<compile_context>
chip_gen: v6e
topology: v6e:2x2x1
jax: 0.10.0
libtpu: 0.0.40
codegen_flags: <defaults>
</compile_context>

<pallas_src>
import functools
import math

import numpy as np

import jax
import jax.numpy as jnp
from jax.experimental import pallas as pl
from jax.experimental.pallas import tpu as pltpu


# ------------------------------ fused HODA kernel ------------------------------
def hoda_kernel(*refs, nl, layer_lens, d):
    """refs = (x, w, b, wo, bo, Q_1..Q_{nl-1}, U_1..U_{nl-1}, out).

    x block is (TB, L0p, D) bf16; the whole ODA stack runs per block and the
    residual sum over layers is written once as an f32 (TB, L0p, D) block.
    """
    x_ref, w_ref, b_ref, wo_ref, bo_ref = refs[:5]
    pool_refs = refs[5:5 + (nl - 1)]
    up_refs = refs[5 + (nl - 1):5 + 2 * (nl - 1)]
    o_ref = refs[-1]

    x = x_ref[...]                                     # (TB, L0p, D) bf16
    tb, l0p, _ = x.shape
    acc = jnp.zeros((tb, l0p, d), jnp.float32)

    for layer in range(nl):                            # static unroll over layers
        l_real, lp = layer_lens[layer]

        if layer == 0:
            xl = x                                     # (TB, lp, D), lp == l0p
        else:
            # Cumulative AvgPool along L as a dense matrix: batched MXU matmul
            # (same batched dot_general form as the attention matmuls below).
            q_mat = pool_refs[layer - 1][...]          # (lp, l0p) bf16, zero-padded
            q_b = jnp.broadcast_to(q_mat[None], (tb, lp, l0p))
            xl = jax.lax.dot_general(
                q_b, x, (((2,), (1,)), ((0,), (0,))),
                preferred_element_type=jnp.float32).astype(jnp.bfloat16)

        # Q/K/V projections: three separate (D, D) matmuls so nothing slices the
        # lane axis at non-128-aligned offsets when D < 128.  lp % 8 == 0, so the
        # (TB, lp, D) <-> (TB*lp, D) reshapes are layout no-ops.
        x2 = xl.reshape(tb * lp, d)

        def proj(idx):
            y = jnp.dot(x2, w_ref[layer, idx],
                        preferred_element_type=jnp.float32) + b_ref[layer, idx]
            return y.reshape(tb, lp, d).astype(jnp.bfloat16)

        q, k, v = proj(0), proj(1), proj(2)

        # scores[b, l, m] = q[b, l, :] . k[b, m, :]; 1/sqrt(D) folded into wq/bq.
        scores = jax.lax.dot_general(q, k, (((2,), (2,)), ((0,), (0,))),
                                     preferred_element_type=jnp.float32)

        # TODO(synk): OffDiagMask source is not provided; assumed to mask the
        # diagonal (l == m) of the LxL score matrix ("off-diagonal attention").
        row = jax.lax.broadcasted_iota(jnp.int32, (lp, lp), 0)
        col = jax.lax.broadcasted_iota(jnp.int32, (lp, lp), 1)
        masked = (row == col) | (col >= l_real)        # also mask zero-padded keys
        scores = scores + jnp.where(masked, jnp.float32(-1e30),
                                    jnp.float32(0.0))[None, :, :]

        # Softmax over keys (dropout is identity in eval mode).  -1e30 instead of
        # -inf keeps fully-masked rows finite; reciprocal uses the EUP slot.
        m = jnp.max(scores, axis=-1, keepdims=True)
        p = jnp.exp(scores - m)
        attn = (p * pl.reciprocal(jnp.sum(p, axis=-1, keepdims=True),
                                  approx=True)).astype(jnp.bfloat16)

        ctx = jax.lax.dot_general(attn, v, (((2,), (1,)), ((0,), (0,))),
                                  preferred_element_type=jnp.float32)  # (TB, lp, D)

        y = (jnp.dot(ctx.reshape(tb * lp, d).astype(jnp.bfloat16), wo_ref[layer],
                     preferred_element_type=jnp.float32)
             + bo_ref[layer]).reshape(tb, lp, d)

        if layer == 0:
            acc = acc + y
        else:
            # Bilinear upsample back to label_len (dense matrix) + residual sum.
            u_mat = up_refs[layer - 1][...]            # (l0p, lp) bf16, zero-padded
            u_b = jnp.broadcast_to(u_mat[None], (tb, l0p, lp))
            acc = acc + jax.lax.dot_general(
                u_b, y.astype(jnp.bfloat16), (((2,), (1,)), ((0,), (0,))),
                preferred_element_type=jnp.float32)

    o_ref[...] = acc


# ------------------------- tiling / hardware heuristics -------------------------
def _round_up(a, m):
    return ((a + m - 1) // m) * m


def _cdiv(a, b):
    return -(-a // b)


def _tpu_vmem_and_cores():
    """VMEM capacity (per core) + a two-TensorCore heuristic (v7x)."""
    vmem = 64 * 1024 * 1024                      # conservative default (v7x per-TC)
    try:
        vmem = int(pltpu.get_tpu_info().vmem_capacity_bytes)
    except Exception:
        pass
    kind = ""
    try:
        kind = jax.devices()[0].device_kind.lower()
    except Exception:
        pass
    two_cores = "7" in kind                      # v7x has 2 TCs; v5e/v6e have 1
    return vmem, two_cores


def _step_bytes(tb, d, lens_padded, nl):
    """Rough per-grid-step VMEM footprint; used only to size TB / vmem_limit."""
    l0p = lens_padded[0]
    io = 2 * tb * l0p * d * 2 + 2 * tb * l0p * d * 4       # dbl-buffered in + out
    weights = nl * (4 * d * d * 2 + 4 * d * 4)
    mats = 2 * sum(2 * lp * l0p * 2 for lp in lens_padded[1:])
    acc = tb * l0p * d * 4

    def layer_tmp(i, lp):
        t = 3 * tb * lp * d * (4 + 2)                       # q/k/v f32 + bf16
        t += tb * lp * lp * (4 + 4 + 2)                     # scores, exp, attn
        t += 2 * tb * lp * d * 4                            # ctx, y
        if i:
            t += 2 * tb * lp * l0p * 2                      # broadcast pool/up mats
        return t

    tmp = max(layer_tmp(i, lp) for i, lp in enumerate(lens_padded))
    return io + weights + mats + acc + int(1.25 * tmp)


def _pick_tb(n, d, lens_padded, nl, budget, two_cores):
    """Largest TB (multiple of 8) under the VMEM budget; TB need not divide N."""
    cap = min(_round_up(max(n, 8), 8), 4096)
    tb = 8
    for cand in range(8, cap + 1, 8):
        if _step_bytes(cand, d, lens_padded, nl) <= budget:
            tb = cand
        else:
            break
    if two_cores:                                # only matters on 2-TC chips (v7x)
        steps = _cdiv(n, tb)
        if steps == 1 and n > 8:
            tb = max(8, _round_up(_cdiv(n, 2), 8))          # give both TCs work
        elif steps > 1 and steps % 2:
            tb = max(8, _round_up(_cdiv(n, steps + 1), 8))  # even step count
    return tb


def _const_index_map(rank):
    def imap(i):
        return (0,) * rank
    return imap


def _const_spec(shape, single_buffer):
    """Full-array block whose index never changes; single-buffered if supported."""
    imap = _const_index_map(len(shape))
    if single_buffer:
        try:
            return pl.BlockSpec(shape, imap, pipeline_mode=pl.Buffered(1))
        except Exception:
            pass
    return pl.BlockSpec(shape, imap)


# ------------------------ pool / bilinear resize matrices ------------------------
def _pool_matrix(lin):
    """PyTorch AvgPool2d(kernel=(3,1), stride=(2,1), padding=(1,0)),
    count_include_pad=True, along the L axis, as a dense (lout, lin) matrix."""
    lout = (lin - 1) // 2 + 1
    m = np.zeros((lout, lin), np.float32)
    for o in range(lout):
        for i in (2 * o - 1, 2 * o, 2 * o + 1):
            if 0 <= i < lin:
                m[o, i] = 1.0 / 3.0
    return m


def _bilinear_matrix(lin, lout):
    """PyTorch F.interpolate(mode='bilinear', align_corners=False) along one axis."""
    m = np.zeros((lout, lin), np.float32)
    scale = lin / lout
    for o in range(lout):
        src = max((o + 0.5) * scale - 0.5, 0.0)
        i0 = min(int(np.floor(src)), lin - 1)
        i1 = min(i0 + 1, lin - 1)
        w1 = src - i0
        m[o, i0] += 1.0 - w1
        m[o, i1] += w1
    return m


# ------------------------------------ params ------------------------------------
def init_params(key, num_layers, d_model):
    """Per-layer ODA parameters, stored as W^T so the kernel computes x @ W
    (equivalent to the 1x1 Conv2d projections y = x W^T + b)."""
    params = []
    for _ in range(num_layers):
        layer = {}
        for name in ("wq", "wk", "wv", "wo"):
            key, k1, k2 = jax.random.split(key, 3)
            layer[name] = (jax.random.normal(k1, (d_model, d_model), jnp.float32)
                           / math.sqrt(d_model))
            layer["b" + name[1]] = (jax.random.normal(k2, (1, d_model), jnp.float32)
                                    * 0.01)
        params.append(layer)
    return params


def pack_hoda_params(params, d_model):
    """Stack per-layer Q/K/V/O weights; fold 1/sqrt(D) into wq/bq; bf16 weights,
    f32 biases (accumulation stays f32 in the kernel)."""
    scale = 1.0 / math.sqrt(d_model)
    w, b, wo, bo = [], [], [], []
    for layer in params:
        w.append(jnp.stack([layer["wq"] * scale, layer["wk"], layer["wv"]]))
        b.append(jnp.stack([layer["bq"] * scale, layer["bk"], layer["bv"]]))
        wo.append(layer["wo"])
        bo.append(layer["bo"])
    return {
        "w": jnp.stack(w).astype(jnp.bfloat16),    # (nl, 3, D, D)
        "b": jnp.stack(b).astype(jnp.float32),     # (nl, 3, 1, D)
        "wo": jnp.stack(wo).astype(jnp.bfloat16),  # (nl, D, D)
        "bo": jnp.stack(bo).astype(jnp.float32),   # (nl, 1, D)
    }


# ------------------------------------- HODA -------------------------------------
@functools.partial(jax.jit, static_argnums=(2, 3, 4))
def hoda_forward(x, params, label_len, enc_in, single_buffer_weights=True):
    """x: (B, label_len, enc_in, d_model) -> same shape (sum of ODA_layer outputs)."""
    B, L, V, D = x.shape
    nl = len(params)
    N = B * V
    L0p = _round_up(L, 8)

    # Per-layer sequence lengths after cumulative AvgPool downsampling.
    lens = [L]
    for _ in range(1, nl):
        lens.append((lens[-1] - 1) // 2 + 1)
    lens_padded = [_round_up(l, 8) for l in lens]
    layer_lens = tuple((lens[i], lens_padded[i]) for i in range(nl))

    # Dense (zero-padded) composite pooling and bilinear upsampling matrices.
    pool_mats, up_mats = [], []
    comp = None
    for i in range(1, nl):
        p = _pool_matrix(lens[i - 1])
        comp = p if comp is None else p @ comp               # (lens[i], L)
        qp = np.zeros((lens_padded[i], L0p), np.float32)
        qp[:lens[i], :L] = comp
        pool_mats.append(jnp.asarray(qp, jnp.bfloat16))
        up = np.zeros((L0p, lens_padded[i]), np.float32)
        up[:L, :lens[i]] = _bilinear_matrix(lens[i], L)
        up_mats.append(jnp.asarray(up, jnp.bfloat16))

    packed = pack_hoda_params(params, D)

    # (B, L, V, D) -> (N, L0p, D) bf16; pad N so TB need not divide it.
    vmem_cap, two_cores = _tpu_vmem_and_cores()
    budget = int(vmem_cap * 0.33)                  # ~42 MiB on v5e/v6e, ~21 MiB v7x
    TB = _pick_tb(N, D, lens_padded, nl, budget, two_cores)
    steps = _cdiv(N, TB)
    Npad = steps * TB

    xg = jnp.transpose(x, (0, 2, 1, 3)).reshape(N, L, D)
    xg = jnp.pad(xg, ((0, Npad - N), (0, L0p - L), (0, 0))).astype(jnp.bfloat16)

    est = _step_bytes(TB, D, lens_padded, nl)
    vmem_limit = int(min(0.9 * vmem_cap, max(32 * 1024 * 1024, 2 * est)))

    kernel = functools.partial(hoda_kernel, nl=nl, layer_lens=layer_lens, d=D)
    in_specs = [pl.BlockSpec((TB, L0p, D), lambda i: (i, 0, 0)),
                _const_spec(tuple(packed["w"].shape), single_buffer_weights),
                _const_spec(tuple(packed["b"].shape), single_buffer_weights),
                _const_spec(tuple(packed["wo"].shape), single_buffer_weights),
                _const_spec(tuple(packed["bo"].shape), single_buffer_weights)]
    in_specs += [_const_spec(tuple(m.shape), single_buffer_weights)
                 for m in pool_mats]
    in_specs += [_const_spec(tuple(m.shape), single_buffer_weights)
                 for m in up_mats]

    out = pl.pallas_call(
        kernel,
        out_shape=jax.ShapeDtypeStruct((Npad, L0p, D), jnp.float32),
        grid=(steps,),
        in_specs=in_specs,
        out_specs=pl.BlockSpec((TB, L0p, D), lambda i: (i, 0, 0)),
        compiler_params=pltpu.CompilerParams(
            dimension_semantics=("parallel",),
            vmem_limit_bytes=vmem_limit),
    )(xg, packed["w"], packed["b"], packed["wo"], packed["bo"],
      *pool_mats, *up_mats)

    out = out[:N, :L]                               # drop N / L padding
    return jnp.transpose(out.reshape(B, V, L, D), (0, 2, 1, 3))


if __name__ == "__main__":
    B, label_len, enc_in, d_model = 2, 8, 4, 32
    num_layers = 2

    key = jax.random.PRNGKey(0)
    kx, kp = jax.random.split(key)
    x = jax.random.normal(kx, (B, label_len, enc_in, d_model), jnp.float32)
    params = init_params(kp, num_layers, d_model)

    try:
        y = hoda_forward(x, params, label_len, enc_in, True)
        jax.block_until_ready(y)
    except Exception:
        # Fallback: identical kernel without the single-buffered-weights request.
        y = hoda_forward(x, params, label_len, enc_in, False)
        jax.block_until_ready(y)

    assert y.shape == (B, label_len, enc_in, d_model)
    assert bool(jnp.all(jnp.isfinite(y)))
    print("KERNEL_OK")
</pallas_src>

<mosaic_0001>
module attributes {stable_mosaic.version = 11 : i64} {
  func.func @hoda_kernel(%arg0: i32, %arg1: memref<8x8x32xbf16, #tpu.memory_space<vmem>>, %arg2: memref<2x3x32x32xbf16, #tpu.memory_space<vmem>>, %arg3: memref<2x3x1x32xf32, #tpu.memory_space<vmem>>, %arg4: memref<2x32x32xbf16, #tpu.memory_space<vmem>>, %arg5: memref<2x1x32xf32, #tpu.memory_space<vmem>>, %arg6: memref<8x8xbf16, #tpu.memory_space<vmem>>, %arg7: memref<8x8xbf16, #tpu.memory_space<vmem>>, %arg8: memref<8x8x32xf32, #tpu.memory_space<vmem>>) attributes {dimension_semantics = [#tpu.dimension_semantics<parallel>], iteration_bounds = array<i64: 1>, scalar_prefetch = 0 : i64, scratch_operands = 0 : i64, tpu.core_type = #tpu.core_type<tc>, window_params = [{transform_indices = @transform_0, window_bounds = array<i64: 8, 8, 32>}, {pipeline_mode = #tpu.pipeline_mode<synchronous>, transform_indices = @transform_1, window_bounds = array<i64: 2, 3, 32, 32>}, {pipeline_mode = #tpu.pipeline_mode<synchronous>, transform_indices = @transform_2, window_bounds = array<i64: 2, 3, 1, 32>}, {pipeline_mode = #tpu.pipeline_mode<synchronous>, transform_indices = @transform_3, window_bounds = array<i64: 2, 32, 32>}, {pipeline_mode = #tpu.pipeline_mode<synchronous>, transform_indices = @transform_4, window_bounds = array<i64: 2, 1, 32>}, {pipeline_mode = #tpu.pipeline_mode<synchronous>, transform_indices = @transform_5, window_bounds = array<i64: 8, 8>}, {pipeline_mode = #tpu.pipeline_mode<synchronous>, transform_indices = @transform_6, window_bounds = array<i64: 8, 8>}, {transform_indices = @transform_7, window_bounds = array<i64: 8, 8, 32>}]} {
    %c0 = arith.constant 0 : index
    %c0_0 = arith.constant 0 : index
    %c0_1 = arith.constant 0 : index
    %0 = vector.load %arg1[%c0, %c0_0, %c0_1] : memref<8x8x32xbf16, #tpu.memory_space<vmem>>, vector<8x8x32xbf16>
    %cst = arith.constant 0.000000e+00 : f32
    %1 = vector.broadcast %cst : f32 to vector<8x8x32xf32>
    %2 = vector.shape_cast %0 : vector<8x8x32xbf16> to vector<64x32xbf16>
    %c0_2 = arith.constant 0 : index
    %c0_3 = arith.constant 0 : index
    %c0_4 = arith.constant 0 : index
    %c0_5 = arith.constant 0 : index
    %3 = vector.load %arg2[%c0_2, %c0_3, %c0_4, %c0_5] : memref<2x3x32x32xbf16, #tpu.memory_space<vmem>>, vector<1x1x32x32xbf16>
    %4 = vector.shape_cast %3 : vector<1x1x32x32xbf16> to vector<32x32xbf16>
    %cst_6 = arith.constant dense<0.000000e+00> : vector<64x32xf32>
    %5 = tpu.matmul %2, %4, %cst_6 {dimension_numbers = #tpu.dot_dimension_numbers<[1], [0], [0], [1], [0, 0, 1, 1], [], []>} : vector<64x32xbf16>, vector<32x32xbf16>, vector<64x32xf32> -> vector<64x32xf32>
    %c0_7 = arith.constant 0 : index
    %c0_8 = arith.constant 0 : index
    %c0_9 = arith.constant 0 : index
    %c0_10 = arith.constant 0 : index
    %6 = vector.load %arg3[%c0_7, %c0_8, %c0_9, %c0_10] : memref<2x3x1x32xf32, #tpu.memory_space<vmem>>, vector<1x1x1x32xf32>
    %7 = vector.shape_cast %6 : vector<1x1x1x32xf32> to vector<1x32xf32>
    %8 = vector.broadcast %7 : vector<1x32xf32> to vector<64x32xf32>
    %9 = arith.addf %5, %8 : vector<64x32xf32>
    %10 = vector.shape_cast %9 : vector<64x32xf32> to vector<8x8x32xf32>
    %11 = arith.truncf %10 : vector<8x8x32xf32> to vector<8x8x32xbf16>
    %c0_11 = arith.constant 0 : index
    %c1 = arith.constant 1 : index
    %c0_12 = arith.constant 0 : index
    %c0_13 = arith.constant 0 : index
    %12 = vector.load %arg2[%c0_11, %c1, %c0_12, %c0_13] : memref<2x3x32x32xbf16, #tpu.memory_space<vmem>>, vector<1x1x32x32xbf16>
    %13 = vector.shape_cast %12 : vector<1x1x32x32xbf16> to vector<32x32xbf16>
    %cst_14 = arith.constant dense<0.000000e+00> : vector<64x32xf32>
    %14 = tpu.matmul %2, %13, %cst_14 {dimension_numbers = #tpu.dot_dimension_numbers<[1], [0], [0], [1], [0, 0, 1, 1], [], []>} : vector<64x32xbf16>, vector<32x32xbf16>, vector<64x32xf32> -> vector<64x32xf32>
    %c0_15 = arith.constant 0 : index
    %c1_16 = arith.constant 1 : index
    %c0_17 = arith.constant 0 : index
    %c0_18 = arith.constant 0 : index
    %15 = vector.load %arg3[%c0_15, %c1_16, %c0_17, %c0_18] : memref<2x3x1x32xf32, #tpu.memory_space<vmem>>, vector<1x1x1x32xf32>
    %16 = vector.shape_cast %15 : vector<1x1x1x32xf32> to vector<1x32xf32>
    %17 = vector.broadcast %16 : vector<1x32xf32> to vector<64x32xf32>
    %18 = arith.addf %14, %17 : vector<64x32xf32>
    %19 = vector.shape_cast %18 : vector<64x32xf32> to vector<8x8x32xf32>
    %20 = arith.truncf %19 : vector<8x8x32xf32> to vector<8x8x32xbf16>
    %c0_19 = arith.constant 0 : index
    %c2 = arith.constant 2 : index
    %c0_20 = arith.constant 0 : index
    %c0_21 = arith.constant 0 : index
    %21 = vector.load %arg2[%c0_19, %c2, %c0_20, %c0_21] : memref<2x3x32x32xbf16, #tpu.memory_space<vmem>>, vector<1x1x32x32xbf16>
    %22 = vector.shape_cast %21 : vector<1x1x32x32xbf16> to vector<32x32xbf16>
    %cst_22 = arith.constant dense<0.000000e+00> : vector<64x32xf32>
    %23 = tpu.matmul %2, %22, %cst_22 {dimension_numbers = #tpu.dot_dimension_numbers<[1], [0], [0], [1], [0, 0, 1, 1], [], []>} : vector<64x32xbf16>, vector<32x32xbf16>, vector<64x32xf32> -> vector<64x32xf32>
    %c0_23 = arith.constant 0 : index
    %c2_24 = arith.constant 2 : index
    %c0_25 = arith.constant 0 : index
    %c0_26 = arith.constant 0 : index
    %24 = vector.load %arg3[%c0_23, %c2_24, %c0_25, %c0_26] : memref<2x3x1x32xf32, #tpu.memory_space<vmem>>, vector<1x1x1x32xf32>
    %25 = vector.shape_cast %24 : vector<1x1x1x32xf32> to vector<1x32xf32>
    %26 = vector.broadcast %25 : vector<1x32xf32> to vector<64x32xf32>
    %27 = arith.addf %23, %26 : vector<64x32xf32>
    %28 = vector.shape_cast %27 : vector<64x32xf32> to vector<8x8x32xf32>
    %29 = arith.truncf %28 : vector<8x8x32xf32> to vector<8x8x32xbf16>
    %cst_27 = arith.constant dense<0.000000e+00> : vector<8x8x8xf32>
    %30 = tpu.matmul %11, %20, %cst_27 {dimension_numbers = #tpu.dot_dimension_numbers<[2], [2], [1], [1], [0, 0, 0, 1, 1, 1], [0], [0]>} : vector<8x8x32xbf16>, vector<8x8x32xbf16>, vector<8x8x8xf32> -> vector<8x8x8xf32>
    %31 = tpu.iota {dimensions = array<i32: 0>} : vector<8x8xi32>
    %32 = tpu.iota {dimensions = array<i32: 1>} : vector<8x8xi32>
    %33 = arith.cmpi eq, %31, %32 : vector<8x8xi32>
    %c8_i32 = arith.constant 8 : i32
    %34 = vector.broadcast %c8_i32 : i32 to vector<8x8xi32>
    %35 = arith.cmpi sge, %32, %34 : vector<8x8xi32>
    %36 = arith.ori %33, %35 : vector<8x8xi1>
    %cst_28 = arith.constant -1.000000e+30 : f32
    %cst_29 = arith.constant 0.000000e+00 : f32
    %37 = vector.broadcast %cst_28 : f32 to vector<8x8xf32>
    %38 = vector.broadcast %cst_29 : f32 to vector<8x8xf32>
    %39 = arith.select %36, %37, %38 : vector<8x8xi1>, vector<8x8xf32>
    %40 = vector.shape_cast %39 : vector<8x8xf32> to vector<1x8x8xf32>
    %41 = vector.broadcast %40 : vector<1x8x8xf32> to vector<8x8x8xf32>
    %42 = arith.addf %30, %41 : vector<8x8x8xf32>
    %cst_30 = arith.constant dense<0xFF800000> : vector<8x8xf32>
    %43 = vector.multi_reduction <maximumf>, %42, %cst_30 [2] : vector<8x8x8xf32> to vector<8x8xf32>
    %44 = vector.shape_cast %43 : vector<8x8xf32> to vector<8x8x1xf32>
    %45 = vector.broadcast %44 : vector<8x8x1xf32> to vector<8x8x8xf32>
    %46 = arith.subf %42, %45 : vector<8x8x8xf32>
    %47 = math.exp %46 : vector<8x8x8xf32>
    %cst_31 = arith.constant dense<0.000000e+00> : vector<8x8xf32>
    %48 = vector.multi_reduction <add>, %47, %cst_31 [2] : vector<8x8x8xf32> to vector<8x8xf32>
    %49 = vector.shape_cast %48 : vector<8x8xf32> to vector<8x8x1xf32>
    %50 = tpu.reciprocal %49 {approx = true} : vector<8x8x1xf32> -> vector<8x8x1xf32>
    %51 = vector.broadcast %50 : vector<8x8x1xf32> to vector<8x8x8xf32>
    %52 = arith.mulf %47, %51 : vector<8x8x8xf32>
    %53 = arith.truncf %52 : vector<8x8x8xf32> to vector<8x8x8xbf16>
    %cst_32 = arith.constant dense<0.000000e+00> : vector<8x8x32xf32>
    %54 = tpu.matmul %53, %29, %cst_32 {dimension_numbers = #tpu.dot_dimension_numbers<[2], [1], [1], [2], [0, 0, 0, 1, 1, 2], [0], [0]>} : vector<8x8x8xbf16>, vector<8x8x32xbf16>, vector<8x8x32xf32> -> vector<8x8x32xf32>
    %55 = vector.shape_cast %54 : vector<8x8x32xf32> to vector<64x32xf32>
    %56 = arith.truncf %55 : vector<64x32xf32> to vector<64x32xbf16>
    %c0_33 = arith.constant 0 : index
    %c0_34 = arith.constant 0 : index
    %c0_35 = arith.constant 0 : index
    %57 = vector.load %arg4[%c0_33, %c0_34, %c0_35] : memref<2x32x32xbf16, #tpu.memory_space<vmem>>, vector<1x32x32xbf16>
    %58 = vector.shape_cast %57 : vector<1x32x32xbf16> to vector<32x32xbf16>
    %cst_36 = arith.constant dense<0.000000e+00> : vector<64x32xf32>
    %59 = tpu.matmul %56, %58, %cst_36 {dimension_numbers = #tpu.dot_dimension_numbers<[1], [0], [0], [1], [0, 0, 1, 1], [], []>} : vector<64x32xbf16>, vector<32x32xbf16>, vector<64x32xf32> -> vector<64x32xf32>
    %c0_37 = arith.constant 0 : index
    %c0_38 = arith.constant 0 : index
    %c0_39 = arith.constant 0 : index
    %60 = vector.load %arg5[%c0_37, %c0_38, %c0_39] : memref<2x1x32xf32, #tpu.memory_space<vmem>>, vector<1x1x32xf32>
    %61 = vector.shape_cast %60 : vector<1x1x32xf32> to vector<1x32xf32>
    %62 = vector.broadcast %61 : vector<1x32xf32> to vector<64x32xf32>
    %63 = arith.addf %59, %62 : vector<64x32xf32>
    %64 = vector.shape_cast %63 : vector<64x32xf32> to vector<8x8x32xf32>
    %65 = arith.addf %1, %64 : vector<8x8x32xf32>
    %c0_40 = arith.constant 0 : index
    %c0_41 = arith.constant 0 : index
    %66 = vector.load %arg6[%c0_40, %c0_41] : memref<8x8xbf16, #tpu.memory_space<vmem>>, vector<8x8xbf16>
    %67 = vector.shape_cast %66 : vector<8x8xbf16> to vector<1x8x8xbf16>
    %68 = vector.shape_cast %67 : vector<1x8x8xbf16> to vector<1x8x8xbf16>
    %69 = vector.broadcast %68 : vector<1x8x8xbf16> to vector<8x8x8xbf16>
    %cst_42 = arith.constant dense<0.000000e+00> : vector<8x8x32xf32>
    %70 = tpu.matmul %69, %0, %cst_42 {dimension_numbers = #tpu.dot_dimension_numbers<[2], [1], [1], [2], [0, 0, 0, 1, 1, 2], [0], [0]>} : vector<8x8x8xbf16>, vector<8x8x32xbf16>, vector<8x8x32xf32> -> vector<8x8x32xf32>
    %71 = arith.truncf %70 : vector<8x8x32xf32> to vector<8x8x32xbf16>
    %72 = vector.shape_cast %71 : vector<8x8x32xbf16> to vector<64x32xbf16>
    %c1_43 = arith.constant 1 : index
    %c0_44 = arith.constant 0 : index
    %c0_45 = arith.constant 0 : index
    %c0_46 = arith.constant 0 : index
    %73 = vector.load %arg2[%c1_43, %c0_44, %c0_45, %c0_46] : memref<2x3x32x32xbf16, #tpu.memory_space<vmem>>, vector<1x1x32x32xbf16>
    %74 = vector.shape_cast %73 : vector<1x1x32x32xbf16> to vector<32x32xbf16>
    %cst_47 = arith.constant dense<0.000000e+00> : vector<64x32xf32>
    %75 = tpu.matmul %72, %74, %cst_47 {dimension_numbers = #tpu.dot_dimension_numbers<[1], [0], [0], [1], [0, 0, 1, 1], [], []>} : vector<64x32xbf16>, vector<32x32xbf16>, vector<64x32xf32> -> vector<64x32xf32>
    %c1_48 = arith.constant 1 : index
    %c0_49 = arith.constant 0 : index
    %c0_50 = arith.constant 0 : index
    %c0_51 = arith.constant 0 : index
    %76 = vector.load %arg3[%c1_48, %c0_49, %c0_50, %c0_51] : memref<2x3x1x32xf32, #tpu.memory_space<vmem>>, vector<1x1x1x32xf32>
    %77 = vector.shape_cast %76 : vector<1x1x1x32xf32> to vector<1x32xf32>
    %78 = vector.broadcast %77 : vector<1x32xf32> to vector<64x32xf32>
    %79 = arith.addf %75, %78 : vector<64x32xf32>
    %80 = vector.shape_cast %79 : vector<64x32xf32> to vector<8x8x32xf32>
    %81 = arith.truncf %80 : vector<8x8x32xf32> to vector<8x8x32xbf16>
    %c1_52 = arith.constant 1 : index
    %c1_53 = arith.constant 1 : index
    %c0_54 = arith.constant 0 : index
    %c0_55 = arith.constant 0 : index
    %82 = vector.load %arg2[%c1_52, %c1_53, %c0_54, %c0_55] : memref<2x3x32x32xbf16, #tpu.memory_space<vmem>>, vector<1x1x32x32xbf16>
    %83 = vector.shape_cast %82 : vector<1x1x32x32xbf16> to vector<32x32xbf16>
    %cst_56 = arith.constant dense<0.000000e+00> : vector<64x32xf32>
    %84 = tpu.matmul %72, %83, %cst_56 {dimension_numbers = #tpu.dot_dimension_numbers<[1], [0], [0], [1], [0, 0, 1, 1], [], []>} : vector<64x32xbf16>, vector<32x32xbf16>, vector<64x32xf32> -> vector<64x32xf32>
    %c1_57 = arith.constant 1 : index
    %c1_58 = arith.constant 1 : index
    %c0_59 = arith.constant 0 : index
    %c0_60 = arith.constant 0 : index
    %85 = vector.load %arg3[%c1_57, %c1_58, %c0_59, %c0_60] : memref<2x3x1x32xf32, #tpu.memory_space<vmem>>, vector<1x1x1x32xf32>
    %86 = vector.shape_cast %85 : vector<1x1x1x32xf32> to vector<1x32xf32>
    %87 = vector.broadcast %86 : vector<1x32xf32> to vector<64x32xf32>
    %88 = arith.addf %84, %87 : vector<64x32xf32>
    %89 = vector.shape_cast %88 : vector<64x32xf32> to vector<8x8x32xf32>
    %90 = arith.truncf %89 : vector<8x8x32xf32> to vector<8x8x32xbf16>
    %c1_61 = arith.constant 1 : index
    %c2_62 = arith.constant 2 : index
    %c0_63 = arith.constant 0 : index
    %c0_64 = arith.constant 0 : index
    %91 = vector.load %arg2[%c1_61, %c2_62, %c0_63, %c0_64] : memref<2x3x32x32xbf16, #tpu.memory_space<vmem>>, vector<1x1x32x32xbf16>
    %92 = vector.shape_cast %91 : vector<1x1x32x32xbf16> to vector<32x32xbf16>
    %cst_65 = arith.constant dense<0.000000e+00> : vector<64x32xf32>
    %93 = tpu.matmul %72, %92, %cst_65 {dimension_numbers = #tpu.dot_dimension_numbers<[1], [0], [0], [1], [0, 0, 1, 1], [], []>} : vector<64x32xbf16>, vector<32x32xbf16>, vector<64x32xf32> -> vector<64x32xf32>
    %c1_66 = arith.constant 1 : index
    %c2_67 = arith.constant 2 : index
    %c0_68 = arith.constant 0 : index
    %c0_69 = arith.constant 0 : index
    %94 = vector.load %arg3[%c1_66, %c2_67, %c0_68, %c0_69] : memref<2x3x1x32xf32, #tpu.memory_space<vmem>>, vector<1x1x1x32xf32>
    %95 = vector.shape_cast %94 : vector<1x1x1x32xf32> to vector<1x32xf32>
    %96 = vector.broadcast %95 : vector<1x32xf32> to vector<64x32xf32>
    %97 = arith.addf %93, %96 : vector<64x32xf32>
    %98 = vector.shape_cast %97 : vector<64x32xf32> to vector<8x8x32xf32>
    %99 = arith.truncf %98 : vector<8x8x32xf32> to vector<8x8x32xbf16>
    %cst_70 = arith.constant dense<0.000000e+00> : vector<8x8x8xf32>
    %100 = tpu.matmul %81, %90, %cst_70 {dimension_numbers = #tpu.dot_dimension_numbers<[2], [2], [1], [1], [0, 0, 0, 1, 1, 1], [0], [0]>} : vector<8x8x32xbf16>, vector<8x8x32xbf16>, vector<8x8x8xf32> -> vector<8x8x8xf32>
    %101 = tpu.iota {dimensions = array<i32: 0>} : vector<8x8xi32>
    %102 = tpu.iota {dimensions = array<i32: 1>} : vector<8x8xi32>
    %103 = arith.cmpi eq, %101, %102 : vector<8x8xi32>
    %c4_i32 = arith.constant 4 : i32
    %104 = vector.broadcast %c4_i32 : i32 to vector<8x8xi32>
    %105 = arith.cmpi sge, %102, %104 : vector<8x8xi32>
    %106 = arith.ori %103, %105 : vector<8x8xi1>
    %cst_71 = arith.constant -1.000000e+30 : f32
    %cst_72 = arith.constant 0.000000e+00 : f32
    %107 = vector.broadcast %cst_71 : f32 to vector<8x8xf32>
    %108 = vector.broadcast %cst_72 : f32 to vector<8x8xf32>
    %109 = arith.select %106, %107, %108 : vector<8x8xi1>, vector<8x8xf32>
    %110 = vector.shape_cast %109 : vector<8x8xf32> to vector<1x8x8xf32>
    %111 = vector.broadcast %110 : vector<1x8x8xf32> to vector<8x8x8xf32>
    %112 = arith.addf %100, %111 : vector<8x8x8xf32>
    %cst_73 = arith.constant dense<0xFF800000> : vector<8x8xf32>
    %113 = vector.multi_reduction <maximumf>, %112, %cst_73 [2] : vector<8x8x8xf32> to vector<8x8xf32>
    %114 = vector.shape_cast %113 : vector<8x8xf32> to vector<8x8x1xf32>
    %115 = vector.broadcast %114 : vector<8x8x1xf32> to vector<8x8x8xf32>
    %116 = arith.subf %112, %115 : vector<8x8x8xf32>
    %117 = math.exp %116 : vector<8x8x8xf32>
    %cst_74 = arith.constant dense<0.000000e+00> : vector<8x8xf32>
    %118 = vector.multi_reduction <add>, %117, %cst_74 [2] : vector<8x8x8xf32> to vector<8x8xf32>
    %119 = vector.shape_cast %118 : vector<8x8xf32> to vector<8x8x1xf32>
    %120 = tpu.reciprocal %119 {approx = true} : vector<8x8x1xf32> -> vector<8x8x1xf32>
    %121 = vector.broadcast %120 : vector<8x8x1xf32> to vector<8x8x8xf32>
    %122 = arith.mulf %117, %121 : vector<8x8x8xf32>
    %123 = arith.truncf %122 : vector<8x8x8xf32> to vector<8x8x8xbf16>
    %cst_75 = arith.constant dense<0.000000e+00> : vector<8x8x32xf32>
    %124 = tpu.matmul %123, %99, %cst_75 {dimension_numbers = #tpu.dot_dimension_numbers<[2], [1], [1], [2], [0, 0, 0, 1, 1, 2], [0], [0]>} : vector<8x8x8xbf16>, vector<8x8x32xbf16>, vector<8x8x32xf32> -> vector<8x8x32xf32>
    %125 = vector.shape_cast %124 : vector<8x8x32xf32> to vector<64x32xf32>
    %126 = arith.truncf %125 : vector<64x32xf32> to vector<64x32xbf16>
    %c1_76 = arith.constant 1 : index
    %c0_77 = arith.constant 0 : index
    %c0_78 = arith.constant 0 : index
    %127 = vector.load %arg4[%c1_76, %c0_77, %c0_78] : memref<2x32x32xbf16, #tpu.memory_space<vmem>>, vector<1x32x32xbf16>
    %128 = vector.shape_cast %127 : vector<1x32x32xbf16> to vector<32x32xbf16>
    %cst_79 = arith.constant dense<0.000000e+00> : vector<64x32xf32>
    %129 = tpu.matmul %126, %128, %cst_79 {dimension_numbers = #tpu.dot_dimension_numbers<[1], [0], [0], [1], [0, 0, 1, 1], [], []>} : vector<64x32xbf16>, vector<32x32xbf16>, vector<64x32xf32> -> vector<64x32xf32>
    %c1_80 = arith.constant 1 : index
    %c0_81 = arith.constant 0 : index
    %c0_82 = arith.constant 0 : index
    %130 = vector.load %arg5[%c1_80, %c0_81, %c0_82] : memref<2x1x32xf32, #tpu.memory_space<vmem>>, vector<1x1x32xf32>
    %131 = vector.shape_cast %130 : vector<1x1x32xf32> to vector<1x32xf32>
    %132 = vector.broadcast %131 : vector<1x32xf32> to vector<64x32xf32>
    %133 = arith.addf %129, %132 : vector<64x32xf32>
    %134 = vector.shape_cast %133 : vector<64x32xf32> to vector<8x8x32xf32>
    %c0_83 = arith.constant 0 : index
    %c0_84 = arith.constant 0 : index
    %135 = vector.load %arg7[%c0_83, %c0_84] : memref<8x8xbf16, #tpu.memory_space<vmem>>, vector<8x8xbf16>
    %136 = vector.shape_cast %135 : vector<8x8xbf16> to vector<1x8x8xbf16>
    %137 = vector.shape_cast %136 : vector<1x8x8xbf16> to vector<1x8x8xbf16>
    %138 = vector.broadcast %137 : vector<1x8x8xbf16> to vector<8x8x8xbf16>
    %139 = arith.truncf %134 : vector<8x8x32xf32> to vector<8x8x32xbf16>
    %cst_85 = arith.constant dense<0.000000e+00> : vector<8x8x32xf32>
    %140 = tpu.matmul %138, %139, %cst_85 {dimension_numbers = #tpu.dot_dimension_numbers<[2], [1], [1], [2], [0, 0, 0, 1, 1, 2], [0], [0]>} : vector<8x8x8xbf16>, vector<8x8x32xbf16>, vector<8x8x32xf32> -> vector<8x8x32xf32>
    %141 = arith.addf %65, %140 : vector<8x8x32xf32>
    %c0_86 = arith.constant 0 : index
    %c0_87 = arith.constant 0 : index
    %c0_88 = arith.constant 0 : index
    %142 = vector.load %arg8[%c0_86, %c0_87, %c0_88] : memref<8x8x32xf32, #tpu.memory_space<vmem>>, vector<8x8x32xf32>
    tpu.vector_store %arg8[%c0_86, %c0_87, %c0_88], %141 {strides = array<i32>} : memref<8x8x32xf32, #tpu.memory_space<vmem>>, vector<8x8x32xf32>,
    return
  }
  func.func @transform_0(%arg0: i32) -> (i32, i32, i32) {
    %c0_i32 = arith.constant 0 : i32
    %c0_i32_0 = arith.constant 0 : i32
    %c0_i32_1 = arith.constant 0 : i32
    return %arg0, %c0_i32, %c0_i32_0 : i32, i32, i32
  }
  func.func @transform_1(%arg0: i32) -> (i32, i32, i32, i32) {
    %c0_i32 = arith.constant 0 : i32
    %c0_i32_0 = arith.constant 0 : i32
    %c0_i32_1 = arith.constant 0 : i32
    %c0_i32_2 = arith.constant 0 : i32
    %c0_i32_3 = arith.constant 0 : i32
    return %c0_i32, %c0_i32_0, %c0_i32_1, %c0_i32_2 : i32, i32, i32, i32
  }
  func.func @transform_2(%arg0: i32) -> (i32, i32, i32, i32) {
    %c0_i32 = arith.constant 0 : i32
    %c0_i32_0 = arith.constant 0 : i32
    %c0_i32_1 = arith.constant 0 : i32
    %c0_i32_2 = arith.constant 0 : i32
    %c0_i32_3 = arith.constant 0 : i32
    return %c0_i32, %c0_i32_0, %c0_i32_1, %c0_i32_2 : i32, i32, i32, i32
  }
  func.func @transform_3(%arg0: i32) -> (i32, i32, i32) {
    %c0_i32 = arith.constant 0 : i32
    %c0_i32_0 = arith.constant 0 : i32
    %c0_i32_1 = arith.constant 0 : i32
    %c0_i32_2 = arith.constant 0 : i32
    return %c0_i32, %c0_i32_0, %c0_i32_1 : i32, i32, i32
  }
  func.func @transform_4(%arg0: i32) -> (i32, i32, i32) {
    %c0_i32 = arith.constant 0 : i32
    %c0_i32_0 = arith.constant 0 : i32
    %c0_i32_1 = arith.constant 0 : i32
    %c0_i32_2 = arith.constant 0 : i32
    return %c0_i32, %c0_i32_0, %c0_i32_1 : i32, i32, i32
  }
  func.func @transform_5(%arg0: i32) -> (i32, i32) {
    %c0_i32 = arith.constant 0 : i32
    %c0_i32_0 = arith.constant 0 : i32
    %c0_i32_1 = arith.constant 0 : i32
    return %c0_i32, %c0_i32_0 : i32, i32
  }
  func.func @transform_6(%arg0: i32) -> (i32, i32) {
    %c0_i32 = arith.constant 0 : i32
    %c0_i32_0 = arith.constant 0 : i32
    %c0_i32_1 = arith.constant 0 : i32
    return %c0_i32, %c0_i32_0 : i32, i32
  }
  func.func @transform_7(%arg0: i32) -> (i32, i32, i32) {
    %c0_i32 = arith.constant 0 : i32
    %c0_i32_0 = arith.constant 0 : i32
    %c0_i32_1 = arith.constant 0 : i32
    return %arg0, %c0_i32, %c0_i32_0 : i32, i32, i32
  }
}

module attributes {stable_mosaic.version = 11 : i64} {
  func.func @hoda_kernel(%arg0: i32, %arg1: memref<8x8x32xbf16, #tpu.memory_space<vmem>>, %arg2: memref<2x3x32x32xbf16, #tpu.memory_space<vmem>>, %arg3: memref<2x3x1x32xf32, #tpu.memory_space<vmem>>, %arg4: memref<2x32x32xbf16, #tpu.memory_space<vmem>>, %arg5: memref<2x1x32xf32, #tpu.memory_space<vmem>>, %arg6: memref<8x8xbf16, #tpu.memory_space<vmem>>, %arg7: memref<8x8xbf16, #tpu.memory_space<vmem>>, %arg8: memref<8x8x32xf32, #tpu.memory_space<vmem>>) attributes {dimension_semantics = [#tpu.dimension_semantics<parallel>], iteration_bounds = array<i64: 1>, scalar_prefetch = 0 : i64, scratch_operands = 0 : i64, tpu.core_type = #tpu.core_type<tc>, window_params = [{transform_indices = @transform_0, window_bounds = array<i64: 8, 8, 32>}, {pipeline_mode = #tpu.pipeline_mode<synchronous>, transform_indices = @transform_1, window_bounds = array<i64: 2, 3, 32, 32>}, {pipeline_mode = #tpu.pipeline_mode<synchronous>, transform_indices = @transform_2, window_bounds = array<i64: 2, 3, 1, 32>}, {pipeline_mode = #tpu.pipeline_mode<synchronous>, transform_indices = @transform_3, window_bounds = array<i64: 2, 32, 32>}, {pipeline_mode = #tpu.pipeline_mode<synchronous>, transform_indices = @transform_4, window_bounds = array<i64: 2, 1, 32>}, {pipeline_mode = #tpu.pipeline_mode<synchronous>, transform_indices = @transform_5, window_bounds = array<i64: 8, 8>}, {pipeline_mode = #tpu.pipeline_mode<synchronous>, transform_indices = @transform_6, window_bounds = array<i64: 8, 8>}, {transform_indices = @transform_7, window_bounds = array<i64: 8, 8, 32>}]} {
    %c0 = arith.constant 0 : index
    %c0_0 = arith.constant 0 : index
    %c0_1 = arith.constant 0 : index
    %0 = vector.load %arg1[%c0, %c0_0, %c0_1] : memref<8x8x32xbf16, #tpu.memory_space<vmem>>, vector<8x8x32xbf16>
    %cst = arith.constant 0.000000e+00 : f32
    %1 = vector.broadcast %cst : f32 to vector<8x8x32xf32>
    %2 = vector.shape_cast %0 : vector<8x8x32xbf16> to vector<64x32xbf16>
    %c0_2 = arith.constant 0 : index
    %c0_3 = arith.constant 0 : index
    %c0_4 = arith.constant 0 : index
    %c0_5 = arith.constant 0 : index
    %3 = vector.load %arg2[%c0_2, %c0_3, %c0_4, %c0_5] : memref<2x3x32x32xbf16, #tpu.memory_space<vmem>>, vector<1x1x32x32xbf16>
    %4 = vector.shape_cast %3 : vector<1x1x32x32xbf16> to vector<32x32xbf16>
    %cst_6 = arith.constant dense<0.000000e+00> : vector<64x32xf32>
    %5 = tpu.matmul %2, %4, %cst_6 {dimension_numbers = #tpu.dot_dimension_numbers<[1], [0], [0], [1], [0, 0, 1, 1], [], []>} : vector<64x32xbf16>, vector<32x32xbf16>, vector<64x32xf32> -> vector<64x32xf32>
    %c0_7 = arith.constant 0 : index
    %c0_8 = arith.constant 0 : index
    %c0_9 = arith.constant 0 : index
    %c0_10 = arith.constant 0 : index
    %6 = vector.load %arg3[%c0_7, %c0_8, %c0_9, %c0_10] : memref<2x3x1x32xf32, #tpu.memory_space<vmem>>, vector<1x1x1x32xf32>
    %7 = vector.shape_cast %6 : vector<1x1x1x32xf32> to vector<1x32xf32>
    %8 = vector.broadcast %7 : vector<1x32xf32> to vector<64x32xf32>
    %9 = arith.addf %5, %8 : vector<64x32xf32>
    %10 = vector.shape_cast %9 : vector<64x32xf32> to vector<8x8x32xf32>
    %11 = arith.truncf %10 : vector<8x8x32xf32> to vector<8x8x32xbf16>
    %c0_11 = arith.constant 0 : index
    %c1 = arith.constant 1 : index
    %c0_12 = arith.constant 0 : index
    %c0_13 = arith.constant 0 : index
    %12 = vector.load %arg2[%c0_11, %c1, %c0_12, %c0_13] : memref<2x3x32x32xbf16, #tpu.memory_space<vmem>>, vector<1x1x32x32xbf16>
    %13 = vector.shape_cast %12 : vector<1x1x32x32xbf16> to vector<32x32xbf16>
    %cst_14 = arith.constant dense<0.000000e+00> : vector<64x32xf32>
    %14 = tpu.matmul %2, %13, %cst_14 {dimension_numbers = #tpu.dot_dimension_numbers<[1], [0], [0], [1], [0, 0, 1, 1], [], []>} : vector<64x32xbf16>, vector<32x32xbf16>, vector<64x32xf32> -> vector<64x32xf32>
    %c0_15 = arith.constant 0 : index
    %c1_16 = arith.constant 1 : index
    %c0_17 = arith.constant 0 : index
    %c0_18 = arith.constant 0 : index
    %15 = vector.load %arg3[%c0_15, %c1_16, %c0_17, %c0_18] : memref<2x3x1x32xf32, #tpu.memory_space<vmem>>, vector<1x1x1x32xf32>
    %16 = vector.shape_cast %15 : vector<1x1x1x32xf32> to vector<1x32xf32>
    %17 = vector.broadcast %16 : vector<1x32xf32> to vector<64x32xf32>
    %18 = arith.addf %14, %17 : vector<64x32xf32>
    %19 = vector.shape_cast %18 : vector<64x32xf32> to vector<8x8x32xf32>
    %20 = arith.truncf %19 : vector<8x8x32xf32> to vector<8x8x32xbf16>
    %c0_19 = arith.constant 0 : index
    %c2 = arith.constant 2 : index
    %c0_20 = arith.constant 0 : index
    %c0_21 = arith.constant 0 : index
    %21 = vector.load %arg2[%c0_19, %c2, %c0_20, %c0_21] : memref<2x3x32x32xbf16, #tpu.memory_space<vmem>>, vector<1x1x32x32xbf16>
    %22 = vector.shape_cast %21 : vector<1x1x32x32xbf16> to vector<32x32xbf16>
    %cst_22 = arith.constant dense<0.000000e+00> : vector<64x32xf32>
    %23 = tpu.matmul %2, %22, %cst_22 {dimension_numbers = #tpu.dot_dimension_numbers<[1], [0], [0], [1], [0, 0, 1, 1], [], []>} : vector<64x32xbf16>, vector<32x32xbf16>, vector<64x32xf32> -> vector<64x32xf32>
    %c0_23 = arith.constant 0 : index
    %c2_24 = arith.constant 2 : index
    %c0_25 = arith.constant 0 : index
    %c0_26 = arith.constant 0 : index
    %24 = vector.load %arg3[%c0_23, %c2_24, %c0_25, %c0_26] : memref<2x3x1x32xf32, #tpu.memory_space<vmem>>, vector<1x1x1x32xf32>
    %25 = vector.shape_cast %24 : vector<1x1x1x32xf32> to vector<1x32xf32>
    %26 = vector.broadcast %25 : vector<1x32xf32> to vector<64x32xf32>
    %27 = arith.addf %23, %26 : vector<64x32xf32>
    %28 = vector.shape_cast %27 : vector<64x32xf32> to vector<8x8x32xf32>
    %29 = arith.truncf %28 : vector<8x8x32xf32> to vector<8x8x32xbf16>
    %cst_27 = arith.constant dense<0.000000e+00> : vector<8x8x8xf32>
    %30 = tpu.matmul %11, %20, %cst_27 {dimension_numbers = #tpu.dot_dimension_numbers<[2], [2], [1], [1], [0, 0, 0, 1, 1, 1], [0], [0]>} : vector<8x8x32xbf16>, vector<8x8x32xbf16>, vector<8x8x8xf32> -> vector<8x8x8xf32>
    %31 = tpu.iota {dimensions = array<i32: 0>} : vector<8x8xi32>
    %32 = tpu.iota {dimensions = array<i32: 1>} : vector<8x8xi32>
    %33 = arith.cmpi eq, %31, %32 : vector<8x8xi32>
    %c8_i32 = arith.constant 8 : i32
    %34 = vector.broadcast %c8_i32 : i32 to vector<8x8xi32>
    %35 = arith.cmpi sge, %32, %34 : vector<8x8xi32>
    %36 = arith.ori %33, %35 : vector<8x8xi1>
    %cst_28 = arith.constant -1.000000e+30 : f32
    %cst_29 = arith.constant 0.000000e+00 : f32
    %37 = vector.broadcast %cst_28 : f32 to vector<8x8xf32>
    %38 = vector.broadcast %cst_29 : f32 to vector<8x8xf32>
    %39 = arith.select %36, %37, %38 : vector<8x8xi1>, vector<8x8xf32>
    %40 = vector.shape_cast %39 : vector<8x8xf32> to vector<1x8x8xf32>
    %41 = vector.broadcast %40 : vector<1x8x8xf32> to vector<8x8x8xf32>
    %42 = arith.addf %30, %41 : vector<8x8x8xf32>
    %cst_30 = arith.constant dense<0xFF800000> : vector<8x8xf32>
    %43 = vector.multi_reduction <maximumf>, %42, %cst_30 [2] : vector<8x8x8xf32> to vector<8x8xf32>
    %44 = vector.shape_cast %43 : vector<8x8xf32> to vector<8x8x1xf32>
    %45 = vector.broadcast %44 : vector<8x8x1xf32> to vector<8x8x8xf32>
    %46 = arith.subf %42, %45 : vector<8x8x8xf32>
    %47 = math.exp %46 : vector<8x8x8xf32>
    %cst_31 = arith.constant dense<0.000000e+00> : vector<8x8xf32>
    %48 = vector.multi_reduction <add>, %47, %cst_31 [2] : vector<8x8x8xf32> to vector<8x8xf32>
    %49 = vector.shape_cast %48 : vector<8x8xf32> to vector<8x8x1xf32>
    %50 = tpu.reciprocal %49 {approx = true} : vector<8x8x1xf32> -> vector<8x8x1xf32>
    %51 = vector.broadcast %50 : vector<8x8x1xf32> to vector<8x8x8xf32>
    %52 = arith.mulf %47, %51 : vector<8x8x8xf32>
    %53 = arith.truncf %52 : vector<8x8x8xf32> to vector<8x8x8xbf16>
    %cst_32 = arith.constant dense<0.000000e+00> : vector<8x8x32xf32>
    %54 = tpu.matmul %53, %29, %cst_32 {dimension_numbers = #tpu.dot_dimension_numbers<[2], [1], [1], [2], [0, 0, 0, 1, 1, 2], [0], [0]>} : vector<8x8x8xbf16>, vector<8x8x32xbf16>, vector<8x8x32xf32> -> vector<8x8x32xf32>
    %55 = vector.shape_cast %54 : vector<8x8x32xf32> to vector<64x32xf32>
    %56 = arith.truncf %55 : vector<64x32xf32> to vector<64x32xbf16>
    %c0_33 = arith.constant 0 : index
    %c0_34 = arith.constant 0 : index
    %c0_35 = arith.constant 0 : index
    %57 = vector.load %arg4[%c0_33, %c0_34, %c0_35] : memref<2x32x32xbf16, #tpu.memory_space<vmem>>, vector<1x32x32xbf16>
    %58 = vector.shape_cast %57 : vector<1x32x32xbf16> to vector<32x32xbf16>
    %cst_36 = arith.constant dense<0.000000e+00> : vector<64x32xf32>
    %59 = tpu.matmul %56, %58, %cst_36 {dimension_numbers = #tpu.dot_dimension_numbers<[1], [0], [0], [1], [0, 0, 1, 1], [], []>} : vector<64x32xbf16>, vector<32x32xbf16>, vector<64x32xf32> -> vector<64x32xf32>
    %c0_37 = arith.constant 0 : index
    %c0_38 = arith.constant 0 : index
    %c0_39 = arith.constant 0 : index
    %60 = vector.load %arg5[%c0_37, %c0_38, %c0_39] : memref<2x1x32xf32, #tpu.memory_space<vmem>>, vector<1x1x32xf32>
    %61 = vector.shape_cast %60 : vector<1x1x32xf32> to vector<1x32xf32>
    %62 = vector.broadcast %61 : vector<1x32xf32> to vector<64x32xf32>
    %63 = arith.addf %59, %62 : vector<64x32xf32>
    %64 = vector.shape_cast %63 : vector<64x32xf32> to vector<8x8x32xf32>
    %65 = arith.addf %1, %64 : vector<8x8x32xf32>
    %c0_40 = arith.constant 0 : index
    %c0_41 = arith.constant 0 : index
    %66 = vector.load %arg6[%c0_40, %c0_41] : memref<8x8xbf16, #tpu.memory_space<vmem>>, vector<8x8xbf16>
    %67 = vector.shape_cast %66 : vector<8x8xbf16> to vector<1x8x8xbf16>
    %68 = vector.shape_cast %67 : vector<1x8x8xbf16> to vector<1x8x8xbf16>
    %69 = vector.broadcast %68 : vector<1x8x8xbf16> to vector<8x8x8xbf16>
    %cst_42 = arith.constant dense<0.000000e+00> : vector<8x8x32xf32>
    %70 = tpu.matmul %69, %0, %cst_42 {dimension_numbers = #tpu.dot_dimension_numbers<[2], [1], [1], [2], [0, 0, 0, 1, 1, 2], [0], [0]>} : vector<8x8x8xbf16>, vector<8x8x32xbf16>, vector<8x8x32xf32> -> vector<8x8x32xf32>
    %71 = arith.truncf %70 : vector<8x8x32xf32> to vector<8x8x32xbf16>
    %72 = vector.shape_cast %71 : vector<8x8x32xbf16> to vector<64x32xbf16>
    %c1_43 = arith.constant 1 : index
    %c0_44 = arith.constant 0 : index
    %c0_45 = arith.constant 0 : index
    %c0_46 = arith.constant 0 : index
    %73 = vector.load %arg2[%c1_43, %c0_44, %c0_45, %c0_46] : memref<2x3x32x32xbf16, #tpu.memory_space<vmem>>, vector<1x1x32x32xbf16>
    %74 = vector.shape_cast %73 : vector<1x1x32x32xbf16> to vector<32x32xbf16>
    %cst_47 = arith.constant dense<0.000000e+00> : vector<64x32xf32>
    %75 = tpu.matmul %72, %74, %cst_47 {dimension_numbers = #tpu.dot_dimension_numbers<[1], [0], [0], [1], [0, 0, 1, 1], [], []>} : vector<64x32xbf16>, vector<32x32xbf16>, vector<64x32xf32> -> vector<64x32xf32>
    %c1_48 = arith.constant 1 : index
    %c0_49 = arith.constant 0 : index
    %c0_50 = arith.constant 0 : index
    %c0_51 = arith.constant 0 : index
    %76 = vector.load %arg3[%c1_48, %c0_49, %c0_50, %c0_51] : memref<2x3x1x32xf32, #tpu.memory_space<vmem>>, vector<1x1x1x32xf32>
    %77 = vector.shape_cast %76 : vector<1x1x1x32xf32> to vector<1x32xf32>
    %78 = vector.broadcast %77 : vector<1x32xf32> to vector<64x32xf32>
    %79 = arith.addf %75, %78 : vector<64x32xf32>
    %80 = vector.shape_cast %79 : vector<64x32xf32> to vector<8x8x32xf32>
    %81 = arith.truncf %80 : vector<8x8x32xf32> to vector<8x8x32xbf16>
    %c1_52 = arith.constant 1 : index
    %c1_53 = arith.constant 1 : index
    %c0_54 = arith.constant 0 : index
    %c0_55 = arith.constant 0 : index
    %82 = vector.load %arg2[%c1_52, %c1_53, %c0_54, %c0_55] : memref<2x3x32x32xbf16, #tpu.memory_space<vmem>>, vector<1x1x32x32xbf16>
    %83 = vector.shape_cast %82 : vector<1x1x32x32xbf16> to vector<32x32xbf16>
    %cst_56 = arith.constant dense<0.000000e+00> : vector<64x32xf32>
    %84 = tpu.matmul %72, %83, %cst_56 {dimension_numbers = #tpu.dot_dimension_numbers<[1], [0], [0], [1], [0, 0, 1, 1], [], []>} : vector<64x32xbf16>, vector<32x32xbf16>, vector<64x32xf32> -> vector<64x32xf32>
    %c1_57 = arith.constant 1 : index
    %c1_58 = arith.constant 1 : index
    %c0_59 = arith.constant 0 : index
    %c0_60 = arith.constant 0 : index
    %85 = vector.load %arg3[%c1_57, %c1_58, %c0_59, %c0_60] : memref<2x3x1x32xf32, #tpu.memory_space<vmem>>, vector<1x1x1x32xf32>
    %86 = vector.shape_cast %85 : vector<1x1x1x32xf32> to vector<1x32xf32>
    %87 = vector.broadcast %86 : vector<1x32xf32> to vector<64x32xf32>
    %88 = arith.addf %84, %87 : vector<64x32xf32>
    %89 = vector.shape_cast %88 : vector<64x32xf32> to vector<8x8x32xf32>
    %90 = arith.truncf %89 : vector<8x8x32xf32> to vector<8x8x32xbf16>
    %c1_61 = arith.constant 1 : index
    %c2_62 = arith.constant 2 : index
    %c0_63 = arith.constant 0 : index
    %c0_64 = arith.constant 0 : index
    %91 = vector.load %arg2[%c1_61, %c2_62, %c0_63, %c0_64] : memref<2x3x32x32xbf16, #tpu.memory_space<vmem>>, vector<1x1x32x32xbf16>
    %92 = vector.shape_cast %91 : vector<1x1x32x32xbf16> to vector<32x32xbf16>
    %cst_65 = arith.constant dense<0.000000e+00> : vector<64x32xf32>
    %93 = tpu.matmul %72, %92, %cst_65 {dimension_numbers = #tpu.dot_dimension_numbers<[1], [0], [0], [1], [0, 0, 1, 1], [], []>} : vector<64x32xbf16>, vector<32x32xbf16>, vector<64x32xf32> -> vector<64x32xf32>
    %c1_66 = arith.constant 1 : index
    %c2_67 = arith.constant 2 : index
    %c0_68 = arith.constant 0 : index
    %c0_69 = arith.constant 0 : index
    %94 = vector.load %arg3[%c1_66, %c2_67, %c0_68, %c0_69] : memref<2x3x1x32xf32, #tpu.memory_space<vmem>>, vector<1x1x1x32xf32>
    %95 = vector.shape_cast %94 : vector<1x1x1x32xf32> to vector<1x32xf32>
    %96 = vector.broadcast %95 : vector<1x32xf32> to vector<64x32xf32>
    %97 = arith.addf %93, %96 : vector<64x32xf32>
    %98 = vector.shape_cast %97 : vector<64x32xf32> to vector<8x8x32xf32>
    %99 = arith.truncf %98 : vector<8x8x32xf32> to vector<8x8x32xbf16>
    %cst_70 = arith.constant dense<0.000000e+00> : vector<8x8x8xf32>
    %100 = tpu.matmul %81, %90, %cst_70 {dimension_numbers = #tpu.dot_dimension_numbers<[2], [2], [1], [1], [0, 0, 0, 1, 1, 1], [0], [0]>} : vector<8x8x32xbf16>, vector<8x8x32xbf16>, vector<8x8x8xf32> -> vector<8x8x8xf32>
    %101 = tpu.iota {dimensions = array<i32: 0>} : vector<8x8xi32>
    %102 = tpu.iota {dimensions = array<i32: 1>} : vector<8x8xi32>
    %103 = arith.cmpi eq, %101, %102 : vector<8x8xi32>
    %c4_i32 = arith.constant 4 : i32
    %104 = vector.broadcast %c4_i32 : i32 to vector<8x8xi32>
    %105 = arith.cmpi sge, %102, %104 : vector<8x8xi32>
    %106 = arith.ori %103, %105 : vector<8x8xi1>
    %cst_71 = arith.constant -1.000000e+30 : f32
    %cst_72 = arith.constant 0.000000e+00 : f32
    %107 = vector.broadcast %cst_71 : f32 to vector<8x8xf32>
    %108 = vector.broadcast %cst_72 : f32 to vector<8x8xf32>
    %109 = arith.select %106, %107, %108 : vector<8x8xi1>, vector<8x8xf32>
    %110 = vector.shape_cast %109 : vector<8x8xf32> to vector<1x8x8xf32>
    %111 = vector.broadcast %110 : vector<1x8x8xf32> to vector<8x8x8xf32>
    %112 = arith.addf %100, %111 : vector<8x8x8xf32>
    %cst_73 = arith.constant dense<0xFF800000> : vector<8x8xf32>
    %113 = vector.multi_reduction <maximumf>, %112, %cst_73 [2] : vector<8x8x8xf32> to vector<8x8xf32>
    %114 = vector.shape_cast %113 : vector<8x8xf32> to vector<8x8x1xf32>
    %115 = vector.broadcast %114 : vector<8x8x1xf32> to vector<8x8x8xf32>
    %116 = arith.subf %112, %115 : vector<8x8x8xf32>
    %117 = math.exp %116 : vector<8x8x8xf32>
    %cst_74 = arith.constant dense<0.000000e+00> : vector<8x8xf32>
    %118 = vector.multi_reduction <add>, %117, %cst_74 [2] : vector<8x8x8xf32> to vector<8x8xf32>
    %119 = vector.shape_cast %118 : vector<8x8xf32> to vector<8x8x1xf32>
    %120 = tpu.reciprocal %119 {approx = true} : vector<8x8x1xf32> -> vector<8x8x1xf32>
    %121 = vector.broadcast %120 : vector<8x8x1xf32> to vector<8x8x8xf32>
    %122 = arith.mulf %117, %121 : vector<8x8x8xf32>
    %123 = arith.truncf %122 : vector<8x8x8xf32> to vector<8x8x8xbf16>
    %cst_75 = arith.constant dense<0.000000e+00> : vector<8x8x32xf32>
    %124 = tpu.matmul %123, %99, %cst_75 {dimension_numbers = #tpu.dot_dimension_numbers<[2], [1], [1], [2], [0, 0, 0, 1, 1, 2], [0], [0]>} : vector<8x8x8xbf16>, vector<8x8x32xbf16>, vector<8x8x32xf32> -> vector<8x8x32xf32>
    %125 = vector.shape_cast %124 : vector<8x8x32xf32> to vector<64x32xf32>
    %126 = arith.truncf %125 : vector<64x32xf32> to vector<64x32xbf16>
    %c1_76 = arith.constant 1 : index
    %c0_77 = arith.constant 0 : index
    %c0_78 = arith.constant 0 : index
    %127 = vector.load %arg4[%c1_76, %c0_77, %c0_78] : memref<2x32x32xbf16, #tpu.memory_space<vmem>>, vector<1x32x32xbf16>
    %128 = vector.shape_cast %127 : vector<1x32x32xbf16> to vector<32x32xbf16>
    %cst_79 = arith.constant dense<0.000000e+00> : vector<64x32xf32>
    %129 = tpu.matmul %126, %128, %cst_79 {dimension_numbers = #tpu.dot_dimension_numbers<[1], [0], [0], [1], [0, 0, 1, 1], [], []>} : vector<64x32xbf16>, vector<32x32xbf16>, vector<64x32xf32> -> vector<64x32xf32>
    %c1_80 = arith.constant 1 : index
    %c0_81 = arith.constant 0 : index
    %c0_82 = arith.constant 0 : index
    %130 = vector.load %arg5[%c1_80, %c0_81, %c0_82] : memref<2x1x32xf32, #tpu.memory_space<vmem>>, vector<1x1x32xf32>
    %131 = vector.shape_cast %130 : vector<1x1x32xf32> to vector<1x32xf32>
    %132 = vector.broadcast %131 : vector<1x32xf32> to vector<64x32xf32>
    %133 = arith.addf %129, %132 : vector<64x32xf32>
    %134 = vector.shape_cast %133 : vector<64x32xf32> to vector<8x8x32xf32>
    %c0_83 = arith.constant 0 : index
    %c0_84 = arith.constant 0 : index
    %135 = vector.load %arg7[%c0_83, %c0_84] : memref<8x8xbf16, #tpu.memory_space<vmem>>, vector<8x8xbf16>
    %136 = vector.shape_cast %135 : vector<8x8xbf16> to vector<1x8x8xbf16>
    %137 = vector.shape_cast %136 : vector<1x8x8xbf16> to vector<1x8x8xbf16>
    %138 = vector.broadcast %137 : vector<1x8x8xbf16> to vector<8x8x8xbf16>
    %139 = arith.truncf %134 : vector<8x8x32xf32> to vector<8x8x32xbf16>
    %cst_85 = arith.constant dense<0.000000e+00> : vector<8x8x32xf32>
    %140 = tpu.matmul %138, %139, %cst_85 {dimension_numbers = #tpu.dot_dimension_numbers<[2], [1], [1], [2], [0, 0, 0, 1, 1, 2], [0], [0]>} : vector<8x8x8xbf16>, vector<8x8x32xbf16>, vector<8x8x32xf32> -> vector<8x8x32xf32>
    %141 = arith.addf %65, %140 : vector<8x8x32xf32>
    %c0_86 = arith.constant 0 : index
    %c0_87 = arith.constant 0 : index
    %c0_88 = arith.constant 0 : index
    %142 = vector.load %arg8[%c0_86, %c0_87, %c0_88] : memref<8x8x32xf32, #tpu.memory_space<vmem>>, vector<8x8x32xf32>
    tpu.vector_store %arg8[%c0_86, %c0_87, %c0_88], %141 {strides = array<i32>} : memref<8x8x32xf32, #tpu.memory_space<vmem>>, vector<8x8x32xf32>,
    return
  }
  func.func @transform_0(%arg0: i32) -> (i32, i32, i32) {
    %c0_i32 = arith.constant 0 : i32
    %c0_i32_0 = arith.constant 0 : i32
    %c0_i32_1 = arith.constant 0 : i32
    return %arg0, %c0_i32, %c0_i32_0 : i32, i32, i32
  }
  func.func @transform_1(%arg0: i32) -> (i32, i32, i32, i32) {
    %c0_i32 = arith.constant 0 : i32
    %c0_i32_0 = arith.constant 0 : i32
    %c0_i32_1 = arith.constant 0 : i32
    %c0_i32_2 = arith.constant 0 : i32
    %c0_i32_3 = arith.constant 0 : i32
    return %c0_i32, %c0_i32_0, %c0_i32_1, %c0_i32_2 : i32, i32, i32, i32
  }
  func.func @transform_2(%arg0: i32) -> (i32, i32, i32, i32) {
    %c0_i32 = arith.constant 0 : i32
    %c0_i32_0 = arith.constant 0 : i32
    %c0_i32_1 = arith.constant 0 : i32
    %c0_i32_2 = arith.constant 0 : i32
    %c0_i32_3 = arith.constant 0 : i32
    return %c0_i32, %c0_i32_0, %c0_i32_1, %c0_i32_2 : i32, i32, i32, i32
  }
  func.func @transform_3(%arg0: i32) -> (i32, i32, i32) {
    %c0_i32 = arith.constant 0 : i32
    %c0_i32_0 = arith.constant 0 : i32
    %c0_i32_1 = arith.constant 0 : i32
    %c0_i32_2 = arith.constant 0 : i32
    return %c0_i32, %c0_i32_0, %c0_i32_1 : i32, i32, i32
  }
  func.func @transform_4(%arg0: i32) -> (i32, i32, i32) {
    %c0_i32 = arith.constant 0 : i32
    %c0_i32_0 = arith.constant 0 : i32
    %c0_i32_1 = arith.constant 0 : i32
    %c0_i32_2 = arith.constant 0 : i32
    return %c0_i32, %c0_i32_0, %c0_i32_1 : i32, i32, i32
  }
  func.func @transform_5(%arg0: i32) -> (i32, i32) {
    %c0_i32 = arith.constant 0 : i32
    %c0_i32_0 = arith.constant 0 : i32
    %c0_i32_1 = arith.constant 0 : i32
    return %c0_i32, %c0_i32_0 : i32, i32
  }
  func.func @transform_6(%arg0: i32) -> (i32, i32) {
    %c0_i32 = arith.constant 0 : i32
    %c0_i32_0 = arith.constant 0 : i32
    %c0_i32_1 = arith.constant 0 : i32
    return %c0_i32, %c0_i32_0 : i32, i32
  }
  func.func @transform_7(%arg0: i32) -> (i32, i32, i32) {
    %c0_i32 = arith.constant 0 : i32
    %c0_i32_0 = arith.constant 0 : i32
    %c0_i32_1 = arith.constant 0 : i32
    return %arg0, %c0_i32, %c0_i32_0 : i32, i32, i32
  }
}

</mosaic_0001>

<bundles_post_ra>
// kernel: hoda_forward.1
= control target key start
LH: loop header
LB: loop body
LE: loop exit
PB: predicated region body
PF: predicated region fallthrough
CT: control target
= control target key end

     0   :  { %vm78_vm0 = vcmask 261120   ;;  %v4073_v18 = vmov 0.0   ;;  %vm4074_vm1 = vmmov 0   ;;  %vm836_vm2 = vcmask 1043456   ;;  %s4777_s1 = inlined_call_operand.vmem [shape: bf16[2,3,32,32], index: 1, kind: input, shape index: {}]   ;;  %s4778_s0 = inlined_call_operand.vmem [shape: bf16[8,8,32], index: 0, kind: input, shape index: {}]   ;;  %s4779_s2 = inlined_call_operand.vmem [shape: f32[2,3,1,32], index: 2, kind: input, shape index: {}]   ;;  %s4780_s3 = inlined_call_operand.vmem [shape: bf16[2,32,32], index: 3, kind: input, shape index: {}]   ;;  %s4781_s5 = inlined_call_operand.vmem [shape: bf16[8,8], index: 5, kind: input, shape index: {}]   ;;  %s4782_s4 = inlined_call_operand.vmem [shape: f32[2,1,32], index: 4, kind: input, shape index: {}]   ;;  %s4783_s6 = inlined_call_operand.vmem [shape: bf16[8,8], index: 6, kind: input, shape index: {}]   ;;  %s4784_s7 = inlined_call_operand.vmem [shape: f32[8,8,32], index: 7, kind: output, shape index: {}]  }
   0x1   :  { %v3989_v0 = vld [vmem:[%s4777_s1 + $0x18] sm:$0xff]   ;;  %v3990_v1 = vld [vmem:[%s4777_s1 + $0x8] sm:$0xff]   ;;  %v3991_v2 = vld [vmem:[%s4777_s1 + $0x10] sm:$0xff]   ;;  %vm736_vm6 = vcmask 64512  }
   0x2   :  { %3615 = vmatprep.subr.bf16.mxu1 %v3989_v0  ;;  %3603 = vmatprep.subr.bf16.mxu0 %v3990_v1  ;;  %v3992_v3 = vld [vmem:[%s4777_s1] sm:$0xff]   ;;  %v4140_v6 = vld [vmem:[%s4778_s0 + $0x8] sm:$0xf]  ;;  %v4147_v8 = vld [vmem:[%s4778_s0 + $0xc] sm:$0xf] }
   0x3   :  { %3616 = vmatpush3.bf16.msra.mxu1 %v3989_v0  ;;  %3604 = vmatpush3.bf16.msra.mxu0 %v3990_v1  ;;  %v4130_v4 = vld [vmem:[%s4778_s0] sm:$0xf]  ;;  %v4135_v5 = vld [vmem:[%s4778_s0 + $0x4] sm:$0xf]  ;;  %v4152_v9 = vld [vmem:[%s4778_s0 + $0x10] sm:$0xf]  ;;  %v3315_v11 = vcombine.low %v4140_v6, %v4147_v8 }
   0x4   :  { %3617 = vmatprep.subr.bf16.mxu1 %v3991_v2  ;;  %3605 = vmatprep.subr.bf16.mxu0 %v3992_v3  ;;  %v3314_v7 = vcombine.low %v4130_v4, %v4135_v5  ;;  %v4157_v10 = vld [vmem:[%s4778_s0 + $0x14] sm:$0xf]  ;;  %v3997_v13 = vld [vmem:[%s4777_s1 + $0x28] sm:$0xff]   ;;  %v3998_v14 = vld [vmem:[%s4777_s1 + $0x20] sm:$0xff]  }
   0x5   :  { %v3316_v12 = vcombine.low %v4152_v9, %v4157_v10  ;;  %v4174_v15 = vld [vmem:[%s4778_s0 + $0x18] sm:$0xf]  ;;  %v4179_v16 = vld [vmem:[%s4778_s0 + $0x1c] sm:$0xf]  ;;  %v4202_v19 = vld [vmem:[%s4779_s2 + $0x1] ss:$0 sm:$0xff] }
   0x6   :  { %3619 = vmatprep.mubr.msk.bf16.mxu1 %vm78_vm0, %v3314_v7  ;;  %3607 = vmatprep.mubr.msk.bf16.mxu0 %vm78_vm0, %v3314_v7  ;;  %v3317_v17 = vcombine.low %v4174_v15, %v4179_v16  ;;  %v4208_v23 = vld [vmem:[%s4779_s2] ss:$0 sm:$0xff]  ;;  %v4233_v54 = vld [vmem:[%s4779_s2 + $0x2] ss:$0 sm:$0xff] }
   0x7   :  { %3618 = vmatpush3.bf16.msra.mxu1 %v3991_v2  ;;  %3606 = vmatpush3.bf16.msra.mxu0 %v3992_v3 }
   0x8   :  { %3627 = vmatprep.subr.bf16.mxu0 %v3997_v13  ;;  %3639 = vmatprep.subr.bf16.mxu1 %v4073_v18 }
   0xa   :  { %3620 = vmatmul.mubr.msk.bf16.vlgmr.msra.gmra.mxu1 %vm78_vm0, %v3315_v11  ;;  %3608 = vmatmul.mubr.msk.bf16.vlgmr.msra.gmra.mxu0 %vm78_vm0, %v3315_v11 }
   0xb   :  { %3623 = vmatprep.mubr.msk.bf16.mxu1 %vm78_vm0, %v3316_v12  ;;  %3611 = vmatprep.mubr.msk.bf16.mxu0 %vm78_vm0, %v3316_v12 }
   0xc   :  { %3628 = vmatpush3.bf16.msra.mxu0 %v3997_v13 }
   0xd   :  { %3629 = vmatprep.subr.bf16.mxu0 %v3998_v14 }
  0x10   :  { %3630 = vmatpush3.bf16.msra.mxu0 %v3998_v14 }
  0x11   :  { %3651 = vmatprep.subr.bf16.mxu0 %v4073_v18 }
  0x12   :  { %3624 = vmatmul.mubr.msk.bf16.gmra.mxu1 %vm78_vm0, %v3317_v17  ;;  %3612 = vmatmul.mubr.msk.bf16.gmra.mxu0 %vm78_vm0, %v3317_v17 }
  0x13   :  { %3631 = vmatprep.mubr.msk.bf16.mxu0 %vm78_vm0, %v3314_v7  ;;  %3641 = vmatprep.mubr.msk.bf16.mxu1 %vm4074_vm1, %v4073_v18 }
  0x1a   :  { %3632 = vmatmul.mubr.msk.bf16.vlgmr.msra.gmra.mxu0 %vm78_vm0, %v3315_v11 }
  0x1b   :  { %3635 = vmatprep.mubr.msk.bf16.mxu0 %vm78_vm0, %v3316_v12 }
  0x22   :  { %3636 = vmatmul.mubr.msk.bf16.gmra.mxu0 %vm78_vm0, %v3317_v17 }
  0x23   :  { %3653 = vmatprep.mubr.msk.bf16.mxu0 %vm4074_vm1, %v4073_v18 }
  0xca   :  { %v3621_v20 = vpop.f32.mrf.mxu1  ;;  %v3609_v22 = vpop.f32.mrf.mxu0 }
  0xcb   :  { %v232_v21 = vadd.f32 %v3621_v20, %v4202_v19  ;;  %v134_v30 = vadd.f32 %v3609_v22, %v4208_v23 }
  0xcc   :  { %v223_v24 = vpop.f32.mrf.mxu1  ;;  %v125_v27 = vpop.f32.mrf.mxu0 }
  0xcd   :  { %v256_v25 = vpack.c.bf16 %v232_v21, %v232_v21  ;;  %v224_v26 = vadd.f32 %v4202_v19, %v223_v24  ;;  %v158_v38 = vpack.c.bf16 %v134_v30, %v134_v30  ;;  %v126_v39 = vadd.f32 %v4208_v23, %v125_v27 }
  0xce   :  { %v3622_v28 = vpop.f32.mrf.mxu1  ;;  %v3610_v32 = vpop.f32.mrf.mxu0 }
  0xcf   :  { %v464_v29 = vsel %vm78_vm0, %v256_v25, 0  ;;  %v254_v31 = vpack.c.bf16 %v224_v26, %v224_v26  ;;  %v156_v45 = vpack.c.bf16 %v126_v39, %v126_v39  ;;  %v235_v49 = vadd.f32 %v3622_v28, %v4202_v19 }
  0xd0   :  { %v226_v33 = vpop.f32.mrf.mxu1  ;;  %3652 = vmatpush3.bf16.xpose.msra.mxu0 %v464_v29  ;;  %v128_v36 = vpop.f32.mrf.mxu0  ;;  %v137_v17 = vadd.f32 %v3610_v32, %v4208_v23 }
  0xd1   :  { %v372_v34 = vsel %vm78_vm0, %v254_v31, 0  ;;  %v227_v35 = vadd.f32 %v4202_v19, %v226_v33  ;;  %3663 = vmatprep.subr.bf16.mxu0 %v4073_v18  ;;  %v129_v56 = vadd.f32 %v4208_v23, %v128_v36  ;;  %v257_v60 = vpack.c.bf16 %v235_v49, %v235_v49 }
  0xd2   :  { %v3625_v37 = vpop.f32.mrf.mxu1  ;;  %3640 = vmatpush3.bf16.xpose.msra.mxu1 %v372_v34  ;;  %v3613_v40 = vpop.f32.mrf.mxu0  ;;  %v159_v28 = vpack.c.bf16 %v137_v17, %v137_v17 }
  0xd3   :  { %3645 = vmatprep.subr.bf16.mxu1 %v4073_v18  ;;  %v255_v42 = vpack.c.bf16 %v227_v35, %v227_v35  ;;  %v248_v46 = vadd.f32 %v3625_v37, %v4202_v19  ;;  %v157_v0 = vpack.c.bf16 %v129_v56, %v129_v56  ;;  %v510_v11 = vsel %vm78_vm0, %v257_v60, 0 }
  0xd4   :  { %v239_v41 = vpop.f32.mrf.mxu1  ;;  %v141_v44 = vpop.f32.mrf.mxu0  ;;  %v150_v12 = vadd.f32 %v3613_v40, %v4208_v23 }
  0xd5   :  { %v240_v43 = vadd.f32 %v4202_v19, %v239_v41  ;;  %v418_v51 = vsel %vm78_vm0, %v255_v42, 0  ;;  %v142_v52 = vadd.f32 %v4208_v23, %v141_v44  ;;  %v260_v57 = vpack.c.bf16 %v248_v46, %v248_v46 }
  0xd6   :  { %v4221_v48 = vpop.f32.mrf.mxu0  ;;  %v3626_v55 = vpop.f32.mrf.mxu1  ;;  %v162_v24 = vpack.c.bf16 %v150_v12, %v150_v12  ;;  %v360_v42 = vlaneseq }
  0xd7   :  { %v258_v47 = vpack.c.bf16 %v240_v43, %v240_v43  ;;  %3654 = vmatmul.mubr.msk.bf16.vlgmr.msra.gmra.mxu0 %vm78_vm0, %v158_v38  ;;  %v160_v61 = vpack.c.bf16 %v142_v52, %v142_v52  ;;  %v648_v1 = vsel %vm78_vm0, %v260_v57, 0  ;;  %v251_v32 = vadd.f32 %v3626_v55, %v4202_v19 }
  0xd8   :  { %3665 = vmatprep.mubr.msk.bf16.mxu0 %vm4074_vm1, %v4073_v18  ;;  %v144_v53 = vpop.f32.mrf.mxu0  ;;  %v242_v63 = vpop.f32.mrf.mxu1  ;;  %v153_v37 = vadd.f32 %v4221_v48, %v4208_v23  ;;  %v4294_v43 = vshrl.u32 %v360_v42, 7 }
  0xd9   :  { %v556_v50 = vsel %vm78_vm0, %v258_v47, 0  ;;  %3642 = vmatmul.mubr.msk.bf16.vlgmr.msra.gmra.mxu1 %vm78_vm0, %v156_v45  ;;  %v243_v13 = vadd.f32 %v4202_v19, %v242_v63  ;;  %v145_v34 = vadd.f32 %v4208_v23, %v144_v53  ;;  %v261_v19 = vpack.c.bf16 %v251_v32, %v251_v32 }
  0xda   :  { %3646 = vmatpush3.bf16.xpose.msra.mxu1 %v418_v51  ;;  %3664 = vmatpush3.bf16.xpose.msra.mxu0 %v556_v50  ;;  %v3633_v58 = vpop.f32.mrf.mxu0  ;;  %v163_v38 = vpack.c.bf16 %v153_v37, %v153_v37  ;;  %v4296_v23 = vand.u32 127, %v360_v42 }
  0xdb   :  { %3647 = vmatprep.mubr.msk.bf16.mxu1 %vm4074_vm1, %v4073_v18  ;;  %3657 = vmatprep.subr.bf16.mxu1 %v4073_v18  ;;  %v4241_v59 = vadd.f32 %v3633_v58, %v4233_v54  ;;  %v259_v25 = vpack.c.bf16 %v243_v13, %v243_v13  ;;  %v161_v35 = vpack.c.bf16 %v145_v34, %v145_v34  ;;  %v694_v36 = vsel %vm78_vm0, %v261_v19, 0 }
  0xdc   :  { %3675 = vmatprep.subr.bf16.mxu0 %v4073_v18  ;;  %v321_v62 = vpop.f32.mrf.mxu0  ;;  %vm364_vm3 = vcmp.eq.s32.totalorder %v4294_v43, %v4296_v23  ;;  %vm365_vm4 = vcmp.ge.s32.totalorder %v4296_v23, 8  ;;  %vm1996_vm7 = vcmp.ge.s32.totalorder %v4296_v23, 4 }
  0xdd   :  { %v322_v3 = vadd.f32 %v4233_v54, %v321_v62  ;;  %v602_v33 = vsel %vm78_vm0, %v259_v25, 0  ;;  %vm366_vm5 = vmor %vm364_vm3, %vm365_vm4 }
  0xde   :  { %v3634_v2 = vpop.f32.mrf.mxu0  ;;  %v367_v45 = vsel %vm366_vm5, -1e+30, %v4073_v18  ;;  %vm1997_vm8 = vmor %vm364_vm3, %vm1996_vm7 }
  0xdf   :  { %v4246_v7 = vadd.f32 %v3634_v2, %v4233_v54  ;;  %v352_v21 = vpack.c.bf16 %v322_v3, %v322_v3 }
  0xe0   :  { %v324_v14 = vpop.f32.mrf.mxu0 }
  0xe1   :  { %3648 = vmatmul.mubr.msk.bf16.vlgmr.msra.gmra.mxu1 %vm78_vm0, %v157_v0  ;;  %3666 = vmatmul.mubr.msk.bf16.vlgmr.msra.gmra.mxu0 %vm78_vm0, %v160_v61  ;;  %v838_v30 = vsel %vm836_vm2, %v352_v21, 0  ;;  %v325_v39 = vadd.f32 %v4233_v54, %v324_v14 }
  0xe2   :  { %3658 = vmatpush3.bf16.xpose.msra.mxu1 %v510_v11  ;;  %3676 = vmatpush3.bf16.xpose.msra.mxu0 %v648_v1  ;;  %v3637_v20 = vpop.f32.mrf.mxu0 }
  0xe3   :  { %3659 = vmatprep.mubr.msk.bf16.mxu1 %vm4074_vm1, %v4073_v18  ;;  %3677 = vmatprep.mubr.msk.bf16.mxu0 %vm4074_vm1, %v4073_v18  ;;  %v4260_v22 = vadd.f32 %v3637_v20, %v4233_v54  ;;  %v353_v40 = vpack.c.bf16 %v325_v39, %v325_v39 }
  0xe4   :  { %3669 = vmatprep.subr.bf16.mxu1 %v4073_v18  ;;  %3687 = vmatprep.subr.bf16.mxu0 %v4073_v18  ;;  %v337_v26 = vpop.f32.mrf.mxu0 }
  0xe5   :  { %v4264_v27 = vadd.f32 %v4233_v54, %v337_v26  ;;  %v884_v41 = vsel %vm836_vm2, %v353_v40, 0 }
  0xe6   :  { %v3638_v29 = vpop.f32.mrf.mxu0 }
  0xe7   :  { %v4268_v31 = vadd.f32 %v3638_v29, %v4233_v54 }
  0xe8   :  { %v4304_v44 = vpop.f32.mrf.mxu0 }
  0xe9   :  { %3660 = vmatmul.mubr.msk.bf16.vlgmr.msra.gmra.mxu1 %vm78_vm0, %v159_v28  ;;  %3678 = vmatmul.mubr.msk.bf16.vlgmr.msra.gmra.mxu0 %vm78_vm0, %v162_v24 }
  0xea   :  { %3670 = vmatpush3.bf16.xpose.msra.mxu1 %v602_v33  ;;  %3671 = vmatprep.mubr.msk.bf16.mxu1 %vm4074_vm1, %v4073_v18 }
  0xeb   :  { %3681 = vmatprep.subr.bf16.mxu1 %v4073_v18  ;;  %3688 = vmatpush3.bf16.msra.mxu0 %v838_v30 }
  0xec   :  { %3689 = vmatprep.mubr.msk.bf16.mxu0 %vm4074_vm1, %v4073_v18  ;;  %3699 = vmatprep.subr.bf16.mxu0 %v4073_v18 }
  0xf1   :  { %3672 = vmatmul.mubr.msk.bf16.vlgmr.msra.gmra.mxu1 %vm78_vm0, %v161_v35 }
  0xf2   :  { %3682 = vmatpush3.bf16.xpose.msra.mxu1 %v694_v36  ;;  %3683 = vmatprep.mubr.msk.bf16.mxu1 %vm4074_vm1, %v4073_v18 }
  0xf3   :  { %3693 = vmatprep.subr.bf16.mxu1 %v4073_v18 }
  0xf9   :  { %3684 = vmatmul.mubr.msk.bf16.vlgmr.msra.gmra.mxu1 %vm78_vm0, %v163_v38 }
  0xfa   :  { %3695 = vmatprep.mubr.msk.bf16.mxu1 %vm4074_vm1, %v4073_v18  ;;  %3694 = vmatpush3.bf16.msra.mxu1 %v884_v41 }
  0xfb   :  { %3705 = vmatprep.subr.bf16.mxu1 %v4073_v18 }
 0x197   :  { %v500_v46 = vpop.f32.mrf.mxu0 }
 0x198   :  { %v501_v47 = vadd.f32 %v500_v46, %v367_v45 }
 0x199   :  { %v408_v48 = vpop.f32.mrf.mxu1  ;;  %v3655_v49 = vpop.f32.mrf.mxu0 }
 0x19a   :  { %v409_v50 = vadd.f32 %v408_v48, %v367_v45  ;;  %v743_v51 = vsel %vm736_vm6, %v501_v47, -inf }
 0x19b   :  { %744 = vmax.xlane.f32.xlu1 %v743_v51  ;;  %v3643_v52 = vpop.f32.mrf.mxu1  ;;  %v503_v53 = vpop.f32.mrf.mxu0 }
 0x19c   :  { %v737_v55 = vsel %vm736_vm6, %v409_v50, -inf }
 0x19d   :  { %v3656_v56 = vpop.f32.mrf.mxu0  ;;  %738 = vmax.xlane.f32.xlu0 %v737_v55  ;;  %v411_v57 = vpop.f32.mrf.mxu1 }
 0x19f   :  { %v3644_v58 = vpop.f32.mrf.mxu1 }
 0x1a1   :  { %v454_v60 = vpop.f32.mrf.mxu1  ;;  %v592_v61 = vpop.f32.mrf.mxu0 }
 0x1a2   :  { %v455_v62 = vadd.f32 %v454_v60, %v367_v45  ;;  %v593_v63 = vadd.f32 %v592_v61, %v367_v45 }
 0x1a3   :  { %v3649_v0 = vpop.f32.mrf.mxu1  ;;  %v3667_v1 = vpop.f32.mrf.mxu0 }
 0x1a4   :  { %v740_v2 = vsel %vm736_vm6, %v455_v62, -inf  ;;  %v749_v12 = vsel %vm736_vm6, %v593_v63, -inf }
 0x1a5   :  { %v595_v3 = vpop.f32.mrf.mxu0  ;;  %741 = vmax.xlane.f32.xlu0 %v740_v2  ;;  %v457_v11 = vpop.f32.mrf.mxu1 }
 0x1a7   :  { %v3650_v13 = vpop.f32.mrf.mxu1  ;;  %v3668_v14 = vpop.f32.mrf.mxu0 }
 0x1a9   :  { %v684_v17 = vpop.f32.mrf.mxu0  ;;  %750 = vmax.xlane.f32.xlu0 %v749_v12  ;;  %v546_v20 = vpop.f32.mrf.mxu1 }
 0x1aa   :  { %v685_v21 = vadd.f32 %v684_v17, %v367_v45  ;;  %v547_v24 = vadd.f32 %v546_v20, %v367_v45 }
 0x1ab   :  { %v3661_v25 = vpop.f32.mrf.mxu1  ;;  %v3679_v26 = vpop.f32.mrf.mxu0 }
 0x1ac   :  { %v755_v28 = vsel %vm736_vm6, %v685_v21, -inf  ;;  %v746_v29 = vsel %vm736_vm6, %v547_v24, -inf }
 0x1ad   :  { %v687_v30 = vpop.f32.mrf.mxu0  ;;  %756 = vmax.xlane.f32.xlu0 %v755_v28  ;;  %747 = vmax.xlane.f32.xlu1 %v746_v29  ;;  %v549_v32 = vpop.f32.mrf.mxu1 }
 0x1af   :  { %v3662_v33 = vpop.f32.mrf.mxu1  ;;  %v3680_v34 = vpop.f32.mrf.mxu0 }
 0x1b1   :  { %v638_v19 = vpop.f32.mrf.mxu1 }
 0x1b2   :  { %v639_v35 = vadd.f32 %v638_v19, %v367_v45 }
 0x1b3   :  { %v3673_v36 = vpop.f32.mrf.mxu1 }
 0x1b4   :  { %v752_v37 = vsel %vm736_vm6, %v639_v35, -inf }
 0x1b5   :  { %753 = vmax.xlane.f32.xlu1 %v752_v37  ;;  %v641_v38 = vpop.f32.mrf.mxu1 }
 0x1b7   :  { %v3674_v39 = vpop.f32.mrf.mxu1 }
 0x1b9   :  { %v730_v40 = vpop.f32.mrf.mxu1 }
 0x1ba   :  { %v731_v41 = vadd.f32 %v730_v40, %v367_v45 }
 0x1bb   :  { %v3685_v42 = vpop.f32.mrf.mxu1 }
 0x1bc   :  { %v758_v46 = vsel %vm736_vm6, %v731_v41, -inf }
 0x1bd   :  { %759 = vmax.xlane.f32.xlu1 %v758_v46  ;;  %v733_v48 = vpop.f32.mrf.mxu1 }
 0x1bf   :  { %v3686_v49 = vpop.f32.mrf.mxu1 }
 0x1c0   :  { %v354_v49 = vpack.c.bf16 %v4241_v59, %v4241_v59  ;;  %v355_v59 = vpack.c.bf16 %v4246_v7, %v4246_v7  ;;  %v341_v7 = vadd.f32 %v4233_v54, %v4304_v44 }
 0x224   :  { %v745_v51 = vpop.xlane.xlu1 %744 }
 0x225   :  { %v763_v52 = vsub.f32 %v501_v47, %v745_v51 }
 0x226   :  { %v739_v53 = vpop.xlane.xlu0 %738 }
 0x227   :  { %v761_v55 = vsub.f32 %v409_v50, %v739_v53  ;;  %v773_v56 = vmul.f32 1.442695, %v763_v52 }
 0x229   :  { %v769_v57 = vmul.f32 1.442695, %v761_v55 }
 0x22b   :  { %4009 = vpow2.f32 %v769_v57  ;;  %v930_v57 = vsel %vm836_vm2, %v354_v49, 0 }
 0x22c   :  { %4011 = vpow2.f32 %v773_v56 }
 0x22e   :  { %v742_v58 = vpop.xlane.xlu0 %741 }
 0x22f   :  { %v762_v60 = vsub.f32 %v455_v62, %v742_v58 }
 0x231   :  { %v771_v61 = vmul.f32 1.442695, %v762_v60 }
 0x232   :  { %v751_v0 = vpop.xlane.xlu0 %750 }
 0x233   :  { %4013 = vpow2.f32 %v771_v61  ;;  %v765_v45 = vsub.f32 %v593_v63, %v751_v0  ;;  %v356_v61 = vpack.c.bf16 %v4264_v27, %v4264_v27 }
 0x235   :  { %v777_v1 = vmul.f32 1.442695, %v765_v45 }
 0x236   :  { %v757_v2 = vpop.xlane.xlu0 %756  ;;  %v748_v3 = vpop.xlane.xlu1 %747 }
 0x237   :  { %4015 = vpow2.f32 %v777_v1  ;;  %v767_v11 = vsub.f32 %v685_v21, %v757_v2  ;;  %v764_v12 = vsub.f32 %v547_v24, %v748_v3 }
 0x238   :  { %v4010_v13 = vpop.eup %4009 }
 0x239   :  { %v781_v47 = vmul.f32 1.442695, %v767_v11  ;;  %v775_v14 = vmul.f32 1.442695, %v764_v12  ;;  %v785_v50 = vsel %vm736_vm6, %v4010_v13, 0.0  ;;  %v4012_v17 = vpop.eup %4011  ;;  %v976_v11 = vsel %vm836_vm2, %v355_v59, 0 }
 0x23a   :  { %786 = vadd.xlane.f32.xlu0 %v785_v50  ;;  %v791_v62 = vsel %vm736_vm6, %v4012_v17, 0.0  ;;  %v1022_v12 = vsel %vm836_vm2, %v356_v61, 0 }
 0x23b   :  { %4017 = vpow2.f32 %v781_v47  ;;  %v358_v47 = vpack.c.bf16 %v4260_v22, %v4260_v22 }
 0x23c   :  { %4019 = vpow2.f32 %v775_v14  ;;  %v357_v14 = vpack.c.bf16 %v341_v7, %v341_v7 }
 0x23e   :  { %792 = vadd.xlane.f32.xlu0 %v791_v62  ;;  %v754_v20 = vpop.xlane.xlu1 %753 }
 0x23f   :  { %v766_v63 = vsub.f32 %v639_v35, %v754_v20  ;;  %v1114_v20 = vsel %vm836_vm2, %v358_v47, 0 }
 0x240   :  { %v4014_v25 = vpop.eup %4013 }
 0x241   :  { %v779_v26 = vmul.f32 1.442695, %v766_v63  ;;  %v788_v28 = vsel %vm736_vm6, %v4014_v25, 0.0  ;;  %v1068_v63 = vsel %vm836_vm2, %v357_v14, 0 }
 0x242   :  { %789 = vadd.xlane.f32.xlu1 %v788_v28  ;;  %v359_v28 = vpack.c.bf16 %v4268_v31, %v4268_v31  ;;  %v3999_v31 = vld [vmem:[%s4780_s3 + $0x8] sm:$0xff]  }
 0x243   :  { %4021 = vpow2.f32 %v779_v26 }
 0x244   :  { %v4016_v21 = vpop.eup %4015 }
 0x245   :  { %v797_v24 = vsel %vm736_vm6, %v4016_v21, 0.0 }
 0x246   :  { %798 = vadd.xlane.f32.xlu0 %v797_v24  ;;  %v760_v29 = vpop.xlane.xlu1 %759 }
 0x247   :  { %v768_v30 = vsub.f32 %v731_v41, %v760_v29  ;;  %v1160_v29 = vsel %vm836_vm2, %v359_v28, 0 }
 0x248   :  { %v4319_v32 = vpop.eup %4017 }
 0x249   :  { %v4020_v33 = vpop.eup %4019  ;;  %v783_v34 = vmul.f32 1.442695, %v768_v30  ;;  %v803_v19 = vsel %vm736_vm6, %v4319_v32, 0.0 }
 0x24a   :  { %804 = vadd.xlane.f32.xlu0 %v803_v19  ;;  %v794_v35 = vsel %vm736_vm6, %v4020_v33, 0.0  ;;  %v1319_v19 = vsel %vm836_vm2, %v4130_v4, 0  ;;  %v1362_v4 = vsel %vm836_vm2, %v4135_v5, 0  ;;  %v1534_v5 = vsel %vm836_vm2, %v4157_v10, 0 }
 0x24b   :  { %4023 = vpow2.f32 %v783_v34  ;;  %795 = vadd.xlane.f32.xlu1 %v794_v35  ;;  %v4000_v34 = vld [vmem:[%s4780_s3] sm:$0xff]  }
 0x24c   :  { %v4393_v35 = vld [vmem:[%s4781_s5] sm:$0xf] }
 0x250   :  { %v4324_v36 = vpop.eup %4021 }
 0x251   :  { %v800_v37 = vsel %vm736_vm6, %v4324_v36, 0.0 }
 0x252   :  { %801 = vadd.xlane.f32.xlu1 %v800_v37 }
 0x258   :  { %v4328_v38 = vpop.eup %4023 }
 0x259   :  { %v806_v39 = vsel %vm736_vm6, %v4328_v38, 0.0 }
 0x25a   :  { %807 = vadd.xlane.f32.xlu1 %v806_v39 }
 0x2c3   :  { %v787_v40 = vpop.xlane.xlu0 %786 }
 0x2c4   :  { %4025 = vrcp.f32 %v787_v40 }
 0x2c7   :  { %v793_v41 = vpop.xlane.xlu0 %792 }
 0x2c8   :  { %4027 = vrcp.f32 %v793_v41 }
 0x2cb   :  { %v790_v42 = vpop.xlane.xlu1 %789 }
 0x2cc   :  { %4029 = vrcp.f32 %v790_v42 }
 0x2cf   :  { %v799_v46 = vpop.xlane.xlu0 %798 }
 0x2d0   :  { %4031 = vrcp.f32 %v799_v46 }
 0x2d1   :  { %v4026_v48 = vpop.eup %4025 }
 0x2d2   :  { %v817_v51 = vmul.f32 %v4026_v48, %v4010_v13 }
 0x2d3   :  { %v805_v56 = vpop.xlane.xlu0 %804 }
 0x2d4   :  { %v796_v52 = vpop.xlane.xlu1 %795  ;;  %v825_v53 = vpack.c.bf16 %v817_v51, %v817_v51 }
 0x2d5   :  { %v4028_v55 = vpop.eup %4027  ;;  %4033 = vrcp.f32 %v796_v52 }
 0x2d6   :  { %3690 = vmatmul.mubr.msk.bf16.vlgmr.msra.gmra.mxu0 %vm736_vm6, %v825_v53  ;;  %4035 = vrcp.f32 %v805_v56  ;;  %v819_v58 = vmul.f32 %v4028_v55, %v4012_v17 }
 0x2d7   :  { %3700 = vmatpush3.bf16.msra.mxu0 %v930_v57  ;;  %3701 = vmatprep.mubr.msk.bf16.mxu0 %vm4074_vm1, %v4073_v18 }
 0x2d8   :  { %3711 = vmatprep.subr.bf16.mxu0 %v4073_v18  ;;  %v827_v2 = vpack.c.bf16 %v819_v58, %v819_v58  ;;  %v1405_v58 = vsel %vm836_vm2, %v4140_v6, 0 }
 0x2d9   :  { %v4030_v60 = vpop.eup %4029 }
 0x2da   :  { %v818_v0 = vmul.f32 %v4030_v60, %v4014_v25 }
 0x2db   :  { %v802_v45 = vpop.xlane.xlu1 %801 }
 0x2dc   :  { %4037 = vrcp.f32 %v802_v45  ;;  %v826_v1 = vpack.c.bf16 %v818_v0, %v818_v0 }
 0x2dd   :  { %v4032_v3 = vpop.eup %4031 }
 0x2de   :  { %3696 = vmatmul.mubr.msk.bf16.vlgmr.msra.gmra.mxu1 %vm736_vm6, %v826_v1  ;;  %3702 = vmatmul.mubr.msk.bf16.vlgmr.msra.gmra.mxu0 %vm736_vm6, %v827_v2  ;;  %v821_v27 = vmul.f32 %v4032_v3, %v4016_v21 }
 0x2df   :  { %3706 = vmatpush3.bf16.msra.mxu1 %v976_v11  ;;  %3712 = vmatpush3.bf16.msra.mxu0 %v1022_v12 }
 0x2e0   :  { %3707 = vmatprep.mubr.msk.bf16.mxu1 %vm4074_vm1, %v4073_v18  ;;  %3713 = vmatprep.mubr.msk.bf16.mxu0 %vm4074_vm1, %v4073_v18  ;;  %v829_v44 = vpack.c.bf16 %v821_v27, %v821_v27 }
 0x2e1   :  { %3717 = vmatprep.subr.bf16.mxu1 %v4073_v18  ;;  %3723 = vmatprep.subr.bf16.mxu0 %v4073_v18 }
 0x2e2   :  { %v4034_v13 = vpop.eup %4033 }
 0x2e3   :  { %v808_v50 = vpop.xlane.xlu1 %807  ;;  %v820_v54 = vmul.f32 %v4034_v13, %v4020_v33  ;;  %v4036_v17 = vpop.eup %4035 }
 0x2e4   :  { %4039 = vrcp.f32 %v808_v50  ;;  %v823_v22 = vmul.f32 %v4036_v17, %v4319_v32  ;;  %v1491_v17 = vsel %vm836_vm2, %v4152_v9, 0 }
 0x2e5   :  { %v828_v62 = vpack.c.bf16 %v820_v54, %v820_v54 }
 0x2e6   :  { %3714 = vmatmul.mubr.msk.bf16.vlgmr.msra.gmra.mxu0 %vm736_vm6, %v829_v44  ;;  %v831_v24 = vpack.c.bf16 %v823_v22, %v823_v22 }
 0x2e7   :  { %3708 = vmatmul.mubr.msk.bf16.vlgmr.msra.gmra.mxu1 %vm736_vm6, %v828_v62  ;;  %3724 = vmatpush3.bf16.msra.mxu0 %v1114_v20  ;;  %v1577_v62 = vsel %vm836_vm2, %v4174_v15, 0 }
 0x2e8   :  { %3718 = vmatpush3.bf16.msra.mxu1 %v1068_v63  ;;  %3719 = vmatprep.mubr.msk.bf16.mxu1 %vm4074_vm1, %v4073_v18 }
 0x2e9   :  { %v4038_v25 = vpop.eup %4037  ;;  %3725 = vmatprep.mubr.msk.bf16.mxu0 %vm4074_vm1, %v4073_v18  ;;  %3729 = vmatprep.subr.bf16.mxu1 %v4073_v18 }
 0x2ea   :  { %v822_v26 = vmul.f32 %v4038_v25, %v4324_v36  ;;  %3735 = vmatprep.subr.bf16.mxu0 %v3999_v31  ;;  %v1448_v36 = vsel %vm836_vm2, %v4147_v8, 0  ;;  %v1620_v8 = vsel %vm836_vm2, %v4179_v16, 0 }
 0x2ec   :  { %v830_v21 = vpack.c.bf16 %v822_v26, %v822_v26 }
 0x2ee   :  { %3726 = vmatmul.mubr.msk.bf16.vlgmr.msra.gmra.mxu0 %vm736_vm6, %v831_v24  ;;  %v4001_v24 = vld [vmem:[%s4777_s1 + $0x38] sm:$0xff]  }
 0x2ef   :  { %3720 = vmatmul.mubr.msk.bf16.vlgmr.msra.gmra.mxu1 %vm736_vm6, %v830_v21  ;;  %3736 = vmatpush3.bf16.msra.mxu0 %v3999_v31  ;;  %v4004_v31 = vld [vmem:[%s4777_s1 + $0x40] sm:$0xff]  }
 0x2f0   :  { %3730 = vmatpush3.bf16.msra.mxu1 %v1160_v29  ;;  %3731 = vmatprep.mubr.msk.bf16.mxu1 %vm4074_vm1, %v4073_v18  ;;  %v4002_v29 = vld [vmem:[%s4777_s1 + $0x48] sm:$0xff]  }
 0x2f1   :  { %v4040_v30 = vpop.eup %4039  ;;  %3747 = vmatprep.subr.bf16.mxu1 %v4073_v18  ;;  %3737 = vmatprep.subr.bf16.mxu0 %v4000_v34 }
 0x2f2   :  { %v824_v32 = vmul.f32 %v4040_v30, %v4328_v38 }
 0x2f3   :  { %3738 = vmatpush3.bf16.msra.mxu0 %v4000_v34 }
 0x2f4   :  { %v832_v33 = vpack.c.bf16 %v824_v32, %v824_v32  ;;  %3759 = vmatprep.subr.bf16.mxu0 %v4073_v18 }
 0x2f7   :  { %3732 = vmatmul.mubr.msk.bf16.vlgmr.msra.gmra.mxu1 %vm736_vm6, %v832_v33  ;;  %v4003_v33 = vld [vmem:[%s4777_s1 + $0x30] sm:$0xff]  }
 0x2f8   :  { %3749 = vmatprep.mubr.msk.bf16.mxu1 %vm4074_vm1, %v4073_v18  ;;  %3748 = vmatpush3.bf16.msra.mxu1 %v1319_v19 }
 0x2f9   :  { %3753 = vmatprep.subr.bf16.mxu1 %v4073_v18 }
 0x2ff   :  { %3750 = vmatmul.mubr.msk.bf16.vlgmr.msra.gmra.mxu1 %vm736_vm6, %v4393_v35 }
 0x300   :  { %3755 = vmatprep.mubr.msk.bf16.mxu1 %vm4074_vm1, %v4073_v18  ;;  %3754 = vmatpush3.bf16.msra.mxu1 %v1362_v4 }
 0x301   :  { %3765 = vmatprep.subr.bf16.mxu1 %v4073_v18 }
 0x307   :  { %3756 = vmatmul.mubr.msk.bf16.vlgmr.msra.gmra.mxu1 %vm736_vm6, %v4393_v35 }
 0x308   :  { %3767 = vmatprep.mubr.msk.bf16.mxu1 %vm4074_vm1, %v4073_v18  ;;  %3766 = vmatpush3.bf16.msra.mxu1 %v1448_v36 }
 0x309   :  { %3777 = vmatprep.subr.bf16.mxu1 %v4073_v18 }
 0x30f   :  { %3768 = vmatmul.mubr.msk.bf16.vlgmr.msra.gmra.mxu1 %vm736_vm6, %v4393_v35 }
 0x310   :  { %3779 = vmatprep.mubr.msk.bf16.mxu1 %vm4074_vm1, %v4073_v18  ;;  %3778 = vmatpush3.bf16.msra.mxu1 %v1534_v5 }
 0x311   :  { %3789 = vmatprep.subr.bf16.mxu1 %v4073_v18 }
 0x317   :  { %3780 = vmatmul.mubr.msk.bf16.vlgmr.msra.gmra.mxu1 %vm736_vm6, %v4393_v35 }
 0x318   :  { %3791 = vmatprep.mubr.msk.bf16.mxu1 %vm4074_vm1, %v4073_v18  ;;  %3790 = vmatpush3.bf16.msra.mxu1 %v1620_v8 }
 0x319   :  { %3807 = vmatprep.subr.bf16.mxu1 %v4002_v29 }
 0x31f   :  { %3792 = vmatmul.mubr.msk.bf16.vlgmr.msra.gmra.mxu1 %vm736_vm6, %v4393_v35 }
 0x320   :  { %3808 = vmatpush3.bf16.msra.mxu1 %v4002_v29 }
 0x321   :  { %3809 = vmatprep.subr.bf16.mxu1 %v4004_v31 }
 0x324   :  { %3810 = vmatpush3.bf16.msra.mxu1 %v4004_v31 }
 0x325   :  { %3831 = vmatprep.subr.bf16.mxu1 %v4073_v18 }
 0x396   :  { %v874_v37 = vpop.f32.mrf.mxu0 }
 0x398   :  { %v3691_v38 = vpop.f32.mrf.mxu0 }
 0x39a   :  { %v877_v39 = vpop.f32.mrf.mxu0 }
 0x39c   :  { %v3692_v10 = vpop.f32.mrf.mxu0 }
 0x39e   :  { %v920_v40 = vpop.f32.mrf.mxu1  ;;  %v966_v41 = vpop.f32.mrf.mxu0 }
 0x39f   :  { %v1202_v42 = vpack.c.bf16 %v920_v40, %v874_v37  ;;  %v4005_v37 = vld [vmem:[%s4777_s1 + $0x58] sm:$0xff]  }
 0x3a0   :  { %v3697_v46 = vpop.f32.mrf.mxu1  ;;  %v3703_v48 = vpop.f32.mrf.mxu0 }
 0x3a1   :  { %3739 = vmatprep.mubr.msk.bf16.mxu0 %vm78_vm0, %v1202_v42 }
 0x3a2   :  { %v923_v49 = vpop.f32.mrf.mxu1  ;;  %v969_v51 = vpop.f32.mrf.mxu0 }
 0x3a4   :  { %v3698_v52 = vpop.f32.mrf.mxu1  ;;  %v3704_v53 = vpop.f32.mrf.mxu0 }
 0x3a6   :  { %v1058_v16 = vpop.f32.mrf.mxu0 }
 0x3a7   :  { %v1012_v55 = vpop.f32.mrf.mxu1 }
 0x3a8   :  { %v1203_v56 = vpack.c.bf16 %v1012_v55, %v966_v41  ;;  %v3715_v57 = vpop.f32.mrf.mxu0  ;;  %v4006_v55 = vld [vmem:[%s4777_s1 + $0x50] sm:$0xff]  }
 0x3a9   :  { %v3709_v60 = vpop.f32.mrf.mxu1 }
 0x3aa   :  { %3740 = vmatmul.mubr.msk.bf16.vlgmr.msra.gmra.mxu0 %vm78_vm0, %v1203_v56  ;;  %v1061_v59 = vpop.f32.mrf.mxu0 }
 0x3ab   :  { %v1015_v61 = vpop.f32.mrf.mxu1  ;;  %3760 = vmatpush3.bf16.msra.mxu0 %v1405_v58 }
 0x3ac   :  { %v3716_v0 = vpop.f32.mrf.mxu0  ;;  %3771 = vmatprep.subr.bf16.mxu0 %v4073_v18 }
 0x3ad   :  { %v3710_v45 = vpop.f32.mrf.mxu1 }
 0x3ae   :  { %v1150_v1 = vpop.f32.mrf.mxu0 }
 0x3af   :  { %v1104_v2 = vpop.f32.mrf.mxu1 }
 0x3b0   :  { %v1204_v3 = vpack.c.bf16 %v1104_v2, %v1058_v16  ;;  %v3727_v11 = vpop.f32.mrf.mxu0 }
 0x3b1   :  { %v3721_v12 = vpop.f32.mrf.mxu1 }
 0x3b2   :  { %3743 = vmatprep.mubr.msk.bf16.mxu0 %vm78_vm0, %v1204_v3  ;;  %v1153_v7 = vpop.f32.mrf.mxu0 }
 0x3b3   :  { %v1107_v27 = vpop.f32.mrf.mxu1  ;;  %v4508_v7 = vld [vmem:[%s4779_s2 + $0x4] ss:$0 sm:$0xff] }
 0x3b4   :  { %v3728_v6 = vpop.f32.mrf.mxu0 }
 0x3b5   :  { %v3722_v13 = vpop.f32.mrf.mxu1 }
 0x3b7   :  { %v1196_v47 = vpop.f32.mrf.mxu1 }
 0x3b8   :  { %v1205_v14 = vpack.c.bf16 %v1196_v47, %v1150_v1 }
 0x3b9   :  { %v3733_v50 = vpop.f32.mrf.mxu1 }
 0x3ba   :  { %3744 = vmatmul.mubr.msk.bf16.gmra.mxu0 %vm78_vm0, %v1205_v14 }
 0x3bb   :  { %v1199_v54 = vpop.f32.mrf.mxu1  ;;  %3761 = vmatprep.mubr.msk.bf16.mxu0 %vm4074_vm1, %v4073_v18 }
 0x3bc   :  { %v4515_v54 = vld [vmem:[%s4779_s2 + $0x3] ss:$0 sm:$0xff] }
 0x3bd   :  { %v3734_v44 = vpop.f32.mrf.mxu1 }
 0x3bf   :  { %v1355_v9 = vpop.f32.mrf.mxu1 }
 0x3c1   :  { %v3751_v20 = vpop.f32.mrf.mxu1 }
 0x3c2   :  { %3762 = vmatmul.mubr.msk.bf16.vlgmr.msra.gmra.mxu0 %vm736_vm6, %v4393_v35 }
 0x3c3   :  { %3772 = vmatpush3.bf16.msra.mxu0 %v1491_v17  ;;  %3773 = vmatprep.mubr.msk.bf16.mxu0 %vm4074_vm1, %v4073_v18  ;;  %v1358_v63 = vpop.f32.mrf.mxu1 }
 0x3c4   :  { %3783 = vmatprep.subr.bf16.mxu0 %v4073_v18 }
 0x3c5   :  { %v3752_v22 = vpop.f32.mrf.mxu1 }
 0x3c7   :  { %v1398_v25 = vpop.f32.mrf.mxu1 }
 0x3c8   :  { %v4448_v26 = vpack.c.bf16 %v1398_v25, %v1355_v9 }
 0x3c9   :  { %v3757_v28 = vpop.f32.mrf.mxu1 }
 0x3ca   :  { %3774 = vmatmul.mubr.msk.bf16.vlgmr.msra.gmra.mxu0 %vm736_vm6, %v4393_v35  ;;  %3811 = vmatprep.mubr.msk.bf16.mxu1 %vm78_vm0, %v4448_v26 }
 0x3cb   :  { %3784 = vmatpush3.bf16.msra.mxu0 %v1577_v62  ;;  %3785 = vmatprep.mubr.msk.bf16.mxu0 %vm4074_vm1, %v4073_v18  ;;  %v1401_v15 = vpop.f32.mrf.mxu1 }
 0x3cc   :  { %3795 = vmatprep.subr.bf16.mxu0 %v4001_v24 }
 0x3cd   :  { %v3758_v21 = vpop.f32.mrf.mxu1 }
 0x3cf   :  { %v1484_v30 = vpop.f32.mrf.mxu1 }
 0x3d1   :  { %v3769_v32 = vpop.f32.mrf.mxu1 }
 0x3d2   :  { %3786 = vmatmul.mubr.msk.bf16.vlgmr.msra.gmra.mxu0 %vm736_vm6, %v4393_v35 }
 0x3d3   :  { %3799 = vmatprep.mubr.msk.bf16.mxu0 %vm78_vm0, %v4448_v26  ;;  %3796 = vmatpush3.bf16.msra.mxu0 %v4001_v24  ;;  %v1487_v34 = vpop.f32.mrf.mxu1 }
 0x3d4   :  { %3797 = vmatprep.subr.bf16.mxu0 %v4003_v33 }
 0x3d5   :  { %v3770_v19 = vpop.f32.mrf.mxu1 }
 0x3d7   :  { %3798 = vmatpush3.bf16.msra.mxu0 %v4003_v33  ;;  %v1570_v35 = vpop.f32.mrf.mxu1 }
 0x3d8   :  { %3819 = vmatprep.subr.bf16.mxu0 %v4005_v37 }
 0x3d9   :  { %v3781_v4 = vpop.f32.mrf.mxu1 }
 0x3db   :  { %v1573_v36 = vpop.f32.mrf.mxu1 }
 0x3dd   :  { %v3782_v5 = vpop.f32.mrf.mxu1 }
 0x3df   :  { %v1656_v8 = vpop.f32.mrf.mxu1 }
 0x3e1   :  { %v3793_v38 = vpop.f32.mrf.mxu1 }
 0x3e3   :  { %v1659_v39 = vpop.f32.mrf.mxu1 }
 0x3e5   :  { %v3794_v10 = vpop.f32.mrf.mxu1 }
 0x3e6   :  { %v4538_v10 = vld [vmem:[%s4779_s2 + $0x5] ss:$0 sm:$0xff] }
 0x46a   :  { %v4470_v40 = vpop.f32.mrf.mxu0 }
 0x46c   :  { %v4472_v41 = vpop.f32.mrf.mxu0 }
 0x46e   :  { %v4474_v42 = vpop.f32.mrf.mxu0 }
 0x470   :  { %v4476_v46 = vpop.f32.mrf.mxu0 }
 0x47a   :  { %v4478_v48 = vpop.f32.mrf.mxu0 }
 0x47c   :  { %v4480_v49 = vpop.f32.mrf.mxu0 }
 0x47e   :  { %v4482_v51 = vpop.f32.mrf.mxu0 }
 0x480   :  { %v4484_v52 = vpop.f32.mrf.mxu0 }
 0x482   :  { %v1441_v53 = vpop.f32.mrf.mxu0 }
 0x483   :  { %v3456_v16 = vpack.c.bf16 %v1484_v30, %v1441_v53 }
 0x484   :  { %v3763_v56 = vpop.f32.mrf.mxu0 }
 0x485   :  { %3800 = vmatmul.mubr.msk.bf16.vlgmr.msra.gmra.mxu0 %vm78_vm0, %v3456_v16  ;;  %3812 = vmatmul.mubr.msk.bf16.vlgmr.msra.gmra.mxu1 %vm78_vm0, %v3456_v16 }
 0x486   :  { %v1444_v57 = vpop.f32.mrf.mxu0  ;;  %3820 = vmatpush3.bf16.msra.mxu0 %v4005_v37 }
 0x487   :  { %3821 = vmatprep.subr.bf16.mxu0 %v4006_v55 }
 0x488   :  { %v3764_v58 = vpop.f32.mrf.mxu0 }
 0x48a   :  { %v1527_v60 = vpop.f32.mrf.mxu0  ;;  %3822 = vmatpush3.bf16.msra.mxu0 %v4006_v55 }
 0x48b   :  { %v3457_v59 = vpack.c.bf16 %v1570_v35, %v1527_v60  ;;  %3843 = vmatprep.subr.bf16.mxu0 %v4073_v18 }
 0x48c   :  { %v3775_v61 = vpop.f32.mrf.mxu0 }
 0x48d   :  { %3803 = vmatprep.mubr.msk.bf16.mxu0 %vm78_vm0, %v3457_v59  ;;  %3815 = vmatprep.mubr.msk.bf16.mxu1 %vm78_vm0, %v3457_v59 }
 0x48e   :  { %v1530_v0 = vpop.f32.mrf.mxu0 }
 0x490   :  { %v3776_v45 = vpop.f32.mrf.mxu0 }
 0x492   :  { %v1613_v1 = vpop.f32.mrf.mxu0 }
 0x493   :  { %v3458_v2 = vpack.c.bf16 %v1656_v8, %v1613_v1 }
 0x494   :  { %v3787_v3 = vpop.f32.mrf.mxu0 }
 0x495   :  { %3804 = vmatmul.mubr.msk.bf16.gmra.mxu0 %vm78_vm0, %v3458_v2  ;;  %3816 = vmatmul.mubr.msk.bf16.gmra.mxu1 %vm78_vm0, %v3458_v2 }
 0x496   :  { %3823 = vmatprep.mubr.msk.bf16.mxu0 %vm78_vm0, %v4448_v26  ;;  %v1616_v11 = vpop.f32.mrf.mxu0  ;;  %3833 = vmatprep.mubr.msk.bf16.mxu1 %vm4074_vm1, %v4073_v18 }
 0x498   :  { %v3788_v12 = vpop.f32.mrf.mxu0 }
 0x49d   :  { %3824 = vmatmul.mubr.msk.bf16.vlgmr.msra.gmra.mxu0 %vm78_vm0, %v3456_v16 }
 0x49e   :  { %3827 = vmatprep.mubr.msk.bf16.mxu0 %vm78_vm0, %v3457_v59 }
 0x4a5   :  { %3828 = vmatmul.mubr.msk.bf16.gmra.mxu0 %vm78_vm0, %v3458_v2 }
 0x4a6   :  { %3845 = vmatprep.mubr.msk.bf16.mxu0 %vm4074_vm1, %v4073_v18 }
 0x545   :  { %v3813_v27 = vpop.f32.mrf.mxu1  ;;  %v3801_v13 = vpop.f32.mrf.mxu0 }
 0x546   :  { %v1868_v6 = vadd.f32 %v3813_v27, %v4508_v7  ;;  %v1770_v63 = vadd.f32 %v3801_v13, %v4515_v54 }
 0x547   :  { %v1859_v47 = vpop.f32.mrf.mxu1  ;;  %v1761_v9 = vpop.f32.mrf.mxu0 }
 0x548   :  { %v1892_v14 = vpack.c.bf16 %v1868_v6, %v1868_v6  ;;  %v1860_v50 = vadd.f32 %v4508_v7, %v1859_v47  ;;  %v1762_v26 = vadd.f32 %v4515_v54, %v1761_v9  ;;  %v1794_v15 = vpack.c.bf16 %v1770_v63, %v1770_v63 }
 0x549   :  { %v3814_v44 = vpop.f32.mrf.mxu1  ;;  %v3802_v28 = vpop.f32.mrf.mxu0 }
 0x54a   :  { %v2095_v17 = vsel %vm78_vm0, %v1892_v14, 0  ;;  %v1890_v62 = vpack.c.bf16 %v1860_v50, %v1860_v50  ;;  %v1792_v24 = vpack.c.bf16 %v1762_v26, %v1762_v26  ;;  %v1871_v30 = vadd.f32 %v3814_v44, %v4508_v7 }
 0x54b   :  { %v1862_v20 = vpop.f32.mrf.mxu1  ;;  %3844 = vmatpush3.bf16.xpose.msra.mxu0 %v2095_v17  ;;  %v1764_v29 = vpop.f32.mrf.mxu0  ;;  %v1773_v60 = vadd.f32 %v3802_v28, %v4515_v54 }
 0x54c   :  { %v2003_v22 = vsel %vm78_vm0, %v1890_v62, 0  ;;  %v1863_v25 = vadd.f32 %v4508_v7, %v1862_v20  ;;  %3855 = vmatprep.subr.bf16.mxu0 %v4073_v18  ;;  %v1765_v34 = vadd.f32 %v4515_v54, %v1764_v29  ;;  %v1893_v4 = vpack.c.bf16 %v1871_v30, %v1871_v30 }
 0x54d   :  { %3832 = vmatpush3.bf16.xpose.msra.mxu1 %v2003_v22  ;;  %v1795_v3 = vpack.c.bf16 %v1773_v60, %v1773_v60 }
 0x54e   :  { %3837 = vmatprep.subr.bf16.mxu1 %v4073_v18  ;;  %v1891_v21 = vpack.c.bf16 %v1863_v25, %v1863_v25  ;;  %v1793_v37 = vpack.c.bf16 %v1765_v34, %v1765_v34  ;;  %v2141_v16 = vsel %vm78_vm0, %v1893_v4, 0  ;;  %v1998_v34 = vsel %vm1997_vm8, -1e+30, %v4073_v18 }
 0x550   :  { %v2049_v32 = vsel %vm78_vm0, %v1891_v21, 0 }
 0x552   :  { %3846 = vmatmul.mubr.msk.bf16.vlgmr.msra.gmra.mxu0 %vm78_vm0, %v1794_v15 }
 0x553   :  { %3857 = vmatprep.mubr.msk.bf16.mxu0 %vm4074_vm1, %v4073_v18 }
 0x554   :  { %3834 = vmatmul.mubr.msk.bf16.vlgmr.msra.gmra.mxu1 %vm78_vm0, %v1792_v24 }
 0x555   :  { %v3805_v33 = vpop.f32.mrf.mxu0  ;;  %v3817_v31 = vpop.f32.mrf.mxu1  ;;  %3838 = vmatpush3.bf16.xpose.msra.mxu1 %v2049_v32  ;;  %3839 = vmatprep.mubr.msk.bf16.mxu1 %vm4074_vm1, %v4073_v18 }
 0x556   :  { %3849 = vmatprep.subr.bf16.mxu1 %v4073_v18  ;;  %v1884_v55 = vadd.f32 %v3817_v31, %v4508_v7  ;;  %v1786_v44 = vadd.f32 %v3805_v33, %v4515_v54 }
 0x557   :  { %v1777_v19 = vpop.f32.mrf.mxu0  ;;  %v1875_v35 = vpop.f32.mrf.mxu1 }
 0x558   :  { %v1876_v36 = vadd.f32 %v4508_v7, %v1875_v35  ;;  %v1778_v59 = vadd.f32 %v4515_v54, %v1777_v19  ;;  %v1896_v45 = vpack.c.bf16 %v1884_v55, %v1884_v55  ;;  %v1798_v25 = vpack.c.bf16 %v1786_v44, %v1786_v44 }
 0x559   :  { %v3806_v5 = vpop.f32.mrf.mxu0  ;;  %v3818_v8 = vpop.f32.mrf.mxu1 }
 0x55a   :  { %v1894_v38 = vpack.c.bf16 %v1876_v36, %v1876_v36  ;;  %v1796_v11 = vpack.c.bf16 %v1778_v59, %v1778_v59  ;;  %v2279_v6 = vsel %vm78_vm0, %v1896_v45, 0  ;;  %v1887_v13 = vadd.f32 %v3818_v8, %v4508_v7 }
 0x55b   :  { %v1780_v39 = vpop.f32.mrf.mxu0  ;;  %v1878_v53 = vpop.f32.mrf.mxu1  ;;  %v1789_v29 = vadd.f32 %v3806_v5, %v4515_v54 }
 0x55c   :  { %v2187_v56 = vsel %vm78_vm0, %v1894_v38, 0  ;;  %3840 = vmatmul.mubr.msk.bf16.vlgmr.msra.gmra.mxu1 %vm78_vm0, %v1793_v37  ;;  %v1879_v57 = vadd.f32 %v4508_v7, %v1878_v53  ;;  %v1781_v17 = vadd.f32 %v4515_v54, %v1780_v39  ;;  %v1897_v9 = vpack.c.bf16 %v1887_v13, %v1887_v13 }
 0x55d   :  { %v3825_v58 = vpop.f32.mrf.mxu0  ;;  %3850 = vmatpush3.bf16.xpose.msra.mxu1 %v2141_v16  ;;  %3856 = vmatpush3.bf16.xpose.msra.mxu0 %v2187_v56  ;;  %v1799_v32 = vpack.c.bf16 %v1789_v29, %v1789_v29 }
 0x55e   :  { %v4548_v61 = vadd.f32 %v3825_v58, %v4538_v10  ;;  %3851 = vmatprep.mubr.msk.bf16.mxu1 %vm4074_vm1, %v4073_v18  ;;  %3861 = vmatprep.subr.bf16.mxu1 %v4073_v18  ;;  %v1895_v1 = vpack.c.bf16 %v1879_v57, %v1879_v57  ;;  %v1797_v26 = vpack.c.bf16 %v1781_v17, %v1781_v17  ;;  %v2325_v15 = vsel %vm78_vm0, %v1897_v9, 0 }
 0x55f   :  { %v1957_v0 = vpop.f32.mrf.mxu0  ;;  %3867 = vmatprep.subr.bf16.mxu0 %v4073_v18 }
 0x560   :  { %v2233_v47 = vsel %vm78_vm0, %v1895_v1, 0  ;;  %v1958_v14 = vadd.f32 %v4538_v10, %v1957_v0 }
 0x561   :  { %v3826_v2 = vpop.f32.mrf.mxu0 }
 0x562   :  { %v4555_v12 = vadd.f32 %v3826_v2, %v4538_v10  ;;  %v1988_v20 = vpack.c.bf16 %v1958_v14, %v1958_v14 }
 0x563   :  { %v1960_v27 = vpop.f32.mrf.mxu0 }
 0x564   :  { %3852 = vmatmul.mubr.msk.bf16.vlgmr.msra.gmra.mxu1 %vm78_vm0, %v1795_v3  ;;  %3858 = vmatmul.mubr.msk.bf16.vlgmr.msra.gmra.mxu0 %vm78_vm0, %v1796_v11  ;;  %v2467_v21 = vsel %vm836_vm2, %v1988_v20, 0  ;;  %v1961_v24 = vadd.f32 %v4538_v10, %v1960_v27 }
 0x565   :  { %v3829_v50 = vpop.f32.mrf.mxu0  ;;  %3862 = vmatpush3.bf16.xpose.msra.mxu1 %v2233_v47  ;;  %3868 = vmatpush3.bf16.xpose.msra.mxu0 %v2279_v6 }
 0x566   :  { %v4566_v62 = vadd.f32 %v3829_v50, %v4538_v10  ;;  %3863 = vmatprep.mubr.msk.bf16.mxu1 %vm4074_vm1, %v4073_v18  ;;  %3869 = vmatprep.mubr.msk.bf16.mxu0 %vm4074_vm1, %v4073_v18  ;;  %v1989_v30 = vpack.c.bf16 %v1961_v24, %v1961_v24 }
 0x567   :  { %v1973_v7 = vpop.f32.mrf.mxu0  ;;  %3873 = vmatprep.subr.bf16.mxu1 %v4073_v18  ;;  %3879 = vmatprep.subr.bf16.mxu0 %v4073_v18 }
 0x568   :  { %v4575_v63 = vadd.f32 %v4538_v10, %v1973_v7  ;;  %v2513_v33 = vsel %vm836_vm2, %v1989_v30, 0 }
 0x569   :  { %v3830_v22 = vpop.f32.mrf.mxu0 }
 0x56a   :  { %v4578_v28 = vadd.f32 %v3830_v22, %v4538_v10 }
 0x56b   :  { %v4598_v54 = vpop.f32.mrf.mxu0 }
 0x56c   :  { %3864 = vmatmul.mubr.msk.bf16.vlgmr.msra.gmra.mxu1 %vm78_vm0, %v1797_v26  ;;  %3870 = vmatmul.mubr.msk.bf16.vlgmr.msra.gmra.mxu0 %vm78_vm0, %v1798_v25 }
 0x56d   :  { %3874 = vmatpush3.bf16.xpose.msra.mxu1 %v2325_v15  ;;  %3880 = vmatpush3.bf16.msra.mxu0 %v2467_v21 }
 0x56e   :  { %3875 = vmatprep.mubr.msk.bf16.mxu1 %vm4074_vm1, %v4073_v18  ;;  %3885 = vmatprep.subr.bf16.mxu1 %v4073_v18 }
 0x56f   :  { %3881 = vmatprep.mubr.msk.bf16.mxu0 %vm4074_vm1, %v4073_v18  ;;  %3891 = vmatprep.subr.bf16.mxu0 %v4073_v18 }
 0x574   :  { %3876 = vmatmul.mubr.msk.bf16.vlgmr.msra.gmra.mxu1 %vm78_vm0, %v1799_v32 }
 0x575   :  { %3886 = vmatpush3.bf16.msra.mxu1 %v2513_v33  ;;  %3887 = vmatprep.mubr.msk.bf16.mxu1 %vm4074_vm1, %v4073_v18 }
 0x576   :  { %3897 = vmatprep.subr.bf16.mxu1 %v4073_v18 }
 0x612   :  { %v2131_v31 = vpop.f32.mrf.mxu0 }
 0x613   :  { %v2132_v8 = vadd.f32 %v2131_v31, %v1998_v34 }
 0x614   :  { %v2039_v19 = vpop.f32.mrf.mxu1  ;;  %v3847_v35 = vpop.f32.mrf.mxu0 }
 0x615   :  { %v2040_v4 = vadd.f32 %v2039_v19, %v1998_v34  ;;  %v2373_v16 = vsel %vm736_vm6, %v2132_v8, -inf }
 0x616   :  { %v3835_v36 = vpop.f32.mrf.mxu1  ;;  %v2134_v5 = vpop.f32.mrf.mxu0 }
 0x617   :  { %v2367_v37 = vsel %vm736_vm6, %v2040_v4, -inf }
 0x618   :  { %v3848_v38 = vpop.f32.mrf.mxu0  ;;  %2368 = vmax.xlane.f32.xlu0 %v2367_v37  ;;  %v2042_v39 = vpop.f32.mrf.mxu1 }
 0x61a   :  { %v3836_v53 = vpop.f32.mrf.mxu1 }
 0x61c   :  { %2374 = vmax.xlane.f32.xlu0 %v2373_v16  ;;  %v2085_v43 = vpop.f32.mrf.mxu1 }
 0x61d   :  { %v2086_v23 = vadd.f32 %v2085_v43, %v1998_v34 }
 0x61e   :  { %v3841_v55 = vpop.f32.mrf.mxu1 }
 0x61f   :  { %v2370_v56 = vsel %vm736_vm6, %v2086_v23, -inf }
 0x620   :  { %2371 = vmax.xlane.f32.xlu1 %v2370_v56  ;;  %v2088_v57 = vpop.f32.mrf.mxu1 }
 0x622   :  { %v3842_v58 = vpop.f32.mrf.mxu1 }
 0x624   :  { %v2177_v60 = vpop.f32.mrf.mxu1  ;;  %v2223_v59 = vpop.f32.mrf.mxu0 }
 0x625   :  { %v2178_v0 = vadd.f32 %v2177_v60, %v1998_v34  ;;  %v2224_v45 = vadd.f32 %v2223_v59, %v1998_v34 }
 0x626   :  { %v3853_v1 = vpop.f32.mrf.mxu1  ;;  %v3859_v2 = vpop.f32.mrf.mxu0 }
 0x627   :  { %v2379_v3 = vsel %vm736_vm6, %v2224_v45, -inf  ;;  %v2376_v11 = vsel %vm736_vm6, %v2178_v0, -inf }
 0x628   :  { %v2226_v27 = vpop.f32.mrf.mxu0  ;;  %2380 = vmax.xlane.f32.xlu0 %v2379_v3  ;;  %2377 = vmax.xlane.f32.xlu1 %v2376_v11  ;;  %v2180_v6 = vpop.f32.mrf.mxu1 }
 0x62a   :  { %v3854_v13 = vpop.f32.mrf.mxu1  ;;  %v3860_v47 = vpop.f32.mrf.mxu0 }
 0x62c   :  { %v2269_v14 = vpop.f32.mrf.mxu1  ;;  %v2315_v50 = vpop.f32.mrf.mxu0 }
 0x62d   :  { %v2270_v44 = vadd.f32 %v2269_v14, %v1998_v34  ;;  %v2316_v17 = vadd.f32 %v2315_v50, %v1998_v34 }
 0x62e   :  { %v3865_v7 = vpop.f32.mrf.mxu1  ;;  %v3871_v9 = vpop.f32.mrf.mxu0 }
 0x62f   :  { %v2385_v20 = vsel %vm736_vm6, %v2316_v17, -inf  ;;  %v2382_v22 = vsel %vm736_vm6, %v2270_v44, -inf }
 0x630   :  { %v2318_v25 = vpop.f32.mrf.mxu0  ;;  %2386 = vmax.xlane.f32.xlu0 %v2385_v20  ;;  %2383 = vmax.xlane.f32.xlu1 %v2382_v22  ;;  %v2272_v26 = vpop.f32.mrf.mxu1 }
 0x632   :  { %v3866_v15 = vpop.f32.mrf.mxu1  ;;  %v3872_v21 = vpop.f32.mrf.mxu0 }
 0x634   :  { %v2361_v24 = vpop.f32.mrf.mxu1 }
 0x635   :  { %v2362_v29 = vadd.f32 %v2361_v24, %v1998_v34 }
 0x636   :  { %v3877_v30 = vpop.f32.mrf.mxu1 }
 0x637   :  { %v2388_v32 = vsel %vm736_vm6, %v2362_v29, -inf  ;;  %v1990_v30 = vpack.c.bf16 %v4548_v61, %v4548_v61  ;;  %v1991_v61 = vpack.c.bf16 %v4555_v12, %v4555_v12  ;;  %v1977_v12 = vadd.f32 %v4538_v10, %v4598_v54 }
 0x638   :  { %2389 = vmax.xlane.f32.xlu1 %v2388_v32  ;;  %v2364_v33 = vpop.f32.mrf.mxu1 }
 0x63a   :  { %v3878_v31 = vpop.f32.mrf.mxu1 }
 0x6a1   :  { %v2369_v19 = vpop.xlane.xlu0 %2368 }
 0x6a2   :  { %v2391_v35 = vsub.f32 %v2040_v4, %v2369_v19 }
 0x6a4   :  { %v2399_v36 = vmul.f32 1.442695, %v2391_v35 }
 0x6a5   :  { %v2375_v5 = vpop.xlane.xlu0 %2374 }
 0x6a6   :  { %4041 = vpow2.f32 %v2399_v36  ;;  %v2393_v37 = vsub.f32 %v2132_v8, %v2375_v5  ;;  %v2559_v36 = vsel %vm836_vm2, %v1990_v30, 0 }
 0x6a8   :  { %v2403_v38 = vmul.f32 1.442695, %v2393_v37 }
 0x6a9   :  { %v2372_v39 = vpop.xlane.xlu1 %2371 }
 0x6aa   :  { %4043 = vpow2.f32 %v2403_v38  ;;  %v2392_v53 = vsub.f32 %v2086_v23, %v2372_v39  ;;  %v1992_v38 = vpack.c.bf16 %v4575_v63, %v4575_v63 }
 0x6ac   :  { %v2401_v16 = vmul.f32 1.442695, %v2392_v53 }
 0x6ae   :  { %4045 = vpow2.f32 %v2401_v16 }
 0x6b1   :  { %v2381_v43 = vpop.xlane.xlu0 %2380  ;;  %v2378_v34 = vpop.xlane.xlu1 %2377 }
 0x6b2   :  { %v2395_v55 = vsub.f32 %v2224_v45, %v2381_v43  ;;  %v2394_v56 = vsub.f32 %v2178_v0, %v2378_v34 }
 0x6b3   :  { %v4042_v57 = vpop.eup %4041 }
 0x6b4   :  { %v2407_v58 = vmul.f32 1.442695, %v2395_v55  ;;  %v2405_v60 = vmul.f32 1.442695, %v2394_v56  ;;  %v2415_v59 = vsel %vm736_vm6, %v4042_v57, 0.0  ;;  %v2605_v55 = vsel %vm836_vm2, %v1991_v61, 0 }
 0x6b5   :  { %2416 = vadd.xlane.f32.xlu0 %v2415_v59  ;;  %v2651_v56 = vsel %vm836_vm2, %v1992_v38, 0  ;;  %v1993_v59 = vpack.c.bf16 %v1977_v12, %v1977_v12 }
 0x6b6   :  { %4047 = vpow2.f32 %v2407_v58  ;;  %v1994_v58 = vpack.c.bf16 %v4566_v62, %v4566_v62 }
 0x6b7   :  { %v4044_v4 = vpop.eup %4043  ;;  %4049 = vpow2.f32 %v2405_v60 }
 0x6b8   :  { %v2421_v8 = vsel %vm736_vm6, %v4044_v4, 0.0 }
 0x6b9   :  { %2422 = vadd.xlane.f32.xlu0 %v2421_v8  ;;  %v2387_v1 = vpop.xlane.xlu0 %2386  ;;  %v2384_v23 = vpop.xlane.xlu1 %2383 }
 0x6ba   :  { %v2397_v2 = vsub.f32 %v2316_v17, %v2387_v1  ;;  %v2396_v3 = vsub.f32 %v2270_v44, %v2384_v23  ;;  %v2743_v1 = vsel %vm836_vm2, %v1994_v58, 0  ;;  %v2697_v23 = vsel %vm836_vm2, %v1993_v59, 0 }
 0x6bb   :  { %v4046_v11 = vpop.eup %4045 }
 0x6bc   :  { %v2411_v27 = vmul.f32 1.442695, %v2397_v2  ;;  %v2409_v45 = vmul.f32 1.442695, %v2396_v3  ;;  %v2418_v0 = vsel %vm736_vm6, %v4046_v11, 0.0 }
 0x6bd   :  { %2419 = vadd.xlane.f32.xlu1 %v2418_v0 }
 0x6be   :  { %4051 = vpow2.f32 %v2411_v27 }
 0x6bf   :  { %4053 = vpow2.f32 %v2409_v45 }
 0x6c1   :  { %v2390_v6 = vpop.xlane.xlu1 %2389 }
 0x6c2   :  { %v2398_v13 = vsub.f32 %v2362_v29, %v2390_v6 }
 0x6c3   :  { %v4048_v47 = vpop.eup %4047 }
 0x6c4   :  { %v4615_v14 = vpop.eup %4049  ;;  %v2413_v50 = vmul.f32 1.442695, %v2398_v13  ;;  %v2427_v7 = vsel %vm736_vm6, %v4048_v47, 0.0 }
 0x6c5   :  { %2428 = vadd.xlane.f32.xlu0 %v2427_v7  ;;  %v2424_v44 = vsel %vm736_vm6, %v4615_v14, 0.0 }
 0x6c6   :  { %4055 = vpow2.f32 %v2413_v50  ;;  %2425 = vadd.xlane.f32.xlu1 %v2424_v44  ;;  %v4008_v50 = vld [vmem:[%s4780_s3 + $0x10] sm:$0xff]  }
 0x6cb   :  { %v4620_v17 = vpop.eup %4051 }
 0x6cc   :  { %v4622_v9 = vpop.eup %4053  ;;  %v2433_v20 = vsel %vm736_vm6, %v4620_v17, 0.0 }
 0x6cd   :  { %2434 = vadd.xlane.f32.xlu0 %v2433_v20  ;;  %v2430_v22 = vsel %vm736_vm6, %v4622_v9, 0.0 }
 0x6ce   :  { %2431 = vadd.xlane.f32.xlu1 %v2430_v22 }
 0x6d3   :  { %v4628_v25 = vpop.eup %4055 }
 0x6d4   :  { %v2436_v26 = vsel %vm736_vm6, %v4628_v25, 0.0 }
 0x6d5   :  { %2437 = vadd.xlane.f32.xlu1 %v2436_v26 }
 0x73e   :  { %v2417_v15 = vpop.xlane.xlu0 %2416 }
 0x73f   :  { %4057 = vrcp.f32 %v2417_v15 }
 0x742   :  { %v2423_v21 = vpop.xlane.xlu0 %2422 }
 0x743   :  { %4059 = vrcp.f32 %v2423_v21 }
 0x746   :  { %v2420_v24 = vpop.xlane.xlu1 %2419 }
 0x747   :  { %4061 = vrcp.f32 %v2420_v24 }
 0x74c   :  { %v4058_v29 = vpop.eup %4057 }
 0x74d   :  { %v2447_v32 = vmul.f32 %v4058_v29, %v4042_v57 }
 0x74e   :  { %v2429_v33 = vpop.xlane.xlu0 %2428 }
 0x74f   :  { %4063 = vrcp.f32 %v2429_v33  ;;  %v2426_v31 = vpop.xlane.xlu1 %2425  ;;  %v2455_v19 = vpack.c.bf16 %v2447_v32, %v2447_v32 }
 0x750   :  { %v4060_v35 = vpop.eup %4059  ;;  %4065 = vrcp.f32 %v2426_v31 }
 0x751   :  { %3882 = vmatmul.mubr.msk.bf16.vlgmr.msra.gmra.mxu0 %vm736_vm6, %v2455_v19  ;;  %v2449_v5 = vmul.f32 %v4060_v35, %v4044_v4 }
 0x752   :  { %3892 = vmatpush3.bf16.msra.mxu0 %v2559_v36  ;;  %3893 = vmatprep.mubr.msk.bf16.mxu0 %vm4074_vm1, %v4073_v18 }
 0x753   :  { %3903 = vmatprep.subr.bf16.mxu0 %v4073_v18  ;;  %v2457_v34 = vpack.c.bf16 %v2449_v5, %v2449_v5 }
 0x754   :  { %v4062_v37 = vpop.eup %4061 }
 0x755   :  { %v2448_v39 = vmul.f32 %v4062_v37, %v4046_v11  ;;  %v1995_v11 = vpack.c.bf16 %v4578_v28, %v4578_v28 }
 0x756   :  { %v2435_v53 = vpop.xlane.xlu0 %2434 }
 0x757   :  { %4067 = vrcp.f32 %v2435_v53  ;;  %v2432_v16 = vpop.xlane.xlu1 %2431  ;;  %v2456_v43 = vpack.c.bf16 %v2448_v39, %v2448_v39  ;;  %v2789_v6 = vsel %vm836_vm2, %v1995_v11, 0 }
 0x758   :  { %4069 = vrcp.f32 %v2432_v16 }
 0x759   :  { %3888 = vmatmul.mubr.msk.bf16.vlgmr.msra.gmra.mxu1 %vm736_vm6, %v2456_v43  ;;  %3894 = vmatmul.mubr.msk.bf16.vlgmr.msra.gmra.mxu0 %vm736_vm6, %v2457_v34 }
 0x75a   :  { %3898 = vmatpush3.bf16.msra.mxu1 %v2605_v55  ;;  %3904 = vmatpush3.bf16.msra.mxu0 %v2651_v56 }
 0x75b   :  { %3899 = vmatprep.mubr.msk.bf16.mxu1 %vm4074_vm1, %v4073_v18  ;;  %3905 = vmatprep.mubr.msk.bf16.mxu0 %vm4074_vm1, %v4073_v18 }
 0x75c   :  { %v4064_v63 = vpop.eup %4063  ;;  %3909 = vmatprep.subr.bf16.mxu1 %v4073_v18  ;;  %3915 = vmatprep.subr.bf16.mxu0 %v4073_v18 }
 0x75d   :  { %v4066_v57 = vpop.eup %4065  ;;  %v2451_v60 = vmul.f32 %v4064_v63, %v4048_v47 }
 0x75e   :  { %v2438_v10 = vpop.xlane.xlu1 %2437  ;;  %v2450_v54 = vmul.f32 %v4066_v57, %v4615_v14  ;;  %v4007_v14 = vld [vmem:[%s4780_s3 + $0x18] sm:$0xff]  }
 0x75f   :  { %4071 = vrcp.f32 %v2438_v10  ;;  %v2459_v4 = vpack.c.bf16 %v2451_v60, %v2451_v60  ;;  %v3440_v10 = vld [vmem:[%s4782_s4 + $0x1] ss:$0 sm:$0xff] }
 0x760   :  { %v2458_v8 = vpack.c.bf16 %v2450_v54, %v2450_v54 }
 0x761   :  { %3906 = vmatmul.mubr.msk.bf16.vlgmr.msra.gmra.mxu0 %vm736_vm6, %v2459_v4 }
 0x762   :  { %3900 = vmatmul.mubr.msk.bf16.vlgmr.msra.gmra.mxu1 %vm736_vm6, %v2458_v8  ;;  %3916 = vmatpush3.bf16.msra.mxu0 %v2743_v1 }
 0x763   :  { %3910 = vmatpush3.bf16.msra.mxu1 %v2697_v23  ;;  %3911 = vmatprep.mubr.msk.bf16.mxu1 %vm4074_vm1, %v4073_v18 }
 0x764   :  { %v4068_v62 = vpop.eup %4067  ;;  %3917 = vmatprep.mubr.msk.bf16.mxu0 %vm4074_vm1, %v4073_v18  ;;  %3921 = vmatprep.subr.bf16.mxu1 %v4073_v18 }
 0x765   :  { %v4070_v2 = vpop.eup %4069  ;;  %v2453_v3 = vmul.f32 %v4068_v62, %v4620_v17  ;;  %3927 = vmatprep.subr.bf16.mxu0 %v4007_v14 }
 0x766   :  { %v2452_v27 = vmul.f32 %v4070_v2, %v4622_v9 }
 0x767   :  { %v2461_v45 = vpack.c.bf16 %v2453_v3, %v2453_v3 }
 0x768   :  { %v2460_v0 = vpack.c.bf16 %v2452_v27, %v2452_v27  ;;  %v2937_v27 = vld [vmem:[%s4783_s6] sm:$0xf] }
 0x769   :  { %3918 = vmatmul.mubr.msk.bf16.vlgmr.msra.gmra.mxu0 %vm736_vm6, %v2461_v45 }
 0x76a   :  { %3912 = vmatmul.mubr.msk.bf16.vlgmr.msra.gmra.mxu1 %vm736_vm6, %v2460_v0  ;;  %3928 = vmatpush3.bf16.msra.mxu0 %v4007_v14 }
 0x76b   :  { %3922 = vmatpush3.bf16.msra.mxu1 %v2789_v6  ;;  %3923 = vmatprep.mubr.msk.bf16.mxu1 %vm4074_vm1, %v4073_v18 }
 0x76c   :  { %v4072_v13 = vpop.eup %4071  ;;  %3939 = vmatprep.subr.bf16.mxu1 %v4073_v18  ;;  %3929 = vmatprep.subr.bf16.mxu0 %v4008_v50 }
 0x76d   :  { %v2454_v47 = vmul.f32 %v4072_v13, %v4628_v25 }
 0x76e   :  { %3930 = vmatpush3.bf16.msra.mxu0 %v4008_v50 }
 0x76f   :  { %v2462_v28 = vpack.c.bf16 %v2454_v47, %v2454_v47  ;;  %3951 = vmatprep.subr.bf16.mxu0 %v4073_v18 }
 0x772   :  { %3924 = vmatmul.mubr.msk.bf16.vlgmr.msra.gmra.mxu1 %vm736_vm6, %v2462_v28 }
 0x773   :  { %3941 = vmatprep.mubr.msk.bf16.mxu1 %vm4074_vm1, %v4073_v18 }
 0x811   :  { %v2503_v7 = vpop.f32.mrf.mxu0 }
 0x813   :  { %v3883_v44 = vpop.f32.mrf.mxu0 }
 0x815   :  { %v2506_v17 = vpop.f32.mrf.mxu0 }
 0x817   :  { %v3884_v9 = vpop.f32.mrf.mxu0 }
 0x819   :  { %v2549_v20 = vpop.f32.mrf.mxu1  ;;  %v2595_v22 = vpop.f32.mrf.mxu0 }
 0x81a   :  { %v2831_v25 = vpack.c.bf16 %v2549_v20, %v2503_v7 }
 0x81b   :  { %v3889_v26 = vpop.f32.mrf.mxu1  ;;  %v3895_v15 = vpop.f32.mrf.mxu0 }
 0x81c   :  { %3931 = vmatprep.mubr.msk.bf16.mxu0 %vm78_vm0, %v2831_v25 }
 0x81d   :  { %v2552_v21 = vpop.f32.mrf.mxu1  ;;  %v2598_v24 = vpop.f32.mrf.mxu0 }
 0x81f   :  { %v3890_v29 = vpop.f32.mrf.mxu1  ;;  %v3896_v30 = vpop.f32.mrf.mxu0 }
 0x821   :  { %v2687_v32 = vpop.f32.mrf.mxu0 }
 0x822   :  { %v2641_v33 = vpop.f32.mrf.mxu1 }
 0x823   :  { %v2832_v31 = vpack.c.bf16 %v2641_v33, %v2595_v22  ;;  %v3907_v19 = vpop.f32.mrf.mxu0 }
 0x824   :  { %v3901_v35 = vpop.f32.mrf.mxu1 }
 0x825   :  { %3932 = vmatmul.mubr.msk.bf16.vlgmr.msra.gmra.mxu0 %vm78_vm0, %v2832_v31  ;;  %v2690_v36 = vpop.f32.mrf.mxu0  ;;  %v3364_v31 = vld [vmem:[%s4782_s4] ss:$0 sm:$0xff] }
 0x826   :  { %v2644_v5 = vpop.f32.mrf.mxu1  ;;  %v1284_v19 = vadd.f32 %v4470_v40, %v3364_v31  ;;  %v1276_v36 = vadd.f32 %v3364_v31, %v4472_v41  ;;  %v1279_v41 = vadd.f32 %v3364_v31, %v4476_v46 }
 0x827   :  { %v3908_v37 = vpop.f32.mrf.mxu0 }
 0x828   :  { %v3902_v61 = vpop.f32.mrf.mxu1 }
 0x829   :  { %v2779_v38 = vpop.f32.mrf.mxu0 }
 0x82a   :  { %v2733_v39 = vpop.f32.mrf.mxu1 }
 0x82b   :  { %v2833_v53 = vpack.c.bf16 %v2733_v39, %v2687_v32  ;;  %v3919_v16 = vpop.f32.mrf.mxu0 }
 0x82c   :  { %v3913_v43 = vpop.f32.mrf.mxu1 }
 0x82d   :  { %3935 = vmatprep.mubr.msk.bf16.mxu0 %vm78_vm0, %v2833_v53  ;;  %v2782_v34 = vpop.f32.mrf.mxu0 }
 0x82e   :  { %v2736_v55 = vpop.f32.mrf.mxu1 }
 0x82f   :  { %v3920_v56 = vpop.f32.mrf.mxu0 }
 0x830   :  { %v3914_v12 = vpop.f32.mrf.mxu1 }
 0x832   :  { %v2825_v63 = vpop.f32.mrf.mxu1 }
 0x833   :  { %v2834_v57 = vpack.c.bf16 %v2825_v63, %v2779_v38  ;;  %v1287_v63 = vadd.f32 %v4474_v42, %v3364_v31 }
 0x834   :  { %v3925_v58 = vpop.f32.mrf.mxu1 }
 0x835   :  { %3936 = vmatmul.mubr.msk.bf16.gmra.mxu0 %vm78_vm0, %v2834_v57  ;;  %v1292_v57 = vadd.f32 %v3364_v31, %v4480_v49 }
 0x836   :  { %v2828_v60 = vpop.f32.mrf.mxu1  ;;  %3953 = vmatprep.mubr.msk.bf16.mxu0 %vm4074_vm1, %v4073_v18 }
 0x838   :  { %v3926_v59 = vpop.f32.mrf.mxu1 }
 0x8e5   :  { %v3933_v54 = vpop.f32.mrf.mxu0 }
 0x8e6   :  { %v2915_v4 = vadd.f32 %v3933_v54, %v3440_v10 }
 0x8e7   :  { %v2906_v8 = vpop.f32.mrf.mxu0 }
 0x8e8   :  { %v2940_v1 = vpack.c.bf16 %v2915_v4, %v2915_v4  ;;  %v2907_v23 = vadd.f32 %v3440_v10, %v2906_v8 }
 0x8e9   :  { %v3934_v62 = vpop.f32.mrf.mxu0 }
 0x8ea   :  { %v3036_v2 = vsel %vm836_vm2, %v2940_v1, 0  ;;  %v2938_v3 = vpack.c.bf16 %v2907_v23, %v2907_v23  ;;  %v2918_v13 = vadd.f32 %v3934_v62, %v3440_v10  ;;  %v1300_v1 = vadd.f32 %v4478_v48, %v3364_v31 }
 0x8eb   :  { %v2909_v11 = vpop.f32.mrf.mxu0  ;;  %3952 = vmatpush3.bf16.msra.mxu0 %v3036_v2  ;;  %v1295_v23 = vadd.f32 %v3364_v31, %v4484_v52 }
 0x8ec   :  { %v2950_v45 = vsel %vm836_vm2, %v2938_v3, 0  ;;  %v2910_v0 = vadd.f32 %v3440_v10, %v2909_v11  ;;  %3963 = vmatprep.subr.bf16.mxu0 %v4073_v18  ;;  %v2941_v28 = vpack.c.bf16 %v2918_v13, %v2918_v13  ;;  %v1303_v13 = vadd.f32 %v4482_v51, %v3364_v31 }
 0x8ed   :  { %3940 = vmatpush3.bf16.msra.mxu1 %v2950_v45 }
 0x8ee   :  { %v2939_v6 = vpack.c.bf16 %v2910_v0, %v2910_v0  ;;  %3954 = vmatmul.mubr.msk.bf16.vlgmr.msra.gmra.mxu0 %vm736_vm6, %v2937_v27  ;;  %3945 = vmatprep.subr.bf16.mxu1 %v4073_v18  ;;  %v3079_v7 = vsel %vm836_vm2, %v2941_v28, 0 }
 0x8ef   :  { %3965 = vmatprep.mubr.msk.bf16.mxu0 %vm4074_vm1, %v4073_v18 }
 0x8f0   :  { %v2993_v47 = vsel %vm836_vm2, %v2939_v6, 0  ;;  %3942 = vmatmul.mubr.msk.bf16.vlgmr.msra.gmra.mxu1 %vm736_vm6, %v2937_v27 }
 0x8f1   :  { %3946 = vmatpush3.bf16.msra.mxu1 %v2993_v47  ;;  %3947 = vmatprep.mubr.msk.bf16.mxu1 %vm4074_vm1, %v4073_v18 }
 0x8f2   :  { %3957 = vmatprep.subr.bf16.mxu1 %v4073_v18 }
 0x8f5   :  { %v3937_v14 = vpop.f32.mrf.mxu0 }
 0x8f6   :  { %v2931_v44 = vadd.f32 %v3937_v14, %v3440_v10 }
 0x8f7   :  { %v2922_v50 = vpop.f32.mrf.mxu0 }
 0x8f8   :  { %v2923_v17 = vadd.f32 %v3440_v10, %v2922_v50  ;;  %3948 = vmatmul.mubr.msk.bf16.vlgmr.msra.gmra.mxu1 %vm736_vm6, %v2937_v27  ;;  %v2944_v25 = vpack.c.bf16 %v2931_v44, %v2931_v44 }
 0x8f9   :  { %3958 = vmatpush3.bf16.msra.mxu1 %v3079_v7  ;;  %v3938_v9 = vpop.f32.mrf.mxu0  ;;  %3959 = vmatprep.mubr.msk.bf16.mxu1 %vm4074_vm1, %v4073_v18 }
 0x8fa   :  { %v2942_v20 = vpack.c.bf16 %v2923_v17, %v2923_v17  ;;  %3969 = vmatprep.subr.bf16.mxu1 %v4073_v18  ;;  %v3208_v24 = vsel %vm836_vm2, %v2944_v25, 0  ;;  %v2934_v29 = vadd.f32 %v3938_v9, %v3440_v10 }
 0x8fb   :  { %v2925_v22 = vpop.f32.mrf.mxu0 }
 0x8fc   :  { %v3122_v26 = vsel %vm836_vm2, %v2942_v20, 0  ;;  %v2926_v15 = vadd.f32 %v3440_v10, %v2925_v22  ;;  %v2945_v32 = vpack.c.bf16 %v2934_v29, %v2934_v29 }
 0x8fd   :  { %3964 = vmatpush3.bf16.msra.mxu0 %v3122_v26 }
 0x8fe   :  { %v2943_v21 = vpack.c.bf16 %v2926_v15, %v2926_v15  ;;  %3975 = vmatprep.subr.bf16.mxu0 %v4073_v18  ;;  %v3251_v33 = vsel %vm836_vm2, %v2945_v32, 0 }
 0x900   :  { %v3165_v30 = vsel %vm836_vm2, %v2943_v21, 0  ;;  %3960 = vmatmul.mubr.msk.bf16.vlgmr.msra.gmra.mxu1 %vm736_vm6, %v2937_v27  ;;  %3966 = vmatmul.mubr.msk.bf16.vlgmr.msra.gmra.mxu0 %vm736_vm6, %v2937_v27 }
 0x901   :  { %3970 = vmatpush3.bf16.msra.mxu1 %v3165_v30  ;;  %3976 = vmatpush3.bf16.msra.mxu0 %v3208_v24 }
 0x902   :  { %3971 = vmatprep.mubr.msk.bf16.mxu1 %vm4074_vm1, %v4073_v18  ;;  %3977 = vmatprep.mubr.msk.bf16.mxu0 %vm4074_vm1, %v4073_v18 }
 0x903   :  { %3981 = vmatprep.subr.bf16.mxu1 %v4073_v18 }
 0x908   :  { %3972 = vmatmul.mubr.msk.bf16.vlgmr.msra.gmra.mxu1 %vm736_vm6, %v2937_v27  ;;  %3978 = vmatmul.mubr.msk.bf16.vlgmr.msra.gmra.mxu0 %vm736_vm6, %v2937_v27 }
 0x909   :  { %3982 = vmatpush3.bf16.msra.mxu1 %v3251_v33  ;;  %3983 = vmatprep.mubr.msk.bf16.mxu1 %vm4074_vm1, %v4073_v18 }
 0x910   :  { %3984 = vmatmul.mubr.msk.bf16.vlgmr.msra.gmra.mxu1 %vm736_vm6, %v2937_v27 }
 0x9ae   :  { %v3072_v35 = vpop.f32.mrf.mxu0 }
 0x9af   :  { %v3295_v5 = vadd.f32 %v3072_v35, %v1284_v19 }
 0x9b0   :  { %v2986_v37 = vpop.f32.mrf.mxu1  ;;  %v3955_v61 = vpop.f32.mrf.mxu0 }
 0x9b1   :  { %3303 = vst.msk [vmem:[%s4784_s7 + $0x10] sm:$0xff] %vm78_vm0, %v3295_v5  ;;  %v3293_v18 = vadd.f32 %v2986_v37, %v1276_v36 }
 0x9b2   :  { %v3943_v38 = vpop.f32.mrf.mxu1  ;;  %v3075_v39 = vpop.f32.mrf.mxu0 }
 0x9b3   :  { %3301 = vst.msk [vmem:[%s4784_s7] sm:$0xff] %vm78_vm0, %v3293_v18 }
 0x9b4   :  { %v2989_v40 = vpop.f32.mrf.mxu1  ;;  %v3956_v53 = vpop.f32.mrf.mxu0 }
 0x9b6   :  { %v3944_v16 = vpop.f32.mrf.mxu1 }
 0x9b8   :  { %v3029_v43 = vpop.f32.mrf.mxu1 }
 0x9b9   :  { %v3294_v34 = vadd.f32 %v3029_v43, %v1279_v41 }
 0x9ba   :  { %v3949_v55 = vpop.f32.mrf.mxu1 }
 0x9bb   :  { %3302 = vst.msk [vmem:[%s4784_s7 + $0x8] sm:$0xff] %vm78_vm0, %v3294_v34 }
 0x9bc   :  { %v3032_v56 = vpop.f32.mrf.mxu1 }
 0x9be   :  { %v3950_v12 = vpop.f32.mrf.mxu1 }
 0x9c0   :  { %v3115_v58 = vpop.f32.mrf.mxu1  ;;  %v3158_v60 = vpop.f32.mrf.mxu0 }
 0x9c1   :  { %v3296_v59 = vadd.f32 %v3115_v58, %v1287_v63  ;;  %v3297_v10 = vadd.f32 %v3158_v60, %v1292_v57 }
 0x9c2   :  { %v3961_v54 = vpop.f32.mrf.mxu1  ;;  %v3967_v46 = vpop.f32.mrf.mxu0 }
 0x9c3   :  { %3304 = vst.msk [vmem:[%s4784_s7 + $0x18] sm:$0xff] %vm78_vm0, %v3296_v59  ;;  %3305 = vst.msk [vmem:[%s4784_s7 + $0x20] sm:$0xff] %vm78_vm0, %v3297_v10 }
 0x9c4   :  { %v3118_v4 = vpop.f32.mrf.mxu1  ;;  %v3161_v42 = vpop.f32.mrf.mxu0 }
 0x9c6   :  { %v3962_v8 = vpop.f32.mrf.mxu1  ;;  %v3968_v49 = vpop.f32.mrf.mxu0 }
 0x9c8   :  { %v3201_v62 = vpop.f32.mrf.mxu1  ;;  %v3244_v2 = vpop.f32.mrf.mxu0 }
 0x9c9   :  { %v3298_v3 = vadd.f32 %v3201_v62, %v1295_v23  ;;  %v3299_v11 = vadd.f32 %v3244_v2, %v1300_v1 }
 0x9ca   :  { %v3973_v27 = vpop.f32.mrf.mxu1  ;;  %v3979_v45 = vpop.f32.mrf.mxu0 }
 0x9cb   :  { %3306 = vst.msk [vmem:[%s4784_s7 + $0x28] sm:$0xff] %vm78_vm0, %v3298_v3  ;;  %3307 = vst.msk [vmem:[%s4784_s7 + $0x30] sm:$0xff] %vm78_vm0, %v3299_v11 }
 0x9cc   :  { %v3204_v0 = vpop.f32.mrf.mxu1  ;;  %v3247_v48 = vpop.f32.mrf.mxu0 }
 0x9ce   :  { %v3974_v6 = vpop.f32.mrf.mxu1  ;;  %v3980_v52 = vpop.f32.mrf.mxu0 }
 0x9d0   :  { %v3287_v47 = vpop.f32.mrf.mxu1 }
 0x9d1   :  { %v3300_v28 = vadd.f32 %v3287_v47, %v1303_v13 }
 0x9d2   :  { %v3985_v14 = vpop.f32.mrf.mxu1 }
 0x9d3   :  { %3308 = vst.msk [vmem:[%s4784_s7 + $0x38] sm:$0xff] %vm78_vm0, %v3300_v28 }
 0x9d4   :  { %v3290_v50 = vpop.f32.mrf.mxu1 }
 0x9d6   :  { %v3986_v7 = vpop.f32.mrf.mxu1 }

// kernel: hoda_forward.1
= control target key start
LH: loop header
LB: loop body
LE: loop exit
PB: predicated region body
PF: predicated region fallthrough
CT: control target
= control target key end

     0   :  { %vm78_vm0 = vcmask 261120   ;;  %v4073_v18 = vmov 0.0   ;;  %vm4074_vm1 = vmmov 0   ;;  %vm836_vm2 = vcmask 1043456   ;;  %s4777_s1 = inlined_call_operand.vmem [shape: bf16[2,3,32,32], index: 1, kind: input, shape index: {}]   ;;  %s4778_s0 = inlined_call_operand.vmem [shape: bf16[8,8,32], index: 0, kind: input, shape index: {}]   ;;  %s4779_s2 = inlined_call_operand.vmem [shape: f32[2,3,1,32], index: 2, kind: input, shape index: {}]   ;;  %s4780_s3 = inlined_call_operand.vmem [shape: bf16[2,32,32], index: 3, kind: input, shape index: {}]   ;;  %s4781_s5 = inlined_call_operand.vmem [shape: bf16[8,8], index: 5, kind: input, shape index: {}]   ;;  %s4782_s4 = inlined_call_operand.vmem [shape: f32[2,1,32], index: 4, kind: input, shape index: {}]   ;;  %s4783_s6 = inlined_call_operand.vmem [shape: bf16[8,8], index: 6, kind: input, shape index: {}]   ;;  %s4784_s7 = inlined_call_operand.vmem [shape: f32[8,8,32], index: 7, kind: output, shape index: {}]  }
   0x1   :  { %v3989_v0 = vld [vmem:[%s4777_s1 + $0x18] sm:$0xff]   ;;  %v3990_v1 = vld [vmem:[%s4777_s1 + $0x8] sm:$0xff]   ;;  %v3991_v2 = vld [vmem:[%s4777_s1 + $0x10] sm:$0xff]   ;;  %vm736_vm6 = vcmask 64512  }
   0x2   :  { %3615 = vmatprep.subr.bf16.mxu1 %v3989_v0  ;;  %3603 = vmatprep.subr.bf16.mxu0 %v3990_v1  ;;  %v3992_v3 = vld [vmem:[%s4777_s1] sm:$0xff]   ;;  %v4140_v6 = vld [vmem:[%s4778_s0 + $0x8] sm:$0xf]  ;;  %v4147_v8 = vld [vmem:[%s4778_s0 + $0xc] sm:$0xf] }
   0x3   :  { %3616 = vmatpush3.bf16.msra.mxu1 %v3989_v0  ;;  %3604 = vmatpush3.bf16.msra.mxu0 %v3990_v1  ;;  %v4130_v4 = vld [vmem:[%s4778_s0] sm:$0xf]  ;;  %v4135_v5 = vld [vmem:[%s4778_s0 + $0x4] sm:$0xf]  ;;  %v4152_v9 = vld [vmem:[%s4778_s0 + $0x10] sm:$0xf]  ;;  %v3315_v11 = vcombine.low %v4140_v6, %v4147_v8 }
   0x4   :  { %3617 = vmatprep.subr.bf16.mxu1 %v3991_v2  ;;  %3605 = vmatprep.subr.bf16.mxu0 %v3992_v3  ;;  %v3314_v7 = vcombine.low %v4130_v4, %v4135_v5  ;;  %v4157_v10 = vld [vmem:[%s4778_s0 + $0x14] sm:$0xf]  ;;  %v3997_v13 = vld [vmem:[%s4777_s1 + $0x28] sm:$0xff]   ;;  %v3998_v14 = vld [vmem:[%s4777_s1 + $0x20] sm:$0xff]  }
   0x5   :  { %v3316_v12 = vcombine.low %v4152_v9, %v4157_v10  ;;  %v4174_v15 = vld [vmem:[%s4778_s0 + $0x18] sm:$0xf]  ;;  %v4179_v16 = vld [vmem:[%s4778_s0 + $0x1c] sm:$0xf]  ;;  %v4202_v19 = vld [vmem:[%s4779_s2 + $0x1] ss:$0 sm:$0xff] }
   0x6   :  { %3619 = vmatprep.mubr.msk.bf16.mxu1 %vm78_vm0, %v3314_v7  ;;  %3607 = vmatprep.mubr.msk.bf16.mxu0 %vm78_vm0, %v3314_v7  ;;  %v3317_v17 = vcombine.low %v4174_v15, %v4179_v16  ;;  %v4208_v23 = vld [vmem:[%s4779_s2] ss:$0 sm:$0xff]  ;;  %v4233_v54 = vld [vmem:[%s4779_s2 + $0x2] ss:$0 sm:$0xff] }
   0x7   :  { %3618 = vmatpush3.bf16.msra.mxu1 %v3991_v2  ;;  %3606 = vmatpush3.bf16.msra.mxu0 %v3992_v3 }
   0x8   :  { %3627 = vmatprep.subr.bf16.mxu0 %v3997_v13  ;;  %3639 = vmatprep.subr.bf16.mxu1 %v4073_v18 }
   0xa   :  { %3620 = vmatmul.mubr.msk.bf16.vlgmr.msra.gmra.mxu1 %vm78_vm0, %v3315_v11  ;;  %3608 = vmatmul.mubr.msk.bf16.vlgmr.msra.gmra.mxu0 %vm78_vm0, %v3315_v11 }
   0xb   :  { %3623 = vmatprep.mubr.msk.bf16.mxu1 %vm78_vm0, %v3316_v12  ;;  %3611 = vmatprep.mubr.msk.bf16.mxu0 %vm78_vm0, %v3316_v12 }
   0xc   :  { %3628 = vmatpush3.bf16.msra.mxu0 %v3997_v13 }
   0xd   :  { %3629 = vmatprep.subr.bf16.mxu0 %v3998_v14 }
  0x10   :  { %3630 = vmatpush3.bf16.msra.mxu0 %v3998_v14 }
  0x11   :  { %3651 = vmatprep.subr.bf16.mxu0 %v4073_v18 }
  0x12   :  { %3624 = vmatmul.mubr.msk.bf16.gmra.mxu1 %vm78_vm0, %v3317_v17  ;;  %3612 = vmatmul.mubr.msk.bf16.gmra.mxu0 %vm78_vm0, %v3317_v17 }
  0x13   :  { %3631 = vmatprep.mubr.msk.bf16.mxu0 %vm78_vm0, %v3314_v7  ;;  %3641 = vmatprep.mubr.msk.bf16.mxu1 %vm4074_vm1, %v4073_v18 }
  0x1a   :  { %3632 = vmatmul.mubr.msk.bf16.vlgmr.msra.gmra.mxu0 %vm78_vm0, %v3315_v11 }
  0x1b   :  { %3635 = vmatprep.mubr.msk.bf16.mxu0 %vm78_vm0, %v3316_v12 }
  0x22   :  { %3636 = vmatmul.mubr.msk.bf16.gmra.mxu0 %vm78_vm0, %v3317_v17 }
  0x23   :  { %3653 = vmatprep.mubr.msk.bf16.mxu0 %vm4074_vm1, %v4073_v18 }
  0xca   :  { %v3621_v20 = vpop.f32.mrf.mxu1  ;;  %v3609_v22 = vpop.f32.mrf.mxu0 }
  0xcb   :  { %v232_v21 = vadd.f32 %v3621_v20, %v4202_v19  ;;  %v134_v30 = vadd.f32 %v3609_v22, %v4208_v23 }
  0xcc   :  { %v223_v24 = vpop.f32.mrf.mxu1  ;;  %v125_v27 = vpop.f32.mrf.mxu0 }
  0xcd   :  { %v256_v25 = vpack.c.bf16 %v232_v21, %v232_v21  ;;  %v224_v26 = vadd.f32 %v4202_v19, %v223_v24  ;;  %v158_v38 = vpack.c.bf16 %v134_v30, %v134_v30  ;;  %v126_v39 = vadd.f32 %v4208_v23, %v125_v27 }
  0xce   :  { %v3622_v28 = vpop.f32.mrf.mxu1  ;;  %v3610_v32 = vpop.f32.mrf.mxu0 }
  0xcf   :  { %v464_v29 = vsel %vm78_vm0, %v256_v25, 0  ;;  %v254_v31 = vpack.c.bf16 %v224_v26, %v224_v26  ;;  %v156_v45 = vpack.c.bf16 %v126_v39, %v126_v39  ;;  %v235_v49 = vadd.f32 %v3622_v28, %v4202_v19 }
  0xd0   :  { %v226_v33 = vpop.f32.mrf.mxu1  ;;  %3652 = vmatpush3.bf16.xpose.msra.mxu0 %v464_v29  ;;  %v128_v36 = vpop.f32.mrf.mxu0  ;;  %v137_v17 = vadd.f32 %v3610_v32, %v4208_v23 }
  0xd1   :  { %v372_v34 = vsel %vm78_vm0, %v254_v31, 0  ;;  %v227_v35 = vadd.f32 %v4202_v19, %v226_v33  ;;  %3663 = vmatprep.subr.bf16.mxu0 %v4073_v18  ;;  %v129_v56 = vadd.f32 %v4208_v23, %v128_v36  ;;  %v257_v60 = vpack.c.bf16 %v235_v49, %v235_v49 }
  0xd2   :  { %v3625_v37 = vpop.f32.mrf.mxu1  ;;  %3640 = vmatpush3.bf16.xpose.msra.mxu1 %v372_v34  ;;  %v3613_v40 = vpop.f32.mrf.mxu0  ;;  %v159_v28 = vpack.c.bf16 %v137_v17, %v137_v17 }
  0xd3   :  { %3645 = vmatprep.subr.bf16.mxu1 %v4073_v18  ;;  %v255_v42 = vpack.c.bf16 %v227_v35, %v227_v35  ;;  %v248_v46 = vadd.f32 %v3625_v37, %v4202_v19  ;;  %v157_v0 = vpack.c.bf16 %v129_v56, %v129_v56  ;;  %v510_v11 = vsel %vm78_vm0, %v257_v60, 0 }
  0xd4   :  { %v239_v41 = vpop.f32.mrf.mxu1  ;;  %v141_v44 = vpop.f32.mrf.mxu0  ;;  %v150_v12 = vadd.f32 %v3613_v40, %v4208_v23 }
  0xd5   :  { %v240_v43 = vadd.f32 %v4202_v19, %v239_v41  ;;  %v418_v51 = vsel %vm78_vm0, %v255_v42, 0  ;;  %v142_v52 = vadd.f32 %v4208_v23, %v141_v44  ;;  %v260_v57 = vpack.c.bf16 %v248_v46, %v248_v46 }
  0xd6   :  { %v4221_v48 = vpop.f32.mrf.mxu0  ;;  %v3626_v55 = vpop.f32.mrf.mxu1  ;;  %v162_v24 = vpack.c.bf16 %v150_v12, %v150_v12  ;;  %v360_v42 = vlaneseq }
  0xd7   :  { %v258_v47 = vpack.c.bf16 %v240_v43, %v240_v43  ;;  %3654 = vmatmul.mubr.msk.bf16.vlgmr.msra.gmra.mxu0 %vm78_vm0, %v158_v38  ;;  %v160_v61 = vpack.c.bf16 %v142_v52, %v142_v52  ;;  %v648_v1 = vsel %vm78_vm0, %v260_v57, 0  ;;  %v251_v32 = vadd.f32 %v3626_v55, %v4202_v19 }
  0xd8   :  { %3665 = vmatprep.mubr.msk.bf16.mxu0 %vm4074_vm1, %v4073_v18  ;;  %v144_v53 = vpop.f32.mrf.mxu0  ;;  %v242_v63 = vpop.f32.mrf.mxu1  ;;  %v153_v37 = vadd.f32 %v4221_v48, %v4208_v23  ;;  %v4294_v43 = vshrl.u32 %v360_v42, 7 }
  0xd9   :  { %v556_v50 = vsel %vm78_vm0, %v258_v47, 0  ;;  %3642 = vmatmul.mubr.msk.bf16.vlgmr.msra.gmra.mxu1 %vm78_vm0, %v156_v45  ;;  %v243_v13 = vadd.f32 %v4202_v19, %v242_v63  ;;  %v145_v34 = vadd.f32 %v4208_v23, %v144_v53  ;;  %v261_v19 = vpack.c.bf16 %v251_v32, %v251_v32 }
  0xda   :  { %3646 = vmatpush3.bf16.xpose.msra.mxu1 %v418_v51  ;;  %3664 = vmatpush3.bf16.xpose.msra.mxu0 %v556_v50  ;;  %v3633_v58 = vpop.f32.mrf.mxu0  ;;  %v163_v38 = vpack.c.bf16 %v153_v37, %v153_v37  ;;  %v4296_v23 = vand.u32 127, %v360_v42 }
  0xdb   :  { %3647 = vmatprep.mubr.msk.bf16.mxu1 %vm4074_vm1, %v4073_v18  ;;  %3657 = vmatprep.subr.bf16.mxu1 %v4073_v18  ;;  %v4241_v59 = vadd.f32 %v3633_v58, %v4233_v54  ;;  %v259_v25 = vpack.c.bf16 %v243_v13, %v243_v13  ;;  %v161_v35 = vpack.c.bf16 %v145_v34, %v145_v34  ;;  %v694_v36 = vsel %vm78_vm0, %v261_v19, 0 }
  0xdc   :  { %3675 = vmatprep.subr.bf16.mxu0 %v4073_v18  ;;  %v321_v62 = vpop.f32.mrf.mxu0  ;;  %vm364_vm3 = vcmp.eq.s32.totalorder %v4294_v43, %v4296_v23  ;;  %vm365_vm4 = vcmp.ge.s32.totalorder %v4296_v23, 8  ;;  %vm1996_vm7 = vcmp.ge.s32.totalorder %v4296_v23, 4 }
  0xdd   :  { %v322_v3 = vadd.f32 %v4233_v54, %v321_v62  ;;  %v602_v33 = vsel %vm78_vm0, %v259_v25, 0  ;;  %vm366_vm5 = vmor %vm364_vm3, %vm365_vm4 }
  0xde   :  { %v3634_v2 = vpop.f32.mrf.mxu0  ;;  %v367_v45 = vsel %vm366_vm5, -1e+30, %v4073_v18  ;;  %vm1997_vm8 = vmor %vm364_vm3, %vm1996_vm7 }
  0xdf   :  { %v4246_v7 = vadd.f32 %v3634_v2, %v4233_v54  ;;  %v352_v21 = vpack.c.bf16 %v322_v3, %v322_v3 }
  0xe0   :  { %v324_v14 = vpop.f32.mrf.mxu0 }
  0xe1   :  { %3648 = vmatmul.mubr.msk.bf16.vlgmr.msra.gmra.mxu1 %vm78_vm0, %v157_v0  ;;  %3666 = vmatmul.mubr.msk.bf16.vlgmr.msra.gmra.mxu0 %vm78_vm0, %v160_v61  ;;  %v838_v30 = vsel %vm836_vm2, %v352_v21, 0  ;;  %v325_v39 = vadd.f32 %v4233_v54, %v324_v14 }
  0xe2   :  { %3658 = vmatpush3.bf16.xpose.msra.mxu1 %v510_v11  ;;  %3676 = vmatpush3.bf16.xpose.msra.mxu0 %v648_v1  ;;  %v3637_v20 = vpop.f32.mrf.mxu0 }
  0xe3   :  { %3659 = vmatprep.mubr.msk.bf16.mxu1 %vm4074_vm1, %v4073_v18  ;;  %3677 = vmatprep.mubr.msk.bf16.mxu0 %vm4074_vm1, %v4073_v18  ;;  %v4260_v22 = vadd.f32 %v3637_v20, %v4233_v54  ;;  %v353_v40 = vpack.c.bf16 %v325_v39, %v325_v39 }
  0xe4   :  { %3669 = vmatprep.subr.bf16.mxu1 %v4073_v18  ;;  %3687 = vmatprep.subr.bf16.mxu0 %v4073_v18  ;;  %v337_v26 = vpop.f32.mrf.mxu0 }
  0xe5   :  { %v4264_v27 = vadd.f32 %v4233_v54, %v337_v26  ;;  %v884_v41 = vsel %vm836_vm2, %v353_v40, 0 }
  0xe6   :  { %v3638_v29 = vpop.f32.mrf.mxu0 }
  0xe7   :  { %v4268_v31 = vadd.f32 %v3638_v29, %v4233_v54 }
  0xe8   :  { %v4304_v44 = vpop.f32.mrf.mxu0 }
  0xe9   :  { %3660 = vmatmul.mubr.msk.bf16.vlgmr.msra.gmra.mxu1 %vm78_vm0, %v159_v28  ;;  %3678 = vmatmul.mubr.msk.bf16.vlgmr.msra.gmra.mxu0 %vm78_vm0, %v162_v24 }
  0xea   :  { %3670 = vmatpush3.bf16.xpose.msra.mxu1 %v602_v33  ;;  %3671 = vmatprep.mubr.msk.bf16.mxu1 %vm4074_vm1, %v4073_v18 }
  0xeb   :  { %3681 = vmatprep.subr.bf16.mxu1 %v4073_v18  ;;  %3688 = vmatpush3.bf16.msra.mxu0 %v838_v30 }
  0xec   :  { %3689 = vmatprep.mubr.msk.bf16.mxu0 %vm4074_vm1, %v4073_v18  ;;  %3699 = vmatprep.subr.bf16.mxu0 %v4073_v18 }
  0xf1   :  { %3672 = vmatmul.mubr.msk.bf16.vlgmr.msra.gmra.mxu1 %vm78_vm0, %v161_v35 }
  0xf2   :  { %3682 = vmatpush3.bf16.xpose.msra.mxu1 %v694_v36  ;;  %3683 = vmatprep.mubr.msk.bf16.mxu1 %vm4074_vm1, %v4073_v18 }
  0xf3   :  { %3693 = vmatprep.subr.bf16.mxu1 %v4073_v18 }
  0xf9   :  { %3684 = vmatmul.mubr.msk.bf16.vlgmr.msra.gmra.mxu1 %vm78_vm0, %v163_v38 }
  0xfa   :  { %3695 = vmatprep.mubr.msk.bf16.mxu1 %vm4074_vm1, %v4073_v18  ;;  %3694 = vmatpush3.bf16.msra.mxu1 %v884_v41 }
  0xfb   :  { %3705 = vmatprep.subr.bf16.mxu1 %v4073_v18 }
 0x197   :  { %v500_v46 = vpop.f32.mrf.mxu0 }
 0x198   :  { %v501_v47 = vadd.f32 %v500_v46, %v367_v45 }
 0x199   :  { %v408_v48 = vpop.f32.mrf.mxu1  ;;  %v3655_v49 = vpop.f32.mrf.mxu0 }
 0x19a   :  { %v409_v50 = vadd.f32 %v408_v48, %v367_v45  ;;  %v743_v51 = vsel %vm736_vm6, %v501_v47, -inf }
 0x19b   :  { %744 = vmax.xlane.f32.xlu1 %v743_v51  ;;  %v3643_v52 = vpop.f32.mrf.mxu1  ;;  %v503_v53 = vpop.f32.mrf.mxu0 }
 0x19c   :  { %v737_v55 = vsel %vm736_vm6, %v409_v50, -inf }
 0x19d   :  { %v3656_v56 = vpop.f32.mrf.mxu0  ;;  %738 = vmax.xlane.f32.xlu0 %v737_v55  ;;  %v411_v57 = vpop.f32.mrf.mxu1 }
 0x19f   :  { %v3644_v58 = vpop.f32.mrf.mxu1 }
 0x1a1   :  { %v454_v60 = vpop.f32.mrf.mxu1  ;;  %v592_v61 = vpop.f32.mrf.mxu0 }
 0x1a2   :  { %v455_v62 = vadd.f32 %v454_v60, %v367_v45  ;;  %v593_v63 = vadd.f32 %v592_v61, %v367_v45 }
 0x1a3   :  { %v3649_v0 = vpop.f32.mrf.mxu1  ;;  %v3667_v1 = vpop.f32.mrf.mxu0 }
 0x1a4   :  { %v740_v2 = vsel %vm736_vm6, %v455_v62, -inf  ;;  %v749_v12 = vsel %vm736_vm6, %v593_v63, -inf }
 0x1a5   :  { %v595_v3 = vpop.f32.mrf.mxu0  ;;  %741 = vmax.xlane.f32.xlu0 %v740_v2  ;;  %v457_v11 = vpop.f32.mrf.mxu1 }
 0x1a7   :  { %v3650_v13 = vpop.f32.mrf.mxu1  ;;  %v3668_v14 = vpop.f32.mrf.mxu0 }
 0x1a9   :  { %v684_v17 = vpop.f32.mrf.mxu0  ;;  %750 = vmax.xlane.f32.xlu0 %v749_v12  ;;  %v546_v20 = vpop.f32.mrf.mxu1 }
 0x1aa   :  { %v685_v21 = vadd.f32 %v684_v17, %v367_v45  ;;  %v547_v24 = vadd.f32 %v546_v20, %v367_v45 }
 0x1ab   :  { %v3661_v25 = vpop.f32.mrf.mxu1  ;;  %v3679_v26 = vpop.f32.mrf.mxu0 }
 0x1ac   :  { %v755_v28 = vsel %vm736_vm6, %v685_v21, -inf  ;;  %v746_v29 = vsel %vm736_vm6, %v547_v24, -inf }
 0x1ad   :  { %v687_v30 = vpop.f32.mrf.mxu0  ;;  %756 = vmax.xlane.f32.xlu0 %v755_v28  ;;  %747 = vmax.xlane.f32.xlu1 %v746_v29  ;;  %v549_v32 = vpop.f32.mrf.mxu1 }
 0x1af   :  { %v3662_v33 = vpop.f32.mrf.mxu1  ;;  %v3680_v34 = vpop.f32.mrf.mxu0 }
 0x1b1   :  { %v638_v19 = vpop.f32.mrf.mxu1 }
 0x1b2   :  { %v639_v35 = vadd.f32 %v638_v19, %v367_v45 }
 0x1b3   :  { %v3673_v36 = vpop.f32.mrf.mxu1 }
 0x1b4   :  { %v752_v37 = vsel %vm736_vm6, %v639_v35, -inf }
 0x1b5   :  { %753 = vmax.xlane.f32.xlu1 %v752_v37  ;;  %v641_v38 = vpop.f32.mrf.mxu1 }
 0x1b7   :  { %v3674_v39 = vpop.f32.mrf.mxu1 }
 0x1b9   :  { %v730_v40 = vpop.f32.mrf.mxu1 }
 0x1ba   :  { %v731_v41 = vadd.f32 %v730_v40, %v367_v45 }
 0x1bb   :  { %v3685_v42 = vpop.f32.mrf.mxu1 }
 0x1bc   :  { %v758_v46 = vsel %vm736_vm6, %v731_v41, -inf }
 0x1bd   :  { %759 = vmax.xlane.f32.xlu1 %v758_v46  ;;  %v733_v48 = vpop.f32.mrf.mxu1 }
 0x1bf   :  { %v3686_v49 = vpop.f32.mrf.mxu1 }
 0x1c0   :  { %v354_v49 = vpack.c.bf16 %v4241_v59, %v4241_v59  ;;  %v355_v59 = vpack.c.bf16 %v4246_v7, %v4246_v7  ;;  %v341_v7 = vadd.f32 %v4233_v54, %v4304_v44 }
 0x224   :  { %v745_v51 = vpop.xlane.xlu1 %744 }
 0x225   :  { %v763_v52 = vsub.f32 %v501_v47, %v745_v51 }
 0x226   :  { %v739_v53 = vpop.xlane.xlu0 %738 }
 0x227   :  { %v761_v55 = vsub.f32 %v409_v50, %v739_v53  ;;  %v773_v56 = vmul.f32 1.442695, %v763_v52 }
 0x229   :  { %v769_v57 = vmul.f32 1.442695, %v761_v55 }
 0x22b   :  { %4009 = vpow2.f32 %v769_v57  ;;  %v930_v57 = vsel %vm836_vm2, %v354_v49, 0 }
 0x22c   :  { %4011 = vpow2.f32 %v773_v56 }
 0x22e   :  { %v742_v58 = vpop.xlane.xlu0 %741 }
 0x22f   :  { %v762_v60 = vsub.f32 %v455_v62, %v742_v58 }
 0x231   :  { %v771_v61 = vmul.f32 1.442695, %v762_v60 }
 0x232   :  { %v751_v0 = vpop.xlane.xlu0 %750 }
 0x233   :  { %4013 = vpow2.f32 %v771_v61  ;;  %v765_v45 = vsub.f32 %v593_v63, %v751_v0  ;;  %v356_v61 = vpack.c.bf16 %v4264_v27, %v4264_v27 }
 0x235   :  { %v777_v1 = vmul.f32 1.442695, %v765_v45 }
 0x236   :  { %v757_v2 = vpop.xlane.xlu0 %756  ;;  %v748_v3 = vpop.xlane.xlu1 %747 }
 0x237   :  { %4015 = vpow2.f32 %v777_v1  ;;  %v767_v11 = vsub.f32 %v685_v21, %v757_v2  ;;  %v764_v12 = vsub.f32 %v547_v24, %v748_v3 }
 0x238   :  { %v4010_v13 = vpop.eup %4009 }
 0x239   :  { %v781_v47 = vmul.f32 1.442695, %v767_v11  ;;  %v775_v14 = vmul.f32 1.442695, %v764_v12  ;;  %v785_v50 = vsel %vm736_vm6, %v4010_v13, 0.0  ;;  %v4012_v17 = vpop.eup %4011  ;;  %v976_v11 = vsel %vm836_vm2, %v355_v59, 0 }
 0x23a   :  { %786 = vadd.xlane.f32.xlu0 %v785_v50  ;;  %v791_v62 = vsel %vm736_vm6, %v4012_v17, 0.0  ;;  %v1022_v12 = vsel %vm836_vm2, %v356_v61, 0 }
 0x23b   :  { %4017 = vpow2.f32 %v781_v47  ;;  %v358_v47 = vpack.c.bf16 %v4260_v22, %v4260_v22 }
 0x23c   :  { %4019 = vpow2.f32 %v775_v14  ;;  %v357_v14 = vpack.c.bf16 %v341_v7, %v341_v7 }
 0x23e   :  { %792 = vadd.xlane.f32.xlu0 %v791_v62  ;;  %v754_v20 = vpop.xlane.xlu1 %753 }
 0x23f   :  { %v766_v63 = vsub.f32 %v639_v35, %v754_v20  ;;  %v1114_v20 = vsel %vm836_vm2, %v358_v47, 0 }
 0x240   :  { %v4014_v25 = vpop.eup %4013 }
 0x241   :  { %v779_v26 = vmul.f32 1.442695, %v766_v63  ;;  %v788_v28 = vsel %vm736_vm6, %v4014_v25, 0.0  ;;  %v1068_v63 = vsel %vm836_vm2, %v357_v14, 0 }
 0x242   :  { %789 = vadd.xlane.f32.xlu1 %v788_v28  ;;  %v359_v28 = vpack.c.bf16 %v4268_v31, %v4268_v31  ;;  %v3999_v31 = vld [vmem:[%s4780_s3 + $0x8] sm:$0xff]  }
 0x243   :  { %4021 = vpow2.f32 %v779_v26 }
 0x244   :  { %v4016_v21 = vpop.eup %4015 }
 0x245   :  { %v797_v24 = vsel %vm736_vm6, %v4016_v21, 0.0 }
 0x246   :  { %798 = vadd.xlane.f32.xlu0 %v797_v24  ;;  %v760_v29 = vpop.xlane.xlu1 %759 }
 0x247   :  { %v768_v30 = vsub.f32 %v731_v41, %v760_v29  ;;  %v1160_v29 = vsel %vm836_vm2, %v359_v28, 0 }
 0x248   :  { %v4319_v32 = vpop.eup %4017 }
 0x249   :  { %v4020_v33 = vpop.eup %4019  ;;  %v783_v34 = vmul.f32 1.442695, %v768_v30  ;;  %v803_v19 = vsel %vm736_vm6, %v4319_v32, 0.0 }
 0x24a   :  { %804 = vadd.xlane.f32.xlu0 %v803_v19  ;;  %v794_v35 = vsel %vm736_vm6, %v4020_v33, 0.0  ;;  %v1319_v19 = vsel %vm836_vm2, %v4130_v4, 0  ;;  %v1362_v4 = vsel %vm836_vm2, %v4135_v5, 0  ;;  %v1534_v5 = vsel %vm836_vm2, %v4157_v10, 0 }
 0x24b   :  { %4023 = vpow2.f32 %v783_v34  ;;  %795 = vadd.xlane.f32.xlu1 %v794_v35  ;;  %v4000_v34 = vld [vmem:[%s4780_s3] sm:$0xff]  }
 0x24c   :  { %v4393_v35 = vld [vmem:[%s4781_s5] sm:$0xf] }
 0x250   :  { %v4324_v36 = vpop.eup %4021 }
 0x251   :  { %v800_v37 = vsel %vm736_vm6, %v4324_v36, 0.0 }
 0x252   :  { %801 = vadd.xlane.f32.xlu1 %v800_v37 }
 0x258   :  { %v4328_v38 = vpop.eup %4023 }
 0x259   :  { %v806_v39 = vsel %vm736_vm6, %v4328_v38, 0.0 }
 0x25a   :  { %807 = vadd.xlane.f32.xlu1 %v806_v39 }
 0x2c3   :  { %v787_v40 = vpop.xlane.xlu0 %786 }
 0x2c4   :  { %4025 = vrcp.f32 %v787_v40 }
 0x2c7   :  { %v793_v41 = vpop.xlane.xlu0 %792 }
 0x2c8   :  { %4027 = vrcp.f32 %v793_v41 }
 0x2cb   :  { %v790_v42 = vpop.xlane.xlu1 %789 }
 0x2cc   :  { %4029 = vrcp.f32 %v790_v42 }
 0x2cf   :  { %v799_v46 = vpop.xlane.xlu0 %798 }
 0x2d0   :  { %4031 = vrcp.f32 %v799_v46 }
 0x2d1   :  { %v4026_v48 = vpop.eup %4025 }
 0x2d2   :  { %v817_v51 = vmul.f32 %v4026_v48, %v4010_v13 }
 0x2d3   :  { %v805_v56 = vpop.xlane.xlu0 %804 }
 0x2d4   :  { %v796_v52 = vpop.xlane.xlu1 %795  ;;  %v825_v53 = vpack.c.bf16 %v817_v51, %v817_v51 }
 0x2d5   :  { %v4028_v55 = vpop.eup %4027  ;;  %4033 = vrcp.f32 %v796_v52 }
 0x2d6   :  { %3690 = vmatmul.mubr.msk.bf16.vlgmr.msra.gmra.mxu0 %vm736_vm6, %v825_v53  ;;  %4035 = vrcp.f32 %v805_v56  ;;  %v819_v58 = vmul.f32 %v4028_v55, %v4012_v17 }
 0x2d7   :  { %3700 = vmatpush3.bf16.msra.mxu0 %v930_v57  ;;  %3701 = vmatprep.mubr.msk.bf16.mxu0 %vm4074_vm1, %v4073_v18 }
 0x2d8   :  { %3711 = vmatprep.subr.bf16.mxu0 %v4073_v18  ;;  %v827_v2 = vpack.c.bf16 %v819_v58, %v819_v58  ;;  %v1405_v58 = vsel %vm836_vm2, %v4140_v6, 0 }
 0x2d9   :  { %v4030_v60 = vpop.eup %4029 }
 0x2da   :  { %v818_v0 = vmul.f32 %v4030_v60, %v4014_v25 }
 0x2db   :  { %v802_v45 = vpop.xlane.xlu1 %801 }
 0x2dc   :  { %4037 = vrcp.f32 %v802_v45  ;;  %v826_v1 = vpack.c.bf16 %v818_v0, %v818_v0 }
 0x2dd   :  { %v4032_v3 = vpop.eup %4031 }
 0x2de   :  { %3696 = vmatmul.mubr.msk.bf16.vlgmr.msra.gmra.mxu1 %vm736_vm6, %v826_v1  ;;  %3702 = vmatmul.mubr.msk.bf16.vlgmr.msra.gmra.mxu0 %vm736_vm6, %v827_v2  ;;  %v821_v27 = vmul.f32 %v4032_v3, %v4016_v21 }
 0x2df   :  { %3706 = vmatpush3.bf16.msra.mxu1 %v976_v11  ;;  %3712 = vmatpush3.bf16.msra.mxu0 %v1022_v12 }
 0x2e0   :  { %3707 = vmatprep.mubr.msk.bf16.mxu1 %vm4074_vm1, %v4073_v18  ;;  %3713 = vmatprep.mubr.msk.bf16.mxu0 %vm4074_vm1, %v4073_v18  ;;  %v829_v44 = vpack.c.bf16 %v821_v27, %v821_v27 }
 0x2e1   :  { %3717 = vmatprep.subr.bf16.mxu1 %v4073_v18  ;;  %3723 = vmatprep.subr.bf16.mxu0 %v4073_v18 }
 0x2e2   :  { %v4034_v13 = vpop.eup %4033 }
 0x2e3   :  { %v808_v50 = vpop.xlane.xlu1 %807  ;;  %v820_v54 = vmul.f32 %v4034_v13, %v4020_v33  ;;  %v4036_v17 = vpop.eup %4035 }
 0x2e4   :  { %4039 = vrcp.f32 %v808_v50  ;;  %v823_v22 = vmul.f32 %v4036_v17, %v4319_v32  ;;  %v1491_v17 = vsel %vm836_vm2, %v4152_v9, 0 }
 0x2e5   :  { %v828_v62 = vpack.c.bf16 %v820_v54, %v820_v54 }
 0x2e6   :  { %3714 = vmatmul.mubr.msk.bf16.vlgmr.msra.gmra.mxu0 %vm736_vm6, %v829_v44  ;;  %v831_v24 = vpack.c.bf16 %v823_v22, %v823_v22 }
 0x2e7   :  { %3708 = vmatmul.mubr.msk.bf16.vlgmr.msra.gmra.mxu1 %vm736_vm6, %v828_v62  ;;  %3724 = vmatpush3.bf16.msra.mxu0 %v1114_v20  ;;  %v1577_v62 = vsel %vm836_vm2, %v4174_v15, 0 }
 0x2e8   :  { %3718 = vmatpush3.bf16.msra.mxu1 %v1068_v63  ;;  %3719 = vmatprep.mubr.msk.bf16.mxu1 %vm4074_vm1, %v4073_v18 }
 0x2e9   :  { %v4038_v25 = vpop.eup %4037  ;;  %3725 = vmatprep.mubr.msk.bf16.mxu0 %vm4074_vm1, %v4073_v18  ;;  %3729 = vmatprep.subr.bf16.mxu1 %v4073_v18 }
 0x2ea   :  { %v822_v26 = vmul.f32 %v4038_v25, %v4324_v36  ;;  %3735 = vmatprep.subr.bf16.mxu0 %v3999_v31  ;;  %v1448_v36 = vsel %vm836_vm2, %v4147_v8, 0  ;;  %v1620_v8 = vsel %vm836_vm2, %v4179_v16, 0 }
 0x2ec   :  { %v830_v21 = vpack.c.bf16 %v822_v26, %v822_v26 }
 0x2ee   :  { %3726 = vmatmul.mubr.msk.bf16.vlgmr.msra.gmra.mxu0 %vm736_vm6, %v831_v24  ;;  %v4001_v24 = vld [vmem:[%s4777_s1 + $0x38] sm:$0xff]  }
 0x2ef   :  { %3720 = vmatmul.mubr.msk.bf16.vlgmr.msra.gmra.mxu1 %vm736_vm6, %v830_v21  ;;  %3736 = vmatpush3.bf16.msra.mxu0 %v3999_v31  ;;  %v4004_v31 = vld [vmem:[%s4777_s1 + $0x40] sm:$0xff]  }
 0x2f0   :  { %3730 = vmatpush3.bf16.msra.mxu1 %v1160_v29  ;;  %3731 = vmatprep.mubr.msk.bf16.mxu1 %vm4074_vm1, %v4073_v18  ;;  %v4002_v29 = vld [vmem:[%s4777_s1 + $0x48] sm:$0xff]  }
 0x2f1   :  { %v4040_v30 = vpop.eup %4039  ;;  %3747 = vmatprep.subr.bf16.mxu1 %v4073_v18  ;;  %3737 = vmatprep.subr.bf16.mxu0 %v4000_v34 }
 0x2f2   :  { %v824_v32 = vmul.f32 %v4040_v30, %v4328_v38 }
 0x2f3   :  { %3738 = vmatpush3.bf16.msra.mxu0 %v4000_v34 }
 0x2f4   :  { %v832_v33 = vpack.c.bf16 %v824_v32, %v824_v32  ;;  %3759 = vmatprep.subr.bf16.mxu0 %v4073_v18 }
 0x2f7   :  { %3732 = vmatmul.mubr.msk.bf16.vlgmr.msra.gmra.mxu1 %vm736_vm6, %v832_v33  ;;  %v4003_v33 = vld [vmem:[%s4777_s1 + $0x30] sm:$0xff]  }
 0x2f8   :  { %3749 = vmatprep.mubr.msk.bf16.mxu1 %vm4074_vm1, %v4073_v18  ;;  %3748 = vmatpush3.bf16.msra.mxu1 %v1319_v19 }
 0x2f9   :  { %3753 = vmatprep.subr.bf16.mxu1 %v4073_v18 }
 0x2ff   :  { %3750 = vmatmul.mubr.msk.bf16.vlgmr.msra.gmra.mxu1 %vm736_vm6, %v4393_v35 }
 0x300   :  { %3755 = vmatprep.mubr.msk.bf16.mxu1 %vm4074_vm1, %v4073_v18  ;;  %3754 = vmatpush3.bf16.msra.mxu1 %v1362_v4 }
 0x301   :  { %3765 = vmatprep.subr.bf16.mxu1 %v4073_v18 }
 0x307   :  { %3756 = vmatmul.mubr.msk.bf16.vlgmr.msra.gmra.mxu1 %vm736_vm6, %v4393_v35 }
 0x308   :  { %3767 = vmatprep.mubr.msk.bf16.mxu1 %vm4074_vm1, %v4073_v18  ;;  %3766 = vmatpush3.bf16.msra.mxu1 %v1448_v36 }
 0x309   :  { %3777 = vmatprep.subr.bf16.mxu1 %v4073_v18 }
 0x30f   :  { %3768 = vmatmul.mubr.msk.bf16.vlgmr.msra.gmra.mxu1 %vm736_vm6, %v4393_v35 }
 0x310   :  { %3779 = vmatprep.mubr.msk.bf16.mxu1 %vm4074_vm1, %v4073_v18  ;;  %3778 = vmatpush3.bf16.msra.mxu1 %v1534_v5 }
 0x311   :  { %3789 = vmatprep.subr.bf16.mxu1 %v4073_v18 }
 0x317   :  { %3780 = vmatmul.mubr.msk.bf16.vlgmr.msra.gmra.mxu1 %vm736_vm6, %v4393_v35 }
 0x318   :  { %3791 = vmatprep.mubr.msk.bf16.mxu1 %vm4074_vm1, %v4073_v18  ;;  %3790 = vmatpush3.bf16.msra.mxu1 %v1620_v8 }
 0x319   :  { %3807 = vmatprep.subr.bf16.mxu1 %v4002_v29 }
 0x31f   :  { %3792 = vmatmul.mubr.msk.bf16.vlgmr.msra.gmra.mxu1 %vm736_vm6, %v4393_v35 }
 0x320   :  { %3808 = vmatpush3.bf16.msra.mxu1 %v4002_v29 }
 0x321   :  { %3809 = vmatprep.subr.bf16.mxu1 %v4004_v31 }
 0x324   :  { %3810 = vmatpush3.bf16.msra.mxu1 %v4004_v31 }
 0x325   :  { %3831 = vmatprep.subr.bf16.mxu1 %v4073_v18 }
 0x396   :  { %v874_v37 = vpop.f32.mrf.mxu0 }
 0x398   :  { %v3691_v38 = vpop.f32.mrf.mxu0 }
 0x39a   :  { %v877_v39 = vpop.f32.mrf.mxu0 }
 0x39c   :  { %v3692_v10 = vpop.f32.mrf.mxu0 }
 0x39e   :  { %v920_v40 = vpop.f32.mrf.mxu1  ;;  %v966_v41 = vpop.f32.mrf.mxu0 }
 0x39f   :  { %v1202_v42 = vpack.c.bf16 %v920_v40, %v874_v37  ;;  %v4005_v37 = vld [vmem:[%s4777_s1 + $0x58] sm:$0xff]  }
 0x3a0   :  { %v3697_v46 = vpop.f32.mrf.mxu1  ;;  %v3703_v48 = vpop.f32.mrf.mxu0 }
 0x3a1   :  { %3739 = vmatprep.mubr.msk.bf16.mxu0 %vm78_vm0, %v1202_v42 }
 0x3a2   :  { %v923_v49 = vpop.f32.mrf.mxu1  ;;  %v969_v51 = vpop.f32.mrf.mxu0 }
 0x3a4   :  { %v3698_v52 = vpop.f32.mrf.mxu1  ;;  %v3704_v53 = vpop.f32.mrf.mxu0 }
 0x3a6   :  { %v1058_v16 = vpop.f32.mrf.mxu0 }
 0x3a7   :  { %v1012_v55 = vpop.f32.mrf.mxu1 }
 0x3a8   :  { %v1203_v56 = vpack.c.bf16 %v1012_v55, %v966_v41  ;;  %v3715_v57 = vpop.f32.mrf.mxu0  ;;  %v4006_v55 = vld [vmem:[%s4777_s1 + $0x50] sm:$0xff]  }
 0x3a9   :  { %v3709_v60 = vpop.f32.mrf.mxu1 }
 0x3aa   :  { %3740 = vmatmul.mubr.msk.bf16.vlgmr.msra.gmra.mxu0 %vm78_vm0, %v1203_v56  ;;  %v1061_v59 = vpop.f32.mrf.mxu0 }
 0x3ab   :  { %v1015_v61 = vpop.f32.mrf.mxu1  ;;  %3760 = vmatpush3.bf16.msra.mxu0 %v1405_v58 }
 0x3ac   :  { %v3716_v0 = vpop.f32.mrf.mxu0  ;;  %3771 = vmatprep.subr.bf16.mxu0 %v4073_v18 }
 0x3ad   :  { %v3710_v45 = vpop.f32.mrf.mxu1 }
 0x3ae   :  { %v1150_v1 = vpop.f32.mrf.mxu0 }
 0x3af   :  { %v1104_v2 = vpop.f32.mrf.mxu1 }
 0x3b0   :  { %v1204_v3 = vpack.c.bf16 %v1104_v2, %v1058_v16  ;;  %v3727_v11 = vpop.f32.mrf.mxu0 }
 0x3b1   :  { %v3721_v12 = vpop.f32.mrf.mxu1 }
 0x3b2   :  { %3743 = vmatprep.mubr.msk.bf16.mxu0 %vm78_vm0, %v1204_v3  ;;  %v1153_v7 = vpop.f32.mrf.mxu0 }
 0x3b3   :  { %v1107_v27 = vpop.f32.mrf.mxu1  ;;  %v4508_v7 = vld [vmem:[%s4779_s2 + $0x4] ss:$0 sm:$0xff] }
 0x3b4   :  { %v3728_v6 = vpop.f32.mrf.mxu0 }
 0x3b5   :  { %v3722_v13 = vpop.f32.mrf.mxu1 }
 0x3b7   :  { %v1196_v47 = vpop.f32.mrf.mxu1 }
 0x3b8   :  { %v1205_v14 = vpack.c.bf16 %v1196_v47, %v1150_v1 }
 0x3b9   :  { %v3733_v50 = vpop.f32.mrf.mxu1 }
 0x3ba   :  { %3744 = vmatmul.mubr.msk.bf16.gmra.mxu0 %vm78_vm0, %v1205_v14 }
 0x3bb   :  { %v1199_v54 = vpop.f32.mrf.mxu1  ;;  %3761 = vmatprep.mubr.msk.bf16.mxu0 %vm4074_vm1, %v4073_v18 }
 0x3bc   :  { %v4515_v54 = vld [vmem:[%s4779_s2 + $0x3] ss:$0 sm:$0xff] }
 0x3bd   :  { %v3734_v44 = vpop.f32.mrf.mxu1 }
 0x3bf   :  { %v1355_v9 = vpop.f32.mrf.mxu1 }
 0x3c1   :  { %v3751_v20 = vpop.f32.mrf.mxu1 }
 0x3c2   :  { %3762 = vmatmul.mubr.msk.bf16.vlgmr.msra.gmra.mxu0 %vm736_vm6, %v4393_v35 }
 0x3c3   :  { %3772 = vmatpush3.bf16.msra.mxu0 %v1491_v17  ;;  %3773 = vmatprep.mubr.msk.bf16.mxu0 %vm4074_vm1, %v4073_v18  ;;  %v1358_v63 = vpop.f32.mrf.mxu1 }
 0x3c4   :  { %3783 = vmatprep.subr.bf16.mxu0 %v4073_v18 }
 0x3c5   :  { %v3752_v22 = vpop.f32.mrf.mxu1 }
 0x3c7   :  { %v1398_v25 = vpop.f32.mrf.mxu1 }
 0x3c8   :  { %v4448_v26 = vpack.c.bf16 %v1398_v25, %v1355_v9 }
 0x3c9   :  { %v3757_v28 = vpop.f32.mrf.mxu1 }
 0x3ca   :  { %3774 = vmatmul.mubr.msk.bf16.vlgmr.msra.gmra.mxu0 %vm736_vm6, %v4393_v35  ;;  %3811 = vmatprep.mubr.msk.bf16.mxu1 %vm78_vm0, %v4448_v26 }
 0x3cb   :  { %3784 = vmatpush3.bf16.msra.mxu0 %v1577_v62  ;;  %3785 = vmatprep.mubr.msk.bf16.mxu0 %vm4074_vm1, %v4073_v18  ;;  %v1401_v15 = vpop.f32.mrf.mxu1 }
 0x3cc   :  { %3795 = vmatprep.subr.bf16.mxu0 %v4001_v24 }
 0x3cd   :  { %v3758_v21 = vpop.f32.mrf.mxu1 }
 0x3cf   :  { %v1484_v30 = vpop.f32.mrf.mxu1 }
 0x3d1   :  { %v3769_v32 = vpop.f32.mrf.mxu1 }
 0x3d2   :  { %3786 = vmatmul.mubr.msk.bf16.vlgmr.msra.gmra.mxu0 %vm736_vm6, %v4393_v35 }
 0x3d3   :  { %3799 = vmatprep.mubr.msk.bf16.mxu0 %vm78_vm0, %v4448_v26  ;;  %3796 = vmatpush3.bf16.msra.mxu0 %v4001_v24  ;;  %v1487_v34 = vpop.f32.mrf.mxu1 }
 0x3d4   :  { %3797 = vmatprep.subr.bf16.mxu0 %v4003_v33 }
 0x3d5   :  { %v3770_v19 = vpop.f32.mrf.mxu1 }
 0x3d7   :  { %3798 = vmatpush3.bf16.msra.mxu0 %v4003_v33  ;;  %v1570_v35 = vpop.f32.mrf.mxu1 }
 0x3d8   :  { %3819 = vmatprep.subr.bf16.mxu0 %v4005_v37 }
 0x3d9   :  { %v3781_v4 = vpop.f32.mrf.mxu1 }
 0x3db   :  { %v1573_v36 = vpop.f32.mrf.mxu1 }
 0x3dd   :  { %v3782_v5 = vpop.f32.mrf.mxu1 }
 0x3df   :  { %v1656_v8 = vpop.f32.mrf.mxu1 }
 0x3e1   :  { %v3793_v38 = vpop.f32.mrf.mxu1 }
 0x3e3   :  { %v1659_v39 = vpop.f32.mrf.mxu1 }
 0x3e5   :  { %v3794_v10 = vpop.f32.mrf.mxu1 }
 0x3e6   :  { %v4538_v10 = vld [vmem:[%s4779_s2 + $0x5] ss:$0 sm:$0xff] }
 0x46a   :  { %v4470_v40 = vpop.f32.mrf.mxu0 }
 0x46c   :  { %v4472_v41 = vpop.f32.mrf.mxu0 }
 0x46e   :  { %v4474_v42 = vpop.f32.mrf.mxu0 }
 0x470   :  { %v4476_v46 = vpop.f32.mrf.mxu0 }
 0x47a   :  { %v4478_v48 = vpop.f32.mrf.mxu0 }
 0x47c   :  { %v4480_v49 = vpop.f32.mrf.mxu0 }
 0x47e   :  { %v4482_v51 = vpop.f32.mrf.mxu0 }
 0x480   :  { %v4484_v52 = vpop.f32.mrf.mxu0 }
 0x482   :  { %v1441_v53 = vpop.f32.mrf.mxu0 }
 0x483   :  { %v3456_v16 = vpack.c.bf16 %v1484_v30, %v1441_v53 }
 0x484   :  { %v3763_v56 = vpop.f32.mrf.mxu0 }
 0x485   :  { %3800 = vmatmul.mubr.msk.bf16.vlgmr.msra.gmra.mxu0 %vm78_vm0, %v3456_v16  ;;  %3812 = vmatmul.mubr.msk.bf16.vlgmr.msra.gmra.mxu1 %vm78_vm0, %v3456_v16 }
 0x486   :  { %v1444_v57 = vpop.f32.mrf.mxu0  ;;  %3820 = vmatpush3.bf16.msra.mxu0 %v4005_v37 }
 0x487   :  { %3821 = vmatprep.subr.bf16.mxu0 %v4006_v55 }
 0x488   :  { %v3764_v58 = vpop.f32.mrf.mxu0 }
 0x48a   :  { %v1527_v60 = vpop.f32.mrf.mxu0  ;;  %3822 = vmatpush3.bf16.msra.mxu0 %v4006_v55 }
 0x48b   :  { %v3457_v59 = vpack.c.bf16 %v1570_v35, %v1527_v60  ;;  %3843 = vmatprep.subr.bf16.mxu0 %v4073_v18 }
 0x48c   :  { %v3775_v61 = vpop.f32.mrf.mxu0 }
 0x48d   :  { %3803 = vmatprep.mubr.msk.bf16.mxu0 %vm78_vm0, %v3457_v59  ;;  %3815 = vmatprep.mubr.msk.bf16.mxu1 %vm78_vm0, %v3457_v59 }
 0x48e   :  { %v1530_v0 = vpop.f32.mrf.mxu0 }
 0x490   :  { %v3776_v45 = vpop.f32.mrf.mxu0 }
 0x492   :  { %v1613_v1 = vpop.f32.mrf.mxu0 }
 0x493   :  { %v3458_v2 = vpack.c.bf16 %v1656_v8, %v1613_v1 }
 0x494   :  { %v3787_v3 = vpop.f32.mrf.mxu0 }
 0x495   :  { %3804 = vmatmul.mubr.msk.bf16.gmra.mxu0 %vm78_vm0, %v3458_v2  ;;  %3816 = vmatmul.mubr.msk.bf16.gmra.mxu1 %vm78_vm0, %v3458_v2 }
 0x496   :  { %3823 = vmatprep.mubr.msk.bf16.mxu0 %vm78_vm0, %v4448_v26  ;;  %v1616_v11 = vpop.f32.mrf.mxu0  ;;  %3833 = vmatprep.mubr.msk.bf16.mxu1 %vm4074_vm1, %v4073_v18 }
 0x498   :  { %v3788_v12 = vpop.f32.mrf.mxu0 }
 0x49d   :  { %3824 = vmatmul.mubr.msk.bf16.vlgmr.msra.gmra.mxu0 %vm78_vm0, %v3456_v16 }
 0x49e   :  { %3827 = vmatprep.mubr.msk.bf16.mxu0 %vm78_vm0, %v3457_v59 }
 0x4a5   :  { %3828 = vmatmul.mubr.msk.bf16.gmra.mxu0 %vm78_vm0, %v3458_v2 }
 0x4a6   :  { %3845 = vmatprep.mubr.msk.bf16.mxu0 %vm4074_vm1, %v4073_v18 }
 0x545   :  { %v3813_v27 = vpop.f32.mrf.mxu1  ;;  %v3801_v13 = vpop.f32.mrf.mxu0 }
 0x546   :  { %v1868_v6 = vadd.f32 %v3813_v27, %v4508_v7  ;;  %v1770_v63 = vadd.f32 %v3801_v13, %v4515_v54 }
 0x547   :  { %v1859_v47 = vpop.f32.mrf.mxu1  ;;  %v1761_v9 = vpop.f32.mrf.mxu0 }
 0x548   :  { %v1892_v14 = vpack.c.bf16 %v1868_v6, %v1868_v6  ;;  %v1860_v50 = vadd.f32 %v4508_v7, %v1859_v47  ;;  %v1762_v26 = vadd.f32 %v4515_v54, %v1761_v9  ;;  %v1794_v15 = vpack.c.bf16 %v1770_v63, %v1770_v63 }
 0x549   :  { %v3814_v44 = vpop.f32.mrf.mxu1  ;;  %v3802_v28 = vpop.f32.mrf.mxu0 }
 0x54a   :  { %v2095_v17 = vsel %vm78_vm0, %v1892_v14, 0  ;;  %v1890_v62 = vpack.c.bf16 %v1860_v50, %v1860_v50  ;;  %v1792_v24 = vpack.c.bf16 %v1762_v26, %v1762_v26  ;;  %v1871_v30 = vadd.f32 %v3814_v44, %v4508_v7 }
 0x54b   :  { %v1862_v20 = vpop.f32.mrf.mxu1  ;;  %3844 = vmatpush3.bf16.xpose.msra.mxu0 %v2095_v17  ;;  %v1764_v29 = vpop.f32.mrf.mxu0  ;;  %v1773_v60 = vadd.f32 %v3802_v28, %v4515_v54 }
 0x54c   :  { %v2003_v22 = vsel %vm78_vm0, %v1890_v62, 0  ;;  %v1863_v25 = vadd.f32 %v4508_v7, %v1862_v20  ;;  %3855 = vmatprep.subr.bf16.mxu0 %v4073_v18  ;;  %v1765_v34 = vadd.f32 %v4515_v54, %v1764_v29  ;;  %v1893_v4 = vpack.c.bf16 %v1871_v30, %v1871_v30 }
 0x54d   :  { %3832 = vmatpush3.bf16.xpose.msra.mxu1 %v2003_v22  ;;  %v1795_v3 = vpack.c.bf16 %v1773_v60, %v1773_v60 }
 0x54e   :  { %3837 = vmatprep.subr.bf16.mxu1 %v4073_v18  ;;  %v1891_v21 = vpack.c.bf16 %v1863_v25, %v1863_v25  ;;  %v1793_v37 = vpack.c.bf16 %v1765_v34, %v1765_v34  ;;  %v2141_v16 = vsel %vm78_vm0, %v1893_v4, 0  ;;  %v1998_v34 = vsel %vm1997_vm8, -1e+30, %v4073_v18 }
 0x550   :  { %v2049_v32 = vsel %vm78_vm0, %v1891_v21, 0 }
 0x552   :  { %3846 = vmatmul.mubr.msk.bf16.vlgmr.msra.gmra.mxu0 %vm78_vm0, %v1794_v15 }
 0x553   :  { %3857 = vmatprep.mubr.msk.bf16.mxu0 %vm4074_vm1, %v4073_v18 }
 0x554   :  { %3834 = vmatmul.mubr.msk.bf16.vlgmr.msra.gmra.mxu1 %vm78_vm0, %v1792_v24 }
 0x555   :  { %v3805_v33 = vpop.f32.mrf.mxu0  ;;  %v3817_v31 = vpop.f32.mrf.mxu1  ;;  %3838 = vmatpush3.bf16.xpose.msra.mxu1 %v2049_v32  ;;  %3839 = vmatprep.mubr.msk.bf16.mxu1 %vm4074_vm1, %v4073_v18 }
 0x556   :  { %3849 = vmatprep.subr.bf16.mxu1 %v4073_v18  ;;  %v1884_v55 = vadd.f32 %v3817_v31, %v4508_v7  ;;  %v1786_v44 = vadd.f32 %v3805_v33, %v4515_v54 }
 0x557   :  { %v1777_v19 = vpop.f32.mrf.mxu0  ;;  %v1875_v35 = vpop.f32.mrf.mxu1 }
 0x558   :  { %v1876_v36 = vadd.f32 %v4508_v7, %v1875_v35  ;;  %v1778_v59 = vadd.f32 %v4515_v54, %v1777_v19  ;;  %v1896_v45 = vpack.c.bf16 %v1884_v55, %v1884_v55  ;;  %v1798_v25 = vpack.c.bf16 %v1786_v44, %v1786_v44 }
 0x559   :  { %v3806_v5 = vpop.f32.mrf.mxu0  ;;  %v3818_v8 = vpop.f32.mrf.mxu1 }
 0x55a   :  { %v1894_v38 = vpack.c.bf16 %v1876_v36, %v1876_v36  ;;  %v1796_v11 = vpack.c.bf16 %v1778_v59, %v1778_v59  ;;  %v2279_v6 = vsel %vm78_vm0, %v1896_v45, 0  ;;  %v1887_v13 = vadd.f32 %v3818_v8, %v4508_v7 }
 0x55b   :  { %v1780_v39 = vpop.f32.mrf.mxu0  ;;  %v1878_v53 = vpop.f32.mrf.mxu1  ;;  %v1789_v29 = vadd.f32 %v3806_v5, %v4515_v54 }
 0x55c   :  { %v2187_v56 = vsel %vm78_vm0, %v1894_v38, 0  ;;  %3840 = vmatmul.mubr.msk.bf16.vlgmr.msra.gmra.mxu1 %vm78_vm0, %v1793_v37  ;;  %v1879_v57 = vadd.f32 %v4508_v7, %v1878_v53  ;;  %v1781_v17 = vadd.f32 %v4515_v54, %v1780_v39  ;;  %v1897_v9 = vpack.c.bf16 %v1887_v13, %v1887_v13 }
 0x55d   :  { %v3825_v58 = vpop.f32.mrf.mxu0  ;;  %3850 = vmatpush3.bf16.xpose.msra.mxu1 %v2141_v16  ;;  %3856 = vmatpush3.bf16.xpose.msra.mxu0 %v2187_v56  ;;  %v1799_v32 = vpack.c.bf16 %v1789_v29, %v1789_v29 }
 0x55e   :  { %v4548_v61 = vadd.f32 %v3825_v58, %v4538_v10  ;;  %3851 = vmatprep.mubr.msk.bf16.mxu1 %vm4074_vm1, %v4073_v18  ;;  %3861 = vmatprep.subr.bf16.mxu1 %v4073_v18  ;;  %v1895_v1 = vpack.c.bf16 %v1879_v57, %v1879_v57  ;;  %v1797_v26 = vpack.c.bf16 %v1781_v17, %v1781_v17  ;;  %v2325_v15 = vsel %vm78_vm0, %v1897_v9, 0 }
 0x55f   :  { %v1957_v0 = vpop.f32.mrf.mxu0  ;;  %3867 = vmatprep.subr.bf16.mxu0 %v4073_v18 }
 0x560   :  { %v2233_v47 = vsel %vm78_vm0, %v1895_v1, 0  ;;  %v1958_v14 = vadd.f32 %v4538_v10, %v1957_v0 }
 0x561   :  { %v3826_v2 = vpop.f32.mrf.mxu0 }
 0x562   :  { %v4555_v12 = vadd.f32 %v3826_v2, %v4538_v10  ;;  %v1988_v20 = vpack.c.bf16 %v1958_v14, %v1958_v14 }
 0x563   :  { %v1960_v27 = vpop.f32.mrf.mxu0 }
 0x564   :  { %3852 = vmatmul.mubr.msk.bf16.vlgmr.msra.gmra.mxu1 %vm78_vm0, %v1795_v3  ;;  %3858 = vmatmul.mubr.msk.bf16.vlgmr.msra.gmra.mxu0 %vm78_vm0, %v1796_v11  ;;  %v2467_v21 = vsel %vm836_vm2, %v1988_v20, 0  ;;  %v1961_v24 = vadd.f32 %v4538_v10, %v1960_v27 }
 0x565   :  { %v3829_v50 = vpop.f32.mrf.mxu0  ;;  %3862 = vmatpush3.bf16.xpose.msra.mxu1 %v2233_v47  ;;  %3868 = vmatpush3.bf16.xpose.msra.mxu0 %v2279_v6 }
 0x566   :  { %v4566_v62 = vadd.f32 %v3829_v50, %v4538_v10  ;;  %3863 = vmatprep.mubr.msk.bf16.mxu1 %vm4074_vm1, %v4073_v18  ;;  %3869 = vmatprep.mubr.msk.bf16.mxu0 %vm4074_vm1, %v4073_v18  ;;  %v1989_v30 = vpack.c.bf16 %v1961_v24, %v1961_v24 }
 0x567   :  { %v1973_v7 = vpop.f32.mrf.mxu0  ;;  %3873 = vmatprep.subr.bf16.mxu1 %v4073_v18  ;;  %3879 = vmatprep.subr.bf16.mxu0 %v4073_v18 }
 0x568   :  { %v4575_v63 = vadd.f32 %v4538_v10, %v1973_v7  ;;  %v2513_v33 = vsel %vm836_vm2, %v1989_v30, 0 }
 0x569   :  { %v3830_v22 = vpop.f32.mrf.mxu0 }
 0x56a   :  { %v4578_v28 = vadd.f32 %v3830_v22, %v4538_v10 }
 0x56b   :  { %v4598_v54 = vpop.f32.mrf.mxu0 }
 0x56c   :  { %3864 = vmatmul.mubr.msk.bf16.vlgmr.msra.gmra.mxu1 %vm78_vm0, %v1797_v26  ;;  %3870 = vmatmul.mubr.msk.bf16.vlgmr.msra.gmra.mxu0 %vm78_vm0, %v1798_v25 }
 0x56d   :  { %3874 = vmatpush3.bf16.xpose.msra.mxu1 %v2325_v15  ;;  %3880 = vmatpush3.bf16.msra.mxu0 %v2467_v21 }
 0x56e   :  { %3875 = vmatprep.mubr.msk.bf16.mxu1 %vm4074_vm1, %v4073_v18  ;;  %3885 = vmatprep.subr.bf16.mxu1 %v4073_v18 }
 0x56f   :  { %3881 = vmatprep.mubr.msk.bf16.mxu0 %vm4074_vm1, %v4073_v18  ;;  %3891 = vmatprep.subr.bf16.mxu0 %v4073_v18 }
 0x574   :  { %3876 = vmatmul.mubr.msk.bf16.vlgmr.msra.gmra.mxu1 %vm78_vm0, %v1799_v32 }
 0x575   :  { %3886 = vmatpush3.bf16.msra.mxu1 %v2513_v33  ;;  %3887 = vmatprep.mubr.msk.bf16.mxu1 %vm4074_vm1, %v4073_v18 }
 0x576   :  { %3897 = vmatprep.subr.bf16.mxu1 %v4073_v18 }
 0x612   :  { %v2131_v31 = vpop.f32.mrf.mxu0 }
 0x613   :  { %v2132_v8 = vadd.f32 %v2131_v31, %v1998_v34 }
 0x614   :  { %v2039_v19 = vpop.f32.mrf.mxu1  ;;  %v3847_v35 = vpop.f32.mrf.mxu0 }
 0x615   :  { %v2040_v4 = vadd.f32 %v2039_v19, %v1998_v34  ;;  %v2373_v16 = vsel %vm736_vm6, %v2132_v8, -inf }
 0x616   :  { %v3835_v36 = vpop.f32.mrf.mxu1  ;;  %v2134_v5 = vpop.f32.mrf.mxu0 }
 0x617   :  { %v2367_v37 = vsel %vm736_vm6, %v2040_v4, -inf }
 0x618   :  { %v3848_v38 = vpop.f32.mrf.mxu0  ;;  %2368 = vmax.xlane.f32.xlu0 %v2367_v37  ;;  %v2042_v39 = vpop.f32.mrf.mxu1 }
 0x61a   :  { %v3836_v53 = vpop.f32.mrf.mxu1 }
 0x61c   :  { %2374 = vmax.xlane.f32.xlu0 %v2373_v16  ;;  %v2085_v43 = vpop.f32.mrf.mxu1 }
 0x61d   :  { %v2086_v23 = vadd.f32 %v2085_v43, %v1998_v34 }
 0x61e   :  { %v3841_v55 = vpop.f32.mrf.mxu1 }
 0x61f   :  { %v2370_v56 = vsel %vm736_vm6, %v2086_v23, -inf }
 0x620   :  { %2371 = vmax.xlane.f32.xlu1 %v2370_v56  ;;  %v2088_v57 = vpop.f32.mrf.mxu1 }
 0x622   :  { %v3842_v58 = vpop.f32.mrf.mxu1 }
 0x624   :  { %v2177_v60 = vpop.f32.mrf.mxu1  ;;  %v2223_v59 = vpop.f32.mrf.mxu0 }
 0x625   :  { %v2178_v0 = vadd.f32 %v2177_v60, %v1998_v34  ;;  %v2224_v45 = vadd.f32 %v2223_v59, %v1998_v34 }
 0x626   :  { %v3853_v1 = vpop.f32.mrf.mxu1  ;;  %v3859_v2 = vpop.f32.mrf.mxu0 }
 0x627   :  { %v2379_v3 = vsel %vm736_vm6, %v2224_v45, -inf  ;;  %v2376_v11 = vsel %vm736_vm6, %v2178_v0, -inf }
 0x628   :  { %v2226_v27 = vpop.f32.mrf.mxu0  ;;  %2380 = vmax.xlane.f32.xlu0 %v2379_v3  ;;  %2377 = vmax.xlane.f32.xlu1 %v2376_v11  ;;  %v2180_v6 = vpop.f32.mrf.mxu1 }
 0x62a   :  { %v3854_v13 = vpop.f32.mrf.mxu1  ;;  %v3860_v47 = vpop.f32.mrf.mxu0 }
 0x62c   :  { %v2269_v14 = vpop.f32.mrf.mxu1  ;;  %v2315_v50 = vpop.f32.mrf.mxu0 }
 0x62d   :  { %v2270_v44 = vadd.f32 %v2269_v14, %v1998_v34  ;;  %v2316_v17 = vadd.f32 %v2315_v50, %v1998_v34 }
 0x62e   :  { %v3865_v7 = vpop.f32.mrf.mxu1  ;;  %v3871_v9 = vpop.f32.mrf.mxu0 }
 0x62f   :  { %v2385_v20 = vsel %vm736_vm6, %v2316_v17, -inf  ;;  %v2382_v22 = vsel %vm736_vm6, %v2270_v44, -inf }
 0x630   :  { %v2318_v25 = vpop.f32.mrf.mxu0  ;;  %2386 = vmax.xlane.f32.xlu0 %v2385_v20  ;;  %2383 = vmax.xlane.f32.xlu1 %v2382_v22  ;;  %v2272_v26 = vpop.f32.mrf.mxu1 }
 0x632   :  { %v3866_v15 = vpop.f32.mrf.mxu1  ;;  %v3872_v21 = vpop.f32.mrf.mxu0 }
 0x634   :  { %v2361_v24 = vpop.f32.mrf.mxu1 }
 0x635   :  { %v2362_v29 = vadd.f32 %v2361_v24, %v1998_v34 }
 0x636   :  { %v3877_v30 = vpop.f32.mrf.mxu1 }
 0x637   :  { %v2388_v32 = vsel %vm736_vm6, %v2362_v29, -inf  ;;  %v1990_v30 = vpack.c.bf16 %v4548_v61, %v4548_v61  ;;  %v1991_v61 = vpack.c.bf16 %v4555_v12, %v4555_v12  ;;  %v1977_v12 = vadd.f32 %v4538_v10, %v4598_v54 }
 0x638   :  { %2389 = vmax.xlane.f32.xlu1 %v2388_v32  ;;  %v2364_v33 = vpop.f32.mrf.mxu1 }
 0x63a   :  { %v3878_v31 = vpop.f32.mrf.mxu1 }
 0x6a1   :  { %v2369_v19 = vpop.xlane.xlu0 %2368 }
 0x6a2   :  { %v2391_v35 = vsub.f32 %v2040_v4, %v2369_v19 }
 0x6a4   :  { %v2399_v36 = vmul.f32 1.442695, %v2391_v35 }
 0x6a5   :  { %v2375_v5 = vpop.xlane.xlu0 %2374 }
 0x6a6   :  { %4041 = vpow2.f32 %v2399_v36  ;;  %v2393_v37 = vsub.f32 %v2132_v8, %v2375_v5  ;;  %v2559_v36 = vsel %vm836_vm2, %v1990_v30, 0 }
 0x6a8   :  { %v2403_v38 = vmul.f32 1.442695, %v2393_v37 }
 0x6a9   :  { %v2372_v39 = vpop.xlane.xlu1 %2371 }
 0x6aa   :  { %4043 = vpow2.f32 %v2403_v38  ;;  %v2392_v53 = vsub.f32 %v2086_v23, %v2372_v39  ;;  %v1992_v38 = vpack.c.bf16 %v4575_v63, %v4575_v63 }
 0x6ac   :  { %v2401_v16 = vmul.f32 1.442695, %v2392_v53 }
 0x6ae   :  { %4045 = vpow2.f32 %v2401_v16 }
 0x6b1   :  { %v2381_v43 = vpop.xlane.xlu0 %2380  ;;  %v2378_v34 = vpop.xlane.xlu1 %2377 }
 0x6b2   :  { %v2395_v55 = vsub.f32 %v2224_v45, %v2381_v43  ;;  %v2394_v56 = vsub.f32 %v2178_v0, %v2378_v34 }
 0x6b3   :  { %v4042_v57 = vpop.eup %4041 }
 0x6b4   :  { %v2407_v58 = vmul.f32 1.442695, %v2395_v55  ;;  %v2405_v60 = vmul.f32 1.442695, %v2394_v56  ;;  %v2415_v59 = vsel %vm736_vm6, %v4042_v57, 0.0  ;;  %v2605_v55 = vsel %vm836_vm2, %v1991_v61, 0 }
 0x6b5   :  { %2416 = vadd.xlane.f32.xlu0 %v2415_v59  ;;  %v2651_v56 = vsel %vm836_vm2, %v1992_v38, 0  ;;  %v1993_v59 = vpack.c.bf16 %v1977_v12, %v1977_v12 }
 0x6b6   :  { %4047 = vpow2.f32 %v2407_v58  ;;  %v1994_v58 = vpack.c.bf16 %v4566_v62, %v4566_v62 }
 0x6b7   :  { %v4044_v4 = vpop.eup %4043  ;;  %4049 = vpow2.f32 %v2405_v60 }
 0x6b8   :  { %v2421_v8 = vsel %vm736_vm6, %v4044_v4, 0.0 }
 0x6b9   :  { %2422 = vadd.xlane.f32.xlu0 %v2421_v8  ;;  %v2387_v1 = vpop.xlane.xlu0 %2386  ;;  %v2384_v23 = vpop.xlane.xlu1 %2383 }
 0x6ba   :  { %v2397_v2 = vsub.f32 %v2316_v17, %v2387_v1  ;;  %v2396_v3 = vsub.f32 %v2270_v44, %v2384_v23  ;;  %v2743_v1 = vsel %vm836_vm2, %v1994_v58, 0  ;;  %v2697_v23 = vsel %vm836_vm2, %v1993_v59, 0 }
 0x6bb   :  { %v4046_v11 = vpop.eup %4045 }
 0x6bc   :  { %v2411_v27 = vmul.f32 1.442695, %v2397_v2  ;;  %v2409_v45 = vmul.f32 1.442695, %v2396_v3  ;;  %v2418_v0 = vsel %vm736_vm6, %v4046_v11, 0.0 }
 0x6bd   :  { %2419 = vadd.xlane.f32.xlu1 %v2418_v0 }
 0x6be   :  { %4051 = vpow2.f32 %v2411_v27 }
 0x6bf   :  { %4053 = vpow2.f32 %v2409_v45 }
 0x6c1   :  { %v2390_v6 = vpop.xlane.xlu1 %2389 }
 0x6c2   :  { %v2398_v13 = vsub.f32 %v2362_v29, %v2390_v6 }
 0x6c3   :  { %v4048_v47 = vpop.eup %4047 }
 0x6c4   :  { %v4615_v14 = vpop.eup %4049  ;;  %v2413_v50 = vmul.f32 1.442695, %v2398_v13  ;;  %v2427_v7 = vsel %vm736_vm6, %v4048_v47, 0.0 }
 0x6c5   :  { %2428 = vadd.xlane.f32.xlu0 %v2427_v7  ;;  %v2424_v44 = vsel %vm736_vm6, %v4615_v14, 0.0 }
 0x6c6   :  { %4055 = vpow2.f32 %v2413_v50  ;;  %2425 = vadd.xlane.f32.xlu1 %v2424_v44  ;;  %v4008_v50 = vld [vmem:[%s4780_s3 + $0x10] sm:$0xff]  }
 0x6cb   :  { %v4620_v17 = vpop.eup %4051 }
 0x6cc   :  { %v4622_v9 = vpop.eup %4053  ;;  %v2433_v20 = vsel %vm736_vm6, %v4620_v17, 0.0 }
 0x6cd   :  { %2434 = vadd.xlane.f32.xlu0 %v2433_v20  ;;  %v2430_v22 = vsel %vm736_vm6, %v4622_v9, 0.0 }
 0x6ce   :  { %2431 = vadd.xlane.f32.xlu1 %v2430_v22 }
 0x6d3   :  { %v4628_v25 = vpop.eup %4055 }
 0x6d4   :  { %v2436_v26 = vsel %vm736_vm6, %v4628_v25, 0.0 }
 0x6d5   :  { %2437 = vadd.xlane.f32.xlu1 %v2436_v26 }
 0x73e   :  { %v2417_v15 = vpop.xlane.xlu0 %2416 }
 0x73f   :  { %4057 = vrcp.f32 %v2417_v15 }
 0x742   :  { %v2423_v21 = vpop.xlane.xlu0 %2422 }
 0x743   :  { %4059 = vrcp.f32 %v2423_v21 }
 0x746   :  { %v2420_v24 = vpop.xlane.xlu1 %2419 }
 0x747   :  { %4061 = vrcp.f32 %v2420_v24 }
 0x74c   :  { %v4058_v29 = vpop.eup %4057 }
 0x74d   :  { %v2447_v32 = vmul.f32 %v4058_v29, %v4042_v57 }
 0x74e   :  { %v2429_v33 = vpop.xlane.xlu0 %2428 }
 0x74f   :  { %4063 = vrcp.f32 %v2429_v33  ;;  %v2426_v31 = vpop.xlane.xlu1 %2425  ;;  %v2455_v19 = vpack.c.bf16 %v2447_v32, %v2447_v32 }
 0x750   :  { %v4060_v35 = vpop.eup %4059  ;;  %4065 = vrcp.f32 %v2426_v31 }
 0x751   :  { %3882 = vmatmul.mubr.msk.bf16.vlgmr.msra.gmra.mxu0 %vm736_vm6, %v2455_v19  ;;  %v2449_v5 = vmul.f32 %v4060_v35, %v4044_v4 }
 0x752   :  { %3892 = vmatpush3.bf16.msra.mxu0 %v2559_v36  ;;  %3893 = vmatprep.mubr.msk.bf16.mxu0 %vm4074_vm1, %v4073_v18 }
 0x753   :  { %3903 = vmatprep.subr.bf16.mxu0 %v4073_v18  ;;  %v2457_v34 = vpack.c.bf16 %v2449_v5, %v2449_v5 }
 0x754   :  { %v4062_v37 = vpop.eup %4061 }
 0x755   :  { %v2448_v39 = vmul.f32 %v4062_v37, %v4046_v11  ;;  %v1995_v11 = vpack.c.bf16 %v4578_v28, %v4578_v28 }
 0x756   :  { %v2435_v53 = vpop.xlane.xlu0 %2434 }
 0x757   :  { %4067 = vrcp.f32 %v2435_v53  ;;  %v2432_v16 = vpop.xlane.xlu1 %2431  ;;  %v2456_v43 = vpack.c.bf16 %v2448_v39, %v2448_v39  ;;  %v2789_v6 = vsel %vm836_vm2, %v1995_v11, 0 }
 0x758   :  { %4069 = vrcp.f32 %v2432_v16 }
 0x759   :  { %3888 = vmatmul.mubr.msk.bf16.vlgmr.msra.gmra.mxu1 %vm736_vm6, %v2456_v43  ;;  %3894 = vmatmul.mubr.msk.bf16.vlgmr.msra.gmra.mxu0 %vm736_vm6, %v2457_v34 }
 0x75a   :  { %3898 = vmatpush3.bf16.msra.mxu1 %v2605_v55  ;;  %3904 = vmatpush3.bf16.msra.mxu0 %v2651_v56 }
 0x75b   :  { %3899 = vmatprep.mubr.msk.bf16.mxu1 %vm4074_vm1, %v4073_v18  ;;  %3905 = vmatprep.mubr.msk.bf16.mxu0 %vm4074_vm1, %v4073_v18 }
 0x75c   :  { %v4064_v63 = vpop.eup %4063  ;;  %3909 = vmatprep.subr.bf16.mxu1 %v4073_v18  ;;  %3915 = vmatprep.subr.bf16.mxu0 %v4073_v18 }
 0x75d   :  { %v4066_v57 = vpop.eup %4065  ;;  %v2451_v60 = vmul.f32 %v4064_v63, %v4048_v47 }
 0x75e   :  { %v2438_v10 = vpop.xlane.xlu1 %2437  ;;  %v2450_v54 = vmul.f32 %v4066_v57, %v4615_v14  ;;  %v4007_v14 = vld [vmem:[%s4780_s3 + $0x18] sm:$0xff]  }
 0x75f   :  { %4071 = vrcp.f32 %v2438_v10  ;;  %v2459_v4 = vpack.c.bf16 %v2451_v60, %v2451_v60  ;;  %v3440_v10 = vld [vmem:[%s4782_s4 + $0x1] ss:$0 sm:$0xff] }
 0x760   :  { %v2458_v8 = vpack.c.bf16 %v2450_v54, %v2450_v54 }
 0x761   :  { %3906 = vmatmul.mubr.msk.bf16.vlgmr.msra.gmra.mxu0 %vm736_vm6, %v2459_v4 }
 0x762   :  { %3900 = vmatmul.mubr.msk.bf16.vlgmr.msra.gmra.mxu1 %vm736_vm6, %v2458_v8  ;;  %3916 = vmatpush3.bf16.msra.mxu0 %v2743_v1 }
 0x763   :  { %3910 = vmatpush3.bf16.msra.mxu1 %v2697_v23  ;;  %3911 = vmatprep.mubr.msk.bf16.mxu1 %vm4074_vm1, %v4073_v18 }
 0x764   :  { %v4068_v62 = vpop.eup %4067  ;;  %3917 = vmatprep.mubr.msk.bf16.mxu0 %vm4074_vm1, %v4073_v18  ;;  %3921 = vmatprep.subr.bf16.mxu1 %v4073_v18 }
 0x765   :  { %v4070_v2 = vpop.eup %4069  ;;  %v2453_v3 = vmul.f32 %v4068_v62, %v4620_v17  ;;  %3927 = vmatprep.subr.bf16.mxu0 %v4007_v14 }
 0x766   :  { %v2452_v27 = vmul.f32 %v4070_v2, %v4622_v9 }
 0x767   :  { %v2461_v45 = vpack.c.bf16 %v2453_v3, %v2453_v3 }
 0x768   :  { %v2460_v0 = vpack.c.bf16 %v2452_v27, %v2452_v27  ;;  %v2937_v27 = vld [vmem:[%s4783_s6] sm:$0xf] }
 0x769   :  { %3918 = vmatmul.mubr.msk.bf16.vlgmr.msra.gmra.mxu0 %vm736_vm6, %v2461_v45 }
 0x76a   :  { %3912 = vmatmul.mubr.msk.bf16.vlgmr.msra.gmra.mxu1 %vm736_vm6, %v2460_v0  ;;  %3928 = vmatpush3.bf16.msra.mxu0 %v4007_v14 }
 0x76b   :  { %3922 = vmatpush3.bf16.msra.mxu1 %v2789_v6  ;;  %3923 = vmatprep.mubr.msk.bf16.mxu1 %vm4074_vm1, %v4073_v18 }
 0x76c   :  { %v4072_v13 = vpop.eup %4071  ;;  %3939 = vmatprep.subr.bf16.mxu1 %v4073_v18  ;;  %3929 = vmatprep.subr.bf16.mxu0 %v4008_v50 }
 0x76d   :  { %v2454_v47 = vmul.f32 %v4072_v13, %v4628_v25 }
 0x76e   :  { %3930 = vmatpush3.bf16.msra.mxu0 %v4008_v50 }
 0x76f   :  { %v2462_v28 = vpack.c.bf16 %v2454_v47, %v2454_v47  ;;  %3951 = vmatprep.subr.bf16.mxu0 %v4073_v18 }
 0x772   :  { %3924 = vmatmul.mubr.msk.bf16.vlgmr.msra.gmra.mxu1 %vm736_vm6, %v2462_v28 }
 0x773   :  { %3941 = vmatprep.mubr.msk.bf16.mxu1 %vm4074_vm1, %v4073_v18 }
 0x811   :  { %v2503_v7 = vpop.f32.mrf.mxu0 }
 0x813   :  { %v3883_v44 = vpop.f32.mrf.mxu0 }
 0x815   :  { %v2506_v17 = vpop.f32.mrf.mxu0 }
 0x817   :  { %v3884_v9 = vpop.f32.mrf.mxu0 }
 0x819   :  { %v2549_v20 = vpop.f32.mrf.mxu1  ;;  %v2595_v22 = vpop.f32.mrf.mxu0 }
 0x81a   :  { %v2831_v25 = vpack.c.bf16 %v2549_v20, %v2503_v7 }
 0x81b   :  { %v3889_v26 = vpop.f32.mrf.mxu1  ;;  %v3895_v15 = vpop.f32.mrf.mxu0 }
 0x81c   :  { %3931 = vmatprep.mubr.msk.bf16.mxu0 %vm78_vm0, %v2831_v25 }
 0x81d   :  { %v2552_v21 = vpop.f32.mrf.mxu1  ;;  %v2598_v24 = vpop.f32.mrf.mxu0 }
 0x81f   :  { %v3890_v29 = vpop.f32.mrf.mxu1  ;;  %v3896_v30 = vpop.f32.mrf.mxu0 }
 0x821   :  { %v2687_v32 = vpop.f32.mrf.mxu0 }
 0x822   :  { %v2641_v33 = vpop.f32.mrf.mxu1 }
 0x823   :  { %v2832_v31 = vpack.c.bf16 %v2641_v33, %v2595_v22  ;;  %v3907_v19 = vpop.f32.mrf.mxu0 }
 0x824   :  { %v3901_v35 = vpop.f32.mrf.mxu1 }
 0x825   :  { %3932 = vmatmul.mubr.msk.bf16.vlgmr.msra.gmra.mxu0 %vm78_vm0, %v2832_v31  ;;  %v2690_v36 = vpop.f32.mrf.mxu0  ;;  %v3364_v31 = vld [vmem:[%s4782_s4] ss:$0 sm:$0xff] }
 0x826   :  { %v2644_v5 = vpop.f32.mrf.mxu1  ;;  %v1284_v19 = vadd.f32 %v4470_v40, %v3364_v31  ;;  %v1276_v36 = vadd.f32 %v3364_v31, %v4472_v41  ;;  %v1279_v41 = vadd.f32 %v3364_v31, %v4476_v46 }
 0x827   :  { %v3908_v37 = vpop.f32.mrf.mxu0 }
 0x828   :  { %v3902_v61 = vpop.f32.mrf.mxu1 }
 0x829   :  { %v2779_v38 = vpop.f32.mrf.mxu0 }
 0x82a   :  { %v2733_v39 = vpop.f32.mrf.mxu1 }
 0x82b   :  { %v2833_v53 = vpack.c.bf16 %v2733_v39, %v2687_v32  ;;  %v3919_v16 = vpop.f32.mrf.mxu0 }
 0x82c   :  { %v3913_v43 = vpop.f32.mrf.mxu1 }
 0x82d   :  { %3935 = vmatprep.mubr.msk.bf16.mxu0 %vm78_vm0, %v2833_v53  ;;  %v2782_v34 = vpop.f32.mrf.mxu0 }
 0x82e   :  { %v2736_v55 = vpop.f32.mrf.mxu1 }
 0x82f   :  { %v3920_v56 = vpop.f32.mrf.mxu0 }
 0x830   :  { %v3914_v12 = vpop.f32.mrf.mxu1 }
 0x832   :  { %v2825_v63 = vpop.f32.mrf.mxu1 }
 0x833   :  { %v2834_v57 = vpack.c.bf16 %v2825_v63, %v2779_v38  ;;  %v1287_v63 = vadd.f32 %v4474_v42, %v3364_v31 }
 0x834   :  { %v3925_v58 = vpop.f32.mrf.mxu1 }
 0x835   :  { %3936 = vmatmul.mubr.msk.bf16.gmra.mxu0 %vm78_vm0, %v2834_v57  ;;  %v1292_v57 = vadd.f32 %v3364_v31, %v4480_v49 }
 0x836   :  { %v2828_v60 = vpop.f32.mrf.mxu1  ;;  %3953 = vmatprep.mubr.msk.bf16.mxu0 %vm4074_vm1, %v4073_v18 }
 0x838   :  { %v3926_v59 = vpop.f32.mrf.mxu1 }
 0x8e5   :  { %v3933_v54 = vpop.f32.mrf.mxu0 }
 0x8e6   :  { %v2915_v4 = vadd.f32 %v3933_v54, %v3440_v10 }
 0x8e7   :  { %v2906_v8 = vpop.f32.mrf.mxu0 }
 0x8e8   :  { %v2940_v1 = vpack.c.bf16 %v2915_v4, %v2915_v4  ;;  %v2907_v23 = vadd.f32 %v3440_v10, %v2906_v8 }
 0x8e9   :  { %v3934_v62 = vpop.f32.mrf.mxu0 }
 0x8ea   :  { %v3036_v2 = vsel %vm836_vm2, %v2940_v1, 0  ;;  %v2938_v3 = vpack.c.bf16 %v2907_v23, %v2907_v23  ;;  %v2918_v13 = vadd.f32 %v3934_v62, %v3440_v10  ;;  %v1300_v1 = vadd.f32 %v4478_v48, %v3364_v31 }
 0x8eb   :  { %v2909_v11 = vpop.f32.mrf.mxu0  ;;  %3952 = vmatpush3.bf16.msra.mxu0 %v3036_v2  ;;  %v1295_v23 = vadd.f32 %v3364_v31, %v4484_v52 }
 0x8ec   :  { %v2950_v45 = vsel %vm836_vm2, %v2938_v3, 0  ;;  %v2910_v0 = vadd.f32 %v3440_v10, %v2909_v11  ;;  %3963 = vmatprep.subr.bf16.mxu0 %v4073_v18  ;;  %v2941_v28 = vpack.c.bf16 %v2918_v13, %v2918_v13  ;;  %v1303_v13 = vadd.f32 %v4482_v51, %v3364_v31 }
 0x8ed   :  { %3940 = vmatpush3.bf16.msra.mxu1 %v2950_v45 }
 0x8ee   :  { %v2939_v6 = vpack.c.bf16 %v2910_v0, %v2910_v0  ;;  %3954 = vmatmul.mubr.msk.bf16.vlgmr.msra.gmra.mxu0 %vm736_vm6, %v2937_v27  ;;  %3945 = vmatprep.subr.bf16.mxu1 %v4073_v18  ;;  %v3079_v7 = vsel %vm836_vm2, %v2941_v28, 0 }
 0x8ef   :  { %3965 = vmatprep.mubr.msk.bf16.mxu0 %vm4074_vm1, %v4073_v18 }
 0x8f0   :  { %v2993_v47 = vsel %vm836_vm2, %v2939_v6, 0  ;;  %3942 = vmatmul.mubr.msk.bf16.vlgmr.msra.gmra.mxu1 %vm736_vm6, %v2937_v27 }
 0x8f1   :  { %3946 = vmatpush3.bf16.msra.mxu1 %v2993_v47  ;;  %3947 = vmatprep.mubr.msk.bf16.mxu1 %vm4074_vm1, %v4073_v18 }
 0x8f2   :  { %3957 = vmatprep.subr.bf16.mxu1 %v4073_v18 }
 0x8f5   :  { %v3937_v14 = vpop.f32.mrf.mxu0 }
 0x8f6   :  { %v2931_v44 = vadd.f32 %v3937_v14, %v3440_v10 }
 0x8f7   :  { %v2922_v50 = vpop.f32.mrf.mxu0 }
 0x8f8   :  { %v2923_v17 = vadd.f32 %v3440_v10, %v2922_v50  ;;  %3948 = vmatmul.mubr.msk.bf16.vlgmr.msra.gmra.mxu1 %vm736_vm6, %v2937_v27  ;;  %v2944_v25 = vpack.c.bf16 %v2931_v44, %v2931_v44 }
 0x8f9   :  { %3958 = vmatpush3.bf16.msra.mxu1 %v3079_v7  ;;  %v3938_v9 = vpop.f32.mrf.mxu0  ;;  %3959 = vmatprep.mubr.msk.bf16.mxu1 %vm4074_vm1, %v4073_v18 }
 0x8fa   :  { %v2942_v20 = vpack.c.bf16 %v2923_v17, %v2923_v17  ;;  %3969 = vmatprep.subr.bf16.mxu1 %v4073_v18  ;;  %v3208_v24 = vsel %vm836_vm2, %v2944_v25, 0  ;;  %v2934_v29 = vadd.f32 %v3938_v9, %v3440_v10 }
 0x8fb   :  { %v2925_v22 = vpop.f32.mrf.mxu0 }
 0x8fc   :  { %v3122_v26 = vsel %vm836_vm2, %v2942_v20, 0  ;;  %v2926_v15 = vadd.f32 %v3440_v10, %v2925_v22  ;;  %v2945_v32 = vpack.c.bf16 %v2934_v29, %v2934_v29 }
 0x8fd   :  { %3964 = vmatpush3.bf16.msra.mxu0 %v3122_v26 }
 0x8fe   :  { %v2943_v21 = vpack.c.bf16 %v2926_v15, %v2926_v15  ;;  %3975 = vmatprep.subr.bf16.mxu0 %v4073_v18  ;;  %v3251_v33 = vsel %vm836_vm2, %v2945_v32, 0 }
 0x900   :  { %v3165_v30 = vsel %vm836_vm2, %v2943_v21, 0  ;;  %3960 = vmatmul.mubr.msk.bf16.vlgmr.msra.gmra.mxu1 %vm736_vm6, %v2937_v27  ;;  %3966 = vmatmul.mubr.msk.bf16.vlgmr.msra.gmra.mxu0 %vm736_vm6, %v2937_v27 }
 0x901   :  { %3970 = vmatpush3.bf16.msra.mxu1 %v3165_v30  ;;  %3976 = vmatpush3.bf16.msra.mxu0 %v3208_v24 }
 0x902   :  { %3971 = vmatprep.mubr.msk.bf16.mxu1 %vm4074_vm1, %v4073_v18  ;;  %3977 = vmatprep.mubr.msk.bf16.mxu0 %vm4074_vm1, %v4073_v18 }
 0x903   :  { %3981 = vmatprep.subr.bf16.mxu1 %v4073_v18 }
 0x908   :  { %3972 = vmatmul.mubr.msk.bf16.vlgmr.msra.gmra.mxu1 %vm736_vm6, %v2937_v27  ;;  %3978 = vmatmul.mubr.msk.bf16.vlgmr.msra.gmra.mxu0 %vm736_vm6, %v2937_v27 }
 0x909   :  { %3982 = vmatpush3.bf16.msra.mxu1 %v3251_v33  ;;  %3983 = vmatprep.mubr.msk.bf16.mxu1 %vm4074_vm1, %v4073_v18 }
 0x910   :  { %3984 = vmatmul.mubr.msk.bf16.vlgmr.msra.gmra.mxu1 %vm736_vm6, %v2937_v27 }
 0x9ae   :  { %v3072_v35 = vpop.f32.mrf.mxu0 }
 0x9af   :  { %v3295_v5 = vadd.f32 %v3072_v35, %v1284_v19 }
 0x9b0   :  { %v2986_v37 = vpop.f32.mrf.mxu1  ;;  %v3955_v61 = vpop.f32.mrf.mxu0 }
 0x9b1   :  { %3303 = vst.msk [vmem:[%s4784_s7 + $0x10] sm:$0xff] %vm78_vm0, %v3295_v5  ;;  %v3293_v18 = vadd.f32 %v2986_v37, %v1276_v36 }
 0x9b2   :  { %v3943_v38 = vpop.f32.mrf.mxu1  ;;  %v3075_v39 = vpop.f32.mrf.mxu0 }
 0x9b3   :  { %3301 = vst.msk [vmem:[%s4784_s7] sm:$0xff] %vm78_vm0, %v3293_v18 }
 0x9b4   :  { %v2989_v40 = vpop.f32.mrf.mxu1  ;;  %v3956_v53 = vpop.f32.mrf.mxu0 }
 0x9b6   :  { %v3944_v16 = vpop.f32.mrf.mxu1 }
 0x9b8   :  { %v3029_v43 = vpop.f32.mrf.mxu1 }
 0x9b9   :  { %v3294_v34 = vadd.f32 %v3029_v43, %v1279_v41 }
 0x9ba   :  { %v3949_v55 = vpop.f32.mrf.mxu1 }
 0x9bb   :  { %3302 = vst.msk [vmem:[%s4784_s7 + $0x8] sm:$0xff] %vm78_vm0, %v3294_v34 }
 0x9bc   :  { %v3032_v56 = vpop.f32.mrf.mxu1 }
 0x9be   :  { %v3950_v12 = vpop.f32.mrf.mxu1 }
 0x9c0   :  { %v3115_v58 = vpop.f32.mrf.mxu1  ;;  %v3158_v60 = vpop.f32.mrf.mxu0 }
 0x9c1   :  { %v3296_v59 = vadd.f32 %v3115_v58, %v1287_v63  ;;  %v3297_v10 = vadd.f32 %v3158_v60, %v1292_v57 }
 0x9c2   :  { %v3961_v54 = vpop.f32.mrf.mxu1  ;;  %v3967_v46 = vpop.f32.mrf.mxu0 }
 0x9c3   :  { %3304 = vst.msk [vmem:[%s4784_s7 + $0x18] sm:$0xff] %vm78_vm0, %v3296_v59  ;;  %3305 = vst.msk [vmem:[%s4784_s7 + $0x20] sm:$0xff] %vm78_vm0, %v3297_v10 }
 0x9c4   :  { %v3118_v4 = vpop.f32.mrf.mxu1  ;;  %v3161_v42 = vpop.f32.mrf.mxu0 }
 0x9c6   :  { %v3962_v8 = vpop.f32.mrf.mxu1  ;;  %v3968_v49 = vpop.f32.mrf.mxu0 }
 0x9c8   :  { %v3201_v62 = vpop.f32.mrf.mxu1  ;;  %v3244_v2 = vpop.f32.mrf.mxu0 }
 0x9c9   :  { %v3298_v3 = vadd.f32 %v3201_v62, %v1295_v23  ;;  %v3299_v11 = vadd.f32 %v3244_v2, %v1300_v1 }
 0x9ca   :  { %v3973_v27 = vpop.f32.mrf.mxu1  ;;  %v3979_v45 = vpop.f32.mrf.mxu0 }
 0x9cb   :  { %3306 = vst.msk [vmem:[%s4784_s7 + $0x28] sm:$0xff] %vm78_vm0, %v3298_v3  ;;  %3307 = vst.msk [vmem:[%s4784_s7 + $0x30] sm:$0xff] %vm78_vm0, %v3299_v11 }
 0x9cc   :  { %v3204_v0 = vpop.f32.mrf.mxu1  ;;  %v3247_v48 = vpop.f32.mrf.mxu0 }
 0x9ce   :  { %v3974_v6 = vpop.f32.mrf.mxu1  ;;  %v3980_v52 = vpop.f32.mrf.mxu0 }
 0x9d0   :  { %v3287_v47 = vpop.f32.mrf.mxu1 }
 0x9d1   :  { %v3300_v28 = vadd.f32 %v3287_v47, %v1303_v13 }
 0x9d2   :  { %v3985_v14 = vpop.f32.mrf.mxu1 }
 0x9d3   :  { %3308 = vst.msk [vmem:[%s4784_s7 + $0x38] sm:$0xff] %vm78_vm0, %v3300_v28 }
 0x9d4   :  { %v3290_v50 = vpop.f32.mrf.mxu1 }
 0x9d6   :  { %v3986_v7 = vpop.f32.mrf.mxu1 }

</bundles_post_ra>
